<compile_context>
chip_gen: v7x
topology: tpu7x:2x2x1
jax: 0.10.0
libtpu: 0.0.40
codegen_flags: <defaults>
</compile_context>

<pallas_src>
import functools

import jax
import jax.numpy as jnp
from jax.experimental import pallas as pl
from jax.experimental.pallas import tpu as pltpu


# ------------------------------- Pallas kernel -------------------------------

def _tsception_fused_kernel(a_ref, tw_ref, pp_ref,
                            s1w_ref, s1b_ref, s2w_ref, s2b_ref,
                            fw_ref, fb_ref,
                            fc1w_ref, fc1b_ref, fc2w_ref, fc2b_ref,
                            o_ref, *,
                            num_elec, kh, hout, tc_pad, pool, num_t, num_s):
    f32 = jnp.float32
    bf16 = jnp.bfloat16

    def leaky(v):
        return jnp.where(v >= 0.0, v, 0.01 * v)        # PyTorch LeakyReLU default slope

    # ---- Tception: 3 branches merged in one matmul (per-branch bias via indicator cols) ----
    a = a_ref[0]                                                      # (E*Tc_pad*8, 3*k1+3) bf16
    y = jnp.dot(a, tw_ref[...], preferred_element_type=f32)          # (E*Tc_pad*8, num_T) f32
    y = leaky(y)
    # AvgPool(1, 8): layout-preserving sublane-group mean (no pooling matmul).
    out_t = jnp.mean(y.reshape(num_elec * tc_pad, pool, num_t), axis=1)
    out_t = out_t.reshape(num_elec, tc_pad, num_t).astype(bf16)       # rows grouped per electrode

    # ---- Sception1 / Sception2 (BN_t folded into weights): per-electrode matmuls ----
    acc1 = jnp.zeros((tc_pad, num_s), f32)
    acc2 = [jnp.zeros((tc_pad, num_s), f32) for _ in range(hout)]
    for e in range(num_elec):
        blk = out_t[e]                                                # (Tc_pad, num_T) bf16
        acc1 = acc1 + jnp.dot(blk, s1w_ref[e], preferred_element_type=f32)
        if e < hout * kh:
            acc2[e // kh] = acc2[e // kh] + jnp.dot(blk, s2w_ref[e % kh],
                                                    preferred_element_type=f32)
    u = [leaky(acc1 + s1b_ref[...])]                                  # height 0: Sception1
    for h in range(hout):                                             # heights 1..: Sception2
        u.append(leaky(acc2[h] + s2b_ref[...]))

    # ---- fusion conv (BN_s folded); AvgPool(1,2) commuted behind the linear conv ----
    v = fb_ref[...]                                                   # (1, num_S) -> broadcasts
    for h in range(1 + hout):
        v = v + jnp.dot(u[h].astype(bf16), fw_ref[h], preferred_element_type=f32)
    # pair-mean + keep the first 4*t4 pooled steps via a tiny precomputed bf16 matrix,
    # then LeakyReLU (matches conv -> LeakyReLU ordering after commuting the linear pool).
    g = leaky(jnp.dot(pp_ref[...], v.astype(bf16), preferred_element_type=f32))
    # AvgPool(1,4) followed by the temporal mean == one flat mean over the kept steps.
    feat = jnp.mean(g, axis=0, keepdims=True)                         # (1, num_S)

    # ---- fc head (BN_fusion folded into fc1); Dropout = identity in eval mode ----
    h1 = jnp.dot(feat.astype(bf16), fc1w_ref[...], preferred_element_type=f32) + fc1b_ref[...]
    h1 = jnp.maximum(h1, 0.0)
    logits = jnp.dot(h1.astype(bf16), fc2w_ref[...], preferred_element_type=f32) + fc2b_ref[...]
    o_ref[0] = logits.astype(o_ref.dtype)


# ----------------------------- parameter setup -------------------------------

def init_raw_params(key, *, num_electrodes, num_T, num_S, in_channels,
                    hid_channels, num_classes, sampling_rate):
    keys = iter(jax.random.split(key, 40))

    def w(shape, scale=0.1):
        return (scale * jax.random.normal(next(keys), shape)).astype(jnp.float32)

    def bn(C):
        return dict(
            gamma=jax.random.uniform(next(keys), (C,), minval=0.5, maxval=1.5).astype(jnp.float32),
            beta=w((C,)), mean=w((C,)),
            var=jax.random.uniform(next(keys), (C,), minval=0.5, maxval=1.5).astype(jnp.float32))

    k1 = int(0.5 * sampling_rate)
    k2 = int(0.25 * sampling_rate)
    k3 = int(0.125 * sampling_rate)
    kh = int(num_electrodes * 0.5)
    raw = {
        "t1_w": w((num_T, in_channels, 1, k1)), "t1_b": w((num_T,)),
        "t2_w": w((num_T, in_channels, 1, k2)), "t2_b": w((num_T,)),
        "t3_w": w((num_T, in_channels, 1, k3)), "t3_b": w((num_T,)),
        "s1_w": w((num_S, num_T, num_electrodes, 1)), "s1_b": w((num_S,)),
        "s2_w": w((num_S, num_T, kh, 1)), "s2_b": w((num_S,)),
        "f_w": w((num_S, num_S, 3, 1)), "f_b": w((num_S,)),
        "fc1_w": w((hid_channels, num_S)), "fc1_b": w((hid_channels,)),
        "fc2_w": w((num_classes, hid_channels)), "fc2_b": w((num_classes,)),
        "bn_t": bn(num_T), "bn_s": bn(num_S), "bn_f": bn(num_S),
    }
    return raw, dict(k1=k1, k2=k2, k3=k3, kh=kh)


def _bn_scale_shift(bn, eps=1e-5):
    scale = bn["gamma"] / jnp.sqrt(bn["var"] + eps)
    shift = bn["beta"] - bn["mean"] * scale
    return scale, shift


def prepare_inference_params(raw, *, num_T, num_S, num_electrodes, k1, k2, k3, kh):
    """Fold eval-mode BatchNorms forward into the next linear op and pre-arrange all
    conv weights as bf16 matmul operands for the fused kernel."""
    del num_electrodes  # shapes are carried by the raw arrays themselves
    bf16, f32 = jnp.bfloat16, jnp.float32
    s_t, t_t = _bn_scale_shift(raw["bn_t"])
    s_s, t_s = _bn_scale_shift(raw["bn_s"])
    s_f, t_f = _bn_scale_shift(raw["bn_f"])

    # Merged Tception weight: per-branch column blocks of taps + 3 bias indicator rows.
    Kt = 3 * k1 + 3
    t_w = jnp.zeros((Kt, num_T), f32)
    for br, (wk, bk, kb) in enumerate((("t1_w", "t1_b", k1),
                                       ("t2_w", "t2_b", k2),
                                       ("t3_w", "t3_b", k3))):
        taps = raw[wk].reshape(num_T, kb).T                         # (kb, num_T); in_channels==1
        t_w = t_w.at[br * k1:br * k1 + kb, :].set(taps)
        t_w = t_w.at[3 * k1 + br, :].set(raw[bk])

    def fold(wc, bc, scale, shift):
        # wc: (Cout, Cin, H); the folded BN (scale, shift) acts on the Cin channels.
        wf = wc * scale[None, :, None]
        bf_ = bc + jnp.sum(wc * shift[None, :, None], axis=(1, 2))
        return wf, bf_

    w1, s1_b = fold(raw["s1_w"][..., 0], raw["s1_b"], s_t, t_t)     # (num_S, num_T, E)
    w2, s2_b = fold(raw["s2_w"][..., 0], raw["s2_b"], s_t, t_t)     # (num_S, num_T, kh)
    wf, f_b = fold(raw["f_w"][..., 0], raw["f_b"], s_s, t_s)        # (num_S, num_S, 3)

    # BN_fusion -> fc1 (the temporal mean is linear, so the forward fold is exact).
    fc1_w = (raw["fc1_w"] * s_f[None, :]).T                          # (num_S, hid)
    fc1_b = raw["fc1_b"] + raw["fc1_w"] @ t_f
    fc2_w = raw["fc2_w"].T                                           # (hid, num_classes)
    fc2_b = raw["fc2_b"]

    return dict(
        t_w=t_w.astype(bf16),
        s1_w=jnp.transpose(w1, (2, 1, 0)).astype(bf16), s1_b=s1_b.reshape(1, -1).astype(f32),
        s2_w=jnp.transpose(w2, (2, 1, 0)).astype(bf16), s2_b=s2_b.reshape(1, -1).astype(f32),
        f_w=jnp.transpose(wf, (2, 1, 0)).astype(bf16), f_b=f_b.reshape(1, -1).astype(f32),
        fc1_w=fc1_w.astype(bf16), fc1_b=fc1_b.reshape(1, -1).astype(f32),
        fc2_w=fc2_w.astype(bf16), fc2_b=fc2_b.reshape(1, -1).astype(f32),
    )


# ---------------------------------- forward ----------------------------------

def tsception_forward(x_nchw, p, *, k1, k2, k3, kh, num_T, num_S):
    pool, s_pool, f_pool = 8, 2, 4        # module: pool=8, int(pool*0.25)=2, fusion pool=4
    B, Cin, E, T = x_nchw.shape
    assert Cin == 1                        # TODO(synk): in_channels > 1 unsupported
    hid = p["fc1_w"].shape[1]
    num_classes = p["fc2_w"].shape[1]

    ks = (k1, k2, k3)
    Tp = tuple((T - k + 1) // pool for k in ks)
    assert min(Tp) >= 1
    Tc = sum(Tp)
    Tc_pad = ((Tc + 7) // 8) * 8           # pad concat-time so electrode row blocks are 8-aligned
    Tps = Tc // s_pool
    t4 = Tps // f_pool
    assert t4 >= 1
    tuse = t4 * f_pool                     # pooled steps that survive AvgPool(1,4)
    hout = (E - kh) // kh + 1
    assert 1 + hout == 3                   # fusion conv kernel height is 3

    # ---- wrapper-side im2col for the merged Tception matmul ----
    x = x_nchw[:, 0].astype(jnp.float32)                             # (B, E, T)
    Kt = 3 * k1 + 3
    A = jnp.zeros((B, E, Tc_pad, pool, Kt), jnp.bfloat16)
    off = 0
    for br, (kb, tpb) in enumerate(zip(ks, Tp)):
        idx = jnp.arange(tpb * pool)[:, None] + jnp.arange(kb)[None, :]
        win = x[:, :, idx].astype(jnp.bfloat16).reshape(B, E, tpb, pool, kb)
        A = A.at[:, :, off:off + tpb, :, br * k1:br * k1 + kb].set(win)
        A = A.at[:, :, off:off + tpb, :, 3 * k1 + br].set(1.0)       # bias indicator column
        off += tpb
    A = A.reshape(B, E * Tc_pad * pool, Kt)

    # AvgPool(1,2) + crop-to-first-4*t4-steps as one tiny constant bf16 matrix (precomputed
    # in the wrapper, constant index_map -- never rebuilt inside the kernel).
    mm = jnp.arange(tuse)[:, None]
    tt = jnp.arange(Tc_pad)[None, :]
    pp = (((tt == 2 * mm) | (tt == 2 * mm + 1)).astype(jnp.float32) * 0.5).astype(jnp.bfloat16)

    Mt = E * Tc_pad * pool
    kernel = functools.partial(
        _tsception_fused_kernel, num_elec=E, kh=kh, hout=hout,
        tc_pad=Tc_pad, pool=pool, num_t=num_T, num_s=num_S)

    out = pl.pallas_call(
        kernel,
        out_shape=jax.ShapeDtypeStruct((B, 1, num_classes), jnp.float32),
        grid=(B,),
        in_specs=[
            pl.BlockSpec((1, Mt, Kt), lambda b: (b, 0, 0)),           # im2col'd sample
            pl.BlockSpec((Kt, num_T), lambda b: (0, 0)),              # merged Tception weights
            pl.BlockSpec((tuse, Tc_pad), lambda b: (0, 0)),           # pair-pool matrix
            pl.BlockSpec((E, num_T, num_S), lambda b: (0, 0, 0)),     # Sception1 (BN_t folded)
            pl.BlockSpec((1, num_S), lambda b: (0, 0)),
            pl.BlockSpec((kh, num_T, num_S), lambda b: (0, 0, 0)),    # Sception2 (BN_t folded)
            pl.BlockSpec((1, num_S), lambda b: (0, 0)),
            pl.BlockSpec((3, num_S, num_S), lambda b: (0, 0, 0)),     # fusion conv (BN_s folded)
            pl.BlockSpec((1, num_S), lambda b: (0, 0)),
            pl.BlockSpec((num_S, hid), lambda b: (0, 0)),             # fc1 (BN_fusion folded)
            pl.BlockSpec((1, hid), lambda b: (0, 0)),
            pl.BlockSpec((hid, num_classes), lambda b: (0, 0)),       # fc2
            pl.BlockSpec((1, num_classes), lambda b: (0, 0)),
        ],
        out_specs=pl.BlockSpec((1, 1, num_classes), lambda b: (b, 0, 0)),
        compiler_params=pltpu.CompilerParams(dimension_semantics=("parallel",)),
    )(A, p["t_w"], pp, p["s1_w"], p["s1_b"], p["s2_w"], p["s2_b"],
      p["f_w"], p["f_b"], p["fc1_w"], p["fc1_b"], p["fc2_w"], p["fc2_b"])
    return out[:, 0, :]                                               # (B, num_classes)


# ------------------------------------ main ------------------------------------

if __name__ == "__main__":
    cfg = dict(num_electrodes=8, num_T=15, num_S=15, in_channels=1,
               hid_channels=32, num_classes=2, sampling_rate=32)
    B, T = 2, 64

    key = jax.random.PRNGKey(0)
    kx, kp = jax.random.split(key)
    x = jax.random.normal(kx, (B, cfg["in_channels"], cfg["num_electrodes"], T),
                          dtype=jnp.float32)                          # NCHW, like PyTorch

    raw, dims = init_raw_params(kp, **cfg)
    params = prepare_inference_params(raw, num_T=cfg["num_T"], num_S=cfg["num_S"],
                                      num_electrodes=cfg["num_electrodes"], **dims)

    fwd = jax.jit(functools.partial(tsception_forward,
                                    num_T=cfg["num_T"], num_S=cfg["num_S"], **dims))
    out = jax.block_until_ready(fwd(x, params))
    assert out.shape == (B, cfg["num_classes"]), out.shape
    assert bool(jnp.all(jnp.isfinite(out)))
    print("KERNEL_OK")
</pallas_src>

<mosaic_0001>
module attributes {stable_mosaic.version = 11 : i64} {
  func.func @_tsception_fused_kernel(%arg0: i32, %arg1: memref<1x1536x51xbf16, #tpu.memory_space<vmem>>, %arg2: memref<51x15xbf16, #tpu.memory_space<vmem>>, %arg3: memref<8x24xbf16, #tpu.memory_space<vmem>>, %arg4: memref<8x15x15xbf16, #tpu.memory_space<vmem>>, %arg5: memref<1x15xf32, #tpu.memory_space<vmem>>, %arg6: memref<4x15x15xbf16, #tpu.memory_space<vmem>>, %arg7: memref<1x15xf32, #tpu.memory_space<vmem>>, %arg8: memref<3x15x15xbf16, #tpu.memory_space<vmem>>, %arg9: memref<1x15xf32, #tpu.memory_space<vmem>>, %arg10: memref<15x32xbf16, #tpu.memory_space<vmem>>, %arg11: memref<1x32xf32, #tpu.memory_space<vmem>>, %arg12: memref<32x2xbf16, #tpu.memory_space<vmem>>, %arg13: memref<1x2xf32, #tpu.memory_space<vmem>>, %arg14: memref<1x1x2xf32, #tpu.memory_space<vmem>>) attributes {dimension_semantics = [#tpu.dimension_semantics<parallel>], iteration_bounds = array<i64: 2>, scalar_prefetch = 0 : i64, scratch_operands = 0 : i64, tpu.core_type = #tpu.core_type<tc>, window_params = [{transform_indices = @transform_0, window_bounds = array<i64: 1, 1536, 51>}, {pipeline_mode = #tpu.pipeline_mode<synchronous>, transform_indices = @transform_1, window_bounds = array<i64: 51, 15>}, {pipeline_mode = #tpu.pipeline_mode<synchronous>, transform_indices = @transform_2, window_bounds = array<i64: 8, 24>}, {pipeline_mode = #tpu.pipeline_mode<synchronous>, transform_indices = @transform_3, window_bounds = array<i64: 8, 15, 15>}, {pipeline_mode = #tpu.pipeline_mode<synchronous>, transform_indices = @transform_4, window_bounds = array<i64: 1, 15>}, {pipeline_mode = #tpu.pipeline_mode<synchronous>, transform_indices = @transform_5, window_bounds = array<i64: 4, 15, 15>}, {pipeline_mode = #tpu.pipeline_mode<synchronous>, transform_indices = @transform_6, window_bounds = array<i64: 1, 15>}, {pipeline_mode = #tpu.pipeline_mode<synchronous>, transform_indices = @transform_7, window_bounds = array<i64: 3, 15, 15>}, {pipeline_mode = #tpu.pipeline_mode<synchronous>, transform_indices = @transform_8, window_bounds = array<i64: 1, 15>}, {pipeline_mode = #tpu.pipeline_mode<synchronous>, transform_indices = @transform_9, window_bounds = array<i64: 15, 32>}, {pipeline_mode = #tpu.pipeline_mode<synchronous>, transform_indices = @transform_10, window_bounds = array<i64: 1, 32>}, {pipeline_mode = #tpu.pipeline_mode<synchronous>, transform_indices = @transform_11, window_bounds = array<i64: 32, 2>}, {pipeline_mode = #tpu.pipeline_mode<synchronous>, transform_indices = @transform_12, window_bounds = array<i64: 1, 2>}, {transform_indices = @transform_13, window_bounds = array<i64: 1, 1, 2>}]} {
    %c0 = arith.constant 0 : index
    %c0_0 = arith.constant 0 : index
    %c0_1 = arith.constant 0 : index
    %0 = vector.load %arg1[%c0, %c0_0, %c0_1] : memref<1x1536x51xbf16, #tpu.memory_space<vmem>>, vector<1x1536x51xbf16>
    %1 = vector.shape_cast %0 : vector<1x1536x51xbf16> to vector<1536x51xbf16>
    %c0_2 = arith.constant 0 : index
    %c0_3 = arith.constant 0 : index
    %2 = vector.load %arg2[%c0_2, %c0_3] : memref<51x15xbf16, #tpu.memory_space<vmem>>, vector<51x15xbf16>
    %cst = arith.constant dense<0.000000e+00> : vector<1536x15xf32>
    %3 = tpu.matmul %1, %2, %cst {dimension_numbers = #tpu.dot_dimension_numbers<[1], [0], [0], [1], [0, 0, 1, 1], [], []>} : vector<1536x51xbf16>, vector<51x15xbf16>, vector<1536x15xf32> -> vector<1536x15xf32>
    %cst_4 = arith.constant 0.000000e+00 : f32
    %4 = vector.broadcast %cst_4 : f32 to vector<1536x15xf32>
    %5 = arith.cmpf oge, %3, %4 : vector<1536x15xf32>
    %cst_5 = arith.constant 0.00999999977 : f32
    %6 = vector.broadcast %cst_5 : f32 to vector<1536x15xf32>
    %7 = arith.mulf %6, %3 : vector<1536x15xf32>
    %8 = arith.select %5, %3, %7 : vector<1536x15xi1>, vector<1536x15xf32>
    %9 = vector.shape_cast %8 : vector<1536x15xf32> to vector<192x8x15xf32>
    %cst_6 = arith.constant dense<0.000000e+00> : vector<192x15xf32>
    %10 = vector.multi_reduction <add>, %9, %cst_6 [1] : vector<192x8x15xf32> to vector<192x15xf32>
    %cst_7 = arith.constant 8.000000e+00 : f32
    %11 = vector.broadcast %cst_7 : f32 to vector<192x15xf32>
    %12 = arith.divf %10, %11 : vector<192x15xf32>
    %13 = vector.shape_cast %12 : vector<192x15xf32> to vector<8x24x15xf32>
    %14 = arith.truncf %13 : vector<8x24x15xf32> to vector<8x24x15xbf16>
    %cst_8 = arith.constant 0.000000e+00 : f32
    %15 = vector.broadcast %cst_8 : f32 to vector<24x15xf32>
    %cst_9 = arith.constant 0.000000e+00 : f32
    %16 = vector.broadcast %cst_9 : f32 to vector<24x15xf32>
    %cst_10 = arith.constant 0.000000e+00 : f32
    %17 = vector.broadcast %cst_10 : f32 to vector<24x15xf32>
    %18 = vector.extract_strided_slice %14 {offsets = [0, 0, 0], sizes = [1, 24, 15], strides = [1, 1, 1]} : vector<8x24x15xbf16> to vector<1x24x15xbf16>
    %19 = vector.shape_cast %18 : vector<1x24x15xbf16> to vector<24x15xbf16>
    %c0_11 = arith.constant 0 : index
    %c0_12 = arith.constant 0 : index
    %c0_13 = arith.constant 0 : index
    %20 = vector.load %arg4[%c0_11, %c0_12, %c0_13] : memref<8x15x15xbf16, #tpu.memory_space<vmem>>, vector<1x15x15xbf16>
    %21 = vector.shape_cast %20 : vector<1x15x15xbf16> to vector<15x15xbf16>
    %cst_14 = arith.constant dense<0.000000e+00> : vector<24x15xf32>
    %22 = tpu.matmul %19, %21, %cst_14 {dimension_numbers = #tpu.dot_dimension_numbers<[1], [0], [0], [1], [0, 0, 1, 1], [], []>} : vector<24x15xbf16>, vector<15x15xbf16>, vector<24x15xf32> -> vector<24x15xf32>
    %23 = arith.addf %15, %22 : vector<24x15xf32>
    %c0_15 = arith.constant 0 : index
    %c0_16 = arith.constant 0 : index
    %c0_17 = arith.constant 0 : index
    %24 = vector.load %arg6[%c0_15, %c0_16, %c0_17] : memref<4x15x15xbf16, #tpu.memory_space<vmem>>, vector<1x15x15xbf16>
    %25 = vector.shape_cast %24 : vector<1x15x15xbf16> to vector<15x15xbf16>
    %cst_18 = arith.constant dense<0.000000e+00> : vector<24x15xf32>
    %26 = tpu.matmul %19, %25, %cst_18 {dimension_numbers = #tpu.dot_dimension_numbers<[1], [0], [0], [1], [0, 0, 1, 1], [], []>} : vector<24x15xbf16>, vector<15x15xbf16>, vector<24x15xf32> -> vector<24x15xf32>
    %27 = arith.addf %16, %26 : vector<24x15xf32>
    %28 = vector.extract_strided_slice %14 {offsets = [1, 0, 0], sizes = [1, 24, 15], strides = [1, 1, 1]} : vector<8x24x15xbf16> to vector<1x24x15xbf16>
    %29 = vector.shape_cast %28 : vector<1x24x15xbf16> to vector<24x15xbf16>
    %c1 = arith.constant 1 : index
    %c0_19 = arith.constant 0 : index
    %c0_20 = arith.constant 0 : index
    %30 = vector.load %arg4[%c1, %c0_19, %c0_20] : memref<8x15x15xbf16, #tpu.memory_space<vmem>>, vector<1x15x15xbf16>
    %31 = vector.shape_cast %30 : vector<1x15x15xbf16> to vector<15x15xbf16>
    %cst_21 = arith.constant dense<0.000000e+00> : vector<24x15xf32>
    %32 = tpu.matmul %29, %31, %cst_21 {dimension_numbers = #tpu.dot_dimension_numbers<[1], [0], [0], [1], [0, 0, 1, 1], [], []>} : vector<24x15xbf16>, vector<15x15xbf16>, vector<24x15xf32> -> vector<24x15xf32>
    %33 = arith.addf %23, %32 : vector<24x15xf32>
    %c1_22 = arith.constant 1 : index
    %c0_23 = arith.constant 0 : index
    %c0_24 = arith.constant 0 : index
    %34 = vector.load %arg6[%c1_22, %c0_23, %c0_24] : memref<4x15x15xbf16, #tpu.memory_space<vmem>>, vector<1x15x15xbf16>
    %35 = vector.shape_cast %34 : vector<1x15x15xbf16> to vector<15x15xbf16>
    %cst_25 = arith.constant dense<0.000000e+00> : vector<24x15xf32>
    %36 = tpu.matmul %29, %35, %cst_25 {dimension_numbers = #tpu.dot_dimension_numbers<[1], [0], [0], [1], [0, 0, 1, 1], [], []>} : vector<24x15xbf16>, vector<15x15xbf16>, vector<24x15xf32> -> vector<24x15xf32>
    %37 = arith.addf %27, %36 : vector<24x15xf32>
    %38 = vector.extract_strided_slice %14 {offsets = [2, 0, 0], sizes = [1, 24, 15], strides = [1, 1, 1]} : vector<8x24x15xbf16> to vector<1x24x15xbf16>
    %39 = vector.shape_cast %38 : vector<1x24x15xbf16> to vector<24x15xbf16>
    %c2 = arith.constant 2 : index
    %c0_26 = arith.constant 0 : index
    %c0_27 = arith.constant 0 : index
    %40 = vector.load %arg4[%c2, %c0_26, %c0_27] : memref<8x15x15xbf16, #tpu.memory_space<vmem>>, vector<1x15x15xbf16>
    %41 = vector.shape_cast %40 : vector<1x15x15xbf16> to vector<15x15xbf16>
    %cst_28 = arith.constant dense<0.000000e+00> : vector<24x15xf32>
    %42 = tpu.matmul %39, %41, %cst_28 {dimension_numbers = #tpu.dot_dimension_numbers<[1], [0], [0], [1], [0, 0, 1, 1], [], []>} : vector<24x15xbf16>, vector<15x15xbf16>, vector<24x15xf32> -> vector<24x15xf32>
    %43 = arith.addf %33, %42 : vector<24x15xf32>
    %c2_29 = arith.constant 2 : index
    %c0_30 = arith.constant 0 : index
    %c0_31 = arith.constant 0 : index
    %44 = vector.load %arg6[%c2_29, %c0_30, %c0_31] : memref<4x15x15xbf16, #tpu.memory_space<vmem>>, vector<1x15x15xbf16>
    %45 = vector.shape_cast %44 : vector<1x15x15xbf16> to vector<15x15xbf16>
    %cst_32 = arith.constant dense<0.000000e+00> : vector<24x15xf32>
    %46 = tpu.matmul %39, %45, %cst_32 {dimension_numbers = #tpu.dot_dimension_numbers<[1], [0], [0], [1], [0, 0, 1, 1], [], []>} : vector<24x15xbf16>, vector<15x15xbf16>, vector<24x15xf32> -> vector<24x15xf32>
    %47 = arith.addf %37, %46 : vector<24x15xf32>
    %48 = vector.extract_strided_slice %14 {offsets = [3, 0, 0], sizes = [1, 24, 15], strides = [1, 1, 1]} : vector<8x24x15xbf16> to vector<1x24x15xbf16>
    %49 = vector.shape_cast %48 : vector<1x24x15xbf16> to vector<24x15xbf16>
    %c3 = arith.constant 3 : index
    %c0_33 = arith.constant 0 : index
    %c0_34 = arith.constant 0 : index
    %50 = vector.load %arg4[%c3, %c0_33, %c0_34] : memref<8x15x15xbf16, #tpu.memory_space<vmem>>, vector<1x15x15xbf16>
    %51 = vector.shape_cast %50 : vector<1x15x15xbf16> to vector<15x15xbf16>
    %cst_35 = arith.constant dense<0.000000e+00> : vector<24x15xf32>
    %52 = tpu.matmul %49, %51, %cst_35 {dimension_numbers = #tpu.dot_dimension_numbers<[1], [0], [0], [1], [0, 0, 1, 1], [], []>} : vector<24x15xbf16>, vector<15x15xbf16>, vector<24x15xf32> -> vector<24x15xf32>
    %53 = arith.addf %43, %52 : vector<24x15xf32>
    %c3_36 = arith.constant 3 : index
    %c0_37 = arith.constant 0 : index
    %c0_38 = arith.constant 0 : index
    %54 = vector.load %arg6[%c3_36, %c0_37, %c0_38] : memref<4x15x15xbf16, #tpu.memory_space<vmem>>, vector<1x15x15xbf16>
    %55 = vector.shape_cast %54 : vector<1x15x15xbf16> to vector<15x15xbf16>
    %cst_39 = arith.constant dense<0.000000e+00> : vector<24x15xf32>
    %56 = tpu.matmul %49, %55, %cst_39 {dimension_numbers = #tpu.dot_dimension_numbers<[1], [0], [0], [1], [0, 0, 1, 1], [], []>} : vector<24x15xbf16>, vector<15x15xbf16>, vector<24x15xf32> -> vector<24x15xf32>
    %57 = arith.addf %47, %56 : vector<24x15xf32>
    %58 = vector.extract_strided_slice %14 {offsets = [4, 0, 0], sizes = [1, 24, 15], strides = [1, 1, 1]} : vector<8x24x15xbf16> to vector<1x24x15xbf16>
    %59 = vector.shape_cast %58 : vector<1x24x15xbf16> to vector<24x15xbf16>
    %c4 = arith.constant 4 : index
    %c0_40 = arith.constant 0 : index
    %c0_41 = arith.constant 0 : index
    %60 = vector.load %arg4[%c4, %c0_40, %c0_41] : memref<8x15x15xbf16, #tpu.memory_space<vmem>>, vector<1x15x15xbf16>
    %61 = vector.shape_cast %60 : vector<1x15x15xbf16> to vector<15x15xbf16>
    %cst_42 = arith.constant dense<0.000000e+00> : vector<24x15xf32>
    %62 = tpu.matmul %59, %61, %cst_42 {dimension_numbers = #tpu.dot_dimension_numbers<[1], [0], [0], [1], [0, 0, 1, 1], [], []>} : vector<24x15xbf16>, vector<15x15xbf16>, vector<24x15xf32> -> vector<24x15xf32>
    %63 = arith.addf %53, %62 : vector<24x15xf32>
    %c0_43 = arith.constant 0 : index
    %c0_44 = arith.constant 0 : index
    %c0_45 = arith.constant 0 : index
    %64 = vector.load %arg6[%c0_43, %c0_44, %c0_45] : memref<4x15x15xbf16, #tpu.memory_space<vmem>>, vector<1x15x15xbf16>
    %65 = vector.shape_cast %64 : vector<1x15x15xbf16> to vector<15x15xbf16>
    %cst_46 = arith.constant dense<0.000000e+00> : vector<24x15xf32>
    %66 = tpu.matmul %59, %65, %cst_46 {dimension_numbers = #tpu.dot_dimension_numbers<[1], [0], [0], [1], [0, 0, 1, 1], [], []>} : vector<24x15xbf16>, vector<15x15xbf16>, vector<24x15xf32> -> vector<24x15xf32>
    %67 = arith.addf %17, %66 : vector<24x15xf32>
    %68 = vector.extract_strided_slice %14 {offsets = [5, 0, 0], sizes = [1, 24, 15], strides = [1, 1, 1]} : vector<8x24x15xbf16> to vector<1x24x15xbf16>
    %69 = vector.shape_cast %68 : vector<1x24x15xbf16> to vector<24x15xbf16>
    %c5 = arith.constant 5 : index
    %c0_47 = arith.constant 0 : index
    %c0_48 = arith.constant 0 : index
    %70 = vector.load %arg4[%c5, %c0_47, %c0_48] : memref<8x15x15xbf16, #tpu.memory_space<vmem>>, vector<1x15x15xbf16>
    %71 = vector.shape_cast %70 : vector<1x15x15xbf16> to vector<15x15xbf16>
    %cst_49 = arith.constant dense<0.000000e+00> : vector<24x15xf32>
    %72 = tpu.matmul %69, %71, %cst_49 {dimension_numbers = #tpu.dot_dimension_numbers<[1], [0], [0], [1], [0, 0, 1, 1], [], []>} : vector<24x15xbf16>, vector<15x15xbf16>, vector<24x15xf32> -> vector<24x15xf32>
    %73 = arith.addf %63, %72 : vector<24x15xf32>
    %c1_50 = arith.constant 1 : index
    %c0_51 = arith.constant 0 : index
    %c0_52 = arith.constant 0 : index
    %74 = vector.load %arg6[%c1_50, %c0_51, %c0_52] : memref<4x15x15xbf16, #tpu.memory_space<vmem>>, vector<1x15x15xbf16>
    %75 = vector.shape_cast %74 : vector<1x15x15xbf16> to vector<15x15xbf16>
    %cst_53 = arith.constant dense<0.000000e+00> : vector<24x15xf32>
    %76 = tpu.matmul %69, %75, %cst_53 {dimension_numbers = #tpu.dot_dimension_numbers<[1], [0], [0], [1], [0, 0, 1, 1], [], []>} : vector<24x15xbf16>, vector<15x15xbf16>, vector<24x15xf32> -> vector<24x15xf32>
    %77 = arith.addf %67, %76 : vector<24x15xf32>
    %78 = vector.extract_strided_slice %14 {offsets = [6, 0, 0], sizes = [1, 24, 15], strides = [1, 1, 1]} : vector<8x24x15xbf16> to vector<1x24x15xbf16>
    %79 = vector.shape_cast %78 : vector<1x24x15xbf16> to vector<24x15xbf16>
    %c6 = arith.constant 6 : index
    %c0_54 = arith.constant 0 : index
    %c0_55 = arith.constant 0 : index
    %80 = vector.load %arg4[%c6, %c0_54, %c0_55] : memref<8x15x15xbf16, #tpu.memory_space<vmem>>, vector<1x15x15xbf16>
    %81 = vector.shape_cast %80 : vector<1x15x15xbf16> to vector<15x15xbf16>
    %cst_56 = arith.constant dense<0.000000e+00> : vector<24x15xf32>
    %82 = tpu.matmul %79, %81, %cst_56 {dimension_numbers = #tpu.dot_dimension_numbers<[1], [0], [0], [1], [0, 0, 1, 1], [], []>} : vector<24x15xbf16>, vector<15x15xbf16>, vector<24x15xf32> -> vector<24x15xf32>
    %83 = arith.addf %73, %82 : vector<24x15xf32>
    %c2_57 = arith.constant 2 : index
    %c0_58 = arith.constant 0 : index
    %c0_59 = arith.constant 0 : index
    %84 = vector.load %arg6[%c2_57, %c0_58, %c0_59] : memref<4x15x15xbf16, #tpu.memory_space<vmem>>, vector<1x15x15xbf16>
    %85 = vector.shape_cast %84 : vector<1x15x15xbf16> to vector<15x15xbf16>
    %cst_60 = arith.constant dense<0.000000e+00> : vector<24x15xf32>
    %86 = tpu.matmul %79, %85, %cst_60 {dimension_numbers = #tpu.dot_dimension_numbers<[1], [0], [0], [1], [0, 0, 1, 1], [], []>} : vector<24x15xbf16>, vector<15x15xbf16>, vector<24x15xf32> -> vector<24x15xf32>
    %87 = arith.addf %77, %86 : vector<24x15xf32>
    %88 = vector.extract_strided_slice %14 {offsets = [7, 0, 0], sizes = [1, 24, 15], strides = [1, 1, 1]} : vector<8x24x15xbf16> to vector<1x24x15xbf16>
    %89 = vector.shape_cast %88 : vector<1x24x15xbf16> to vector<24x15xbf16>
    %c7 = arith.constant 7 : index
    %c0_61 = arith.constant 0 : index
    %c0_62 = arith.constant 0 : index
    %90 = vector.load %arg4[%c7, %c0_61, %c0_62] : memref<8x15x15xbf16, #tpu.memory_space<vmem>>, vector<1x15x15xbf16>
    %91 = vector.shape_cast %90 : vector<1x15x15xbf16> to vector<15x15xbf16>
    %cst_63 = arith.constant dense<0.000000e+00> : vector<24x15xf32>
    %92 = tpu.matmul %89, %91, %cst_63 {dimension_numbers = #tpu.dot_dimension_numbers<[1], [0], [0], [1], [0, 0, 1, 1], [], []>} : vector<24x15xbf16>, vector<15x15xbf16>, vector<24x15xf32> -> vector<24x15xf32>
    %93 = arith.addf %83, %92 : vector<24x15xf32>
    %c3_64 = arith.constant 3 : index
    %c0_65 = arith.constant 0 : index
    %c0_66 = arith.constant 0 : index
    %94 = vector.load %arg6[%c3_64, %c0_65, %c0_66] : memref<4x15x15xbf16, #tpu.memory_space<vmem>>, vector<1x15x15xbf16>
    %95 = vector.shape_cast %94 : vector<1x15x15xbf16> to vector<15x15xbf16>
    %cst_67 = arith.constant dense<0.000000e+00> : vector<24x15xf32>
    %96 = tpu.matmul %89, %95, %cst_67 {dimension_numbers = #tpu.dot_dimension_numbers<[1], [0], [0], [1], [0, 0, 1, 1], [], []>} : vector<24x15xbf16>, vector<15x15xbf16>, vector<24x15xf32> -> vector<24x15xf32>
    %97 = arith.addf %87, %96 : vector<24x15xf32>
    %c0_68 = arith.constant 0 : index
    %c0_69 = arith.constant 0 : index
    %98 = vector.load %arg5[%c0_68, %c0_69] : memref<1x15xf32, #tpu.memory_space<vmem>>, vector<1x15xf32>
    %99 = vector.broadcast %98 : vector<1x15xf32> to vector<24x15xf32>
    %100 = arith.addf %93, %99 : vector<24x15xf32>
    %cst_70 = arith.constant 0.000000e+00 : f32
    %101 = vector.broadcast %cst_70 : f32 to vector<24x15xf32>
    %102 = arith.cmpf oge, %100, %101 : vector<24x15xf32>
    %cst_71 = arith.constant 0.00999999977 : f32
    %103 = vector.broadcast %cst_71 : f32 to vector<24x15xf32>
    %104 = arith.mulf %103, %100 : vector<24x15xf32>
    %105 = arith.select %102, %100, %104 : vector<24x15xi1>, vector<24x15xf32>
    %c0_72 = arith.constant 0 : index
    %c0_73 = arith.constant 0 : index
    %106 = vector.load %arg7[%c0_72, %c0_73] : memref<1x15xf32, #tpu.memory_space<vmem>>, vector<1x15xf32>
    %107 = vector.broadcast %106 : vector<1x15xf32> to vector<24x15xf32>
    %108 = arith.addf %57, %107 : vector<24x15xf32>
    %cst_74 = arith.constant 0.000000e+00 : f32
    %109 = vector.broadcast %cst_74 : f32 to vector<24x15xf32>
    %110 = arith.cmpf oge, %108, %109 : vector<24x15xf32>
    %cst_75 = arith.constant 0.00999999977 : f32
    %111 = vector.broadcast %cst_75 : f32 to vector<24x15xf32>
    %112 = arith.mulf %111, %108 : vector<24x15xf32>
    %113 = arith.select %110, %108, %112 : vector<24x15xi1>, vector<24x15xf32>
    %c0_76 = arith.constant 0 : index
    %c0_77 = arith.constant 0 : index
    %114 = vector.load %arg7[%c0_76, %c0_77] : memref<1x15xf32, #tpu.memory_space<vmem>>, vector<1x15xf32>
    %115 = vector.broadcast %114 : vector<1x15xf32> to vector<24x15xf32>
    %116 = arith.addf %97, %115 : vector<24x15xf32>
    %cst_78 = arith.constant 0.000000e+00 : f32
    %117 = vector.broadcast %cst_78 : f32 to vector<24x15xf32>
    %118 = arith.cmpf oge, %116, %117 : vector<24x15xf32>
    %cst_79 = arith.constant 0.00999999977 : f32
    %119 = vector.broadcast %cst_79 : f32 to vector<24x15xf32>
    %120 = arith.mulf %119, %116 : vector<24x15xf32>
    %121 = arith.select %118, %116, %120 : vector<24x15xi1>, vector<24x15xf32>
    %c0_80 = arith.constant 0 : index
    %c0_81 = arith.constant 0 : index
    %122 = vector.load %arg9[%c0_80, %c0_81] : memref<1x15xf32, #tpu.memory_space<vmem>>, vector<1x15xf32>
    %123 = arith.truncf %105 : vector<24x15xf32> to vector<24x15xbf16>
    %c0_82 = arith.constant 0 : index
    %c0_83 = arith.constant 0 : index
    %c0_84 = arith.constant 0 : index
    %124 = vector.load %arg8[%c0_82, %c0_83, %c0_84] : memref<3x15x15xbf16, #tpu.memory_space<vmem>>, vector<1x15x15xbf16>
    %125 = vector.shape_cast %124 : vector<1x15x15xbf16> to vector<15x15xbf16>
    %cst_85 = arith.constant dense<0.000000e+00> : vector<24x15xf32>
    %126 = tpu.matmul %123, %125, %cst_85 {dimension_numbers = #tpu.dot_dimension_numbers<[1], [0], [0], [1], [0, 0, 1, 1], [], []>} : vector<24x15xbf16>, vector<15x15xbf16>, vector<24x15xf32> -> vector<24x15xf32>
    %127 = vector.broadcast %122 : vector<1x15xf32> to vector<24x15xf32>
    %128 = arith.addf %127, %126 : vector<24x15xf32>
    %129 = arith.truncf %113 : vector<24x15xf32> to vector<24x15xbf16>
    %c1_86 = arith.constant 1 : index
    %c0_87 = arith.constant 0 : index
    %c0_88 = arith.constant 0 : index
    %130 = vector.load %arg8[%c1_86, %c0_87, %c0_88] : memref<3x15x15xbf16, #tpu.memory_space<vmem>>, vector<1x15x15xbf16>
    %131 = vector.shape_cast %130 : vector<1x15x15xbf16> to vector<15x15xbf16>
    %cst_89 = arith.constant dense<0.000000e+00> : vector<24x15xf32>
    %132 = tpu.matmul %129, %131, %cst_89 {dimension_numbers = #tpu.dot_dimension_numbers<[1], [0], [0], [1], [0, 0, 1, 1], [], []>} : vector<24x15xbf16>, vector<15x15xbf16>, vector<24x15xf32> -> vector<24x15xf32>
    %133 = arith.addf %128, %132 : vector<24x15xf32>
    %134 = arith.truncf %121 : vector<24x15xf32> to vector<24x15xbf16>
    %c2_90 = arith.constant 2 : index
    %c0_91 = arith.constant 0 : index
    %c0_92 = arith.constant 0 : index
    %135 = vector.load %arg8[%c2_90, %c0_91, %c0_92] : memref<3x15x15xbf16, #tpu.memory_space<vmem>>, vector<1x15x15xbf16>
    %136 = vector.shape_cast %135 : vector<1x15x15xbf16> to vector<15x15xbf16>
    %cst_93 = arith.constant dense<0.000000e+00> : vector<24x15xf32>
    %137 = tpu.matmul %134, %136, %cst_93 {dimension_numbers = #tpu.dot_dimension_numbers<[1], [0], [0], [1], [0, 0, 1, 1], [], []>} : vector<24x15xbf16>, vector<15x15xbf16>, vector<24x15xf32> -> vector<24x15xf32>
    %138 = arith.addf %133, %137 : vector<24x15xf32>
    %c0_94 = arith.constant 0 : index
    %c0_95 = arith.constant 0 : index
    %139 = vector.load %arg3[%c0_94, %c0_95] : memref<8x24xbf16, #tpu.memory_space<vmem>>, vector<8x24xbf16>
    %140 = arith.truncf %138 : vector<24x15xf32> to vector<24x15xbf16>
    %cst_96 = arith.constant dense<0.000000e+00> : vector<8x15xf32>
    %141 = tpu.matmul %139, %140, %cst_96 {dimension_numbers = #tpu.dot_dimension_numbers<[1], [0], [0], [1], [0, 0, 1, 1], [], []>} : vector<8x24xbf16>, vector<24x15xbf16>, vector<8x15xf32> -> vector<8x15xf32>
    %cst_97 = arith.constant 0.000000e+00 : f32
    %142 = vector.broadcast %cst_97 : f32 to vector<8x15xf32>
    %143 = arith.cmpf oge, %141, %142 : vector<8x15xf32>
    %cst_98 = arith.constant 0.00999999977 : f32
    %144 = vector.broadcast %cst_98 : f32 to vector<8x15xf32>
    %145 = arith.mulf %144, %141 : vector<8x15xf32>
    %146 = arith.select %143, %141, %145 : vector<8x15xi1>, vector<8x15xf32>
    %cst_99 = arith.constant dense<0.000000e+00> : vector<15xf32>
    %147 = vector.multi_reduction <add>, %146, %cst_99 [0] : vector<8x15xf32> to vector<15xf32>
    %148 = vector.shape_cast %147 : vector<15xf32> to vector<1x15xf32>
    %cst_100 = arith.constant 8.000000e+00 : f32
    %149 = vector.broadcast %cst_100 : f32 to vector<1x15xf32>
    %150 = arith.divf %148, %149 : vector<1x15xf32>
    %151 = arith.truncf %150 : vector<1x15xf32> to vector<1x15xbf16>
    %c0_101 = arith.constant 0 : index
    %c0_102 = arith.constant 0 : index
    %152 = vector.load %arg10[%c0_101, %c0_102] : memref<15x32xbf16, #tpu.memory_space<vmem>>, vector<15x32xbf16>
    %cst_103 = arith.constant dense<0.000000e+00> : vector<1x32xf32>
    %153 = tpu.matmul %151, %152, %cst_103 {dimension_numbers = #tpu.dot_dimension_numbers<[1], [0], [0], [1], [0, 0, 1, 1], [], []>} : vector<1x15xbf16>, vector<15x32xbf16>, vector<1x32xf32> -> vector<1x32xf32>
    %c0_104 = arith.constant 0 : index
    %c0_105 = arith.constant 0 : index
    %154 = vector.load %arg11[%c0_104, %c0_105] : memref<1x32xf32, #tpu.memory_space<vmem>>, vector<1x32xf32>
    %155 = arith.addf %153, %154 : vector<1x32xf32>
    %cst_106 = arith.constant 0.000000e+00 : f32
    %156 = vector.broadcast %cst_106 : f32 to vector<1x32xf32>
    %157 = arith.maximumf %155, %156 : vector<1x32xf32>
    %158 = arith.truncf %157 : vector<1x32xf32> to vector<1x32xbf16>
    %c0_107 = arith.constant 0 : index
    %c0_108 = arith.constant 0 : index
    %159 = vector.load %arg12[%c0_107, %c0_108] : memref<32x2xbf16, #tpu.memory_space<vmem>>, vector<32x2xbf16>
    %cst_109 = arith.constant dense<0.000000e+00> : vector<1x2xf32>
    %160 = tpu.matmul %158, %159, %cst_109 {dimension_numbers = #tpu.dot_dimension_numbers<[1], [0], [0], [1], [0, 0, 1, 1], [], []>} : vector<1x32xbf16>, vector<32x2xbf16>, vector<1x2xf32> -> vector<1x2xf32>
    %c0_110 = arith.constant 0 : index
    %c0_111 = arith.constant 0 : index
    %161 = vector.load %arg13[%c0_110, %c0_111] : memref<1x2xf32, #tpu.memory_space<vmem>>, vector<1x2xf32>
    %162 = arith.addf %160, %161 : vector<1x2xf32>
    %c0_112 = arith.constant 0 : index
    %c0_113 = arith.constant 0 : index
    %c0_114 = arith.constant 0 : index
    %163 = vector.load %arg14[%c0_112, %c0_113, %c0_114] : memref<1x1x2xf32, #tpu.memory_space<vmem>>, vector<1x1x2xf32>
    %164 = vector.shape_cast %163 : vector<1x1x2xf32> to vector<1x2xf32>
    %165 = vector.shape_cast %162 : vector<1x2xf32> to vector<1x1x2xf32>
    tpu.vector_store %arg14[%c0_112, %c0_113, %c0_114], %165 {strides = array<i32>} : memref<1x1x2xf32, #tpu.memory_space<vmem>>, vector<1x1x2xf32>,
    return
  }
  func.func @transform_0(%arg0: i32) -> (i32, i32, i32) {
    %c0_i32 = arith.constant 0 : i32
    %c0_i32_0 = arith.constant 0 : i32
    %c0_i32_1 = arith.constant 0 : i32
    return %arg0, %c0_i32, %c0_i32_0 : i32, i32, i32
  }
  func.func @transform_1(%arg0: i32) -> (i32, i32) {
    %c0_i32 = arith.constant 0 : i32
    %c0_i32_0 = arith.constant 0 : i32
    %c0_i32_1 = arith.constant 0 : i32
    return %c0_i32, %c0_i32_0 : i32, i32
  }
  func.func @transform_2(%arg0: i32) -> (i32, i32) {
    %c0_i32 = arith.constant 0 : i32
    %c0_i32_0 = arith.constant 0 : i32
    %c0_i32_1 = arith.constant 0 : i32
    return %c0_i32, %c0_i32_0 : i32, i32
  }
  func.func @transform_3(%arg0: i32) -> (i32, i32, i32) {
    %c0_i32 = arith.constant 0 : i32
    %c0_i32_0 = arith.constant 0 : i32
    %c0_i32_1 = arith.constant 0 : i32
    %c0_i32_2 = arith.constant 0 : i32
    return %c0_i32, %c0_i32_0, %c0_i32_1 : i32, i32, i32
  }
  func.func @transform_4(%arg0: i32) -> (i32, i32) {
    %c0_i32 = arith.constant 0 : i32
    %c0_i32_0 = arith.constant 0 : i32
    %c0_i32_1 = arith.constant 0 : i32
    return %c0_i32, %c0_i32_0 : i32, i32
  }
  func.func @transform_5(%arg0: i32) -> (i32, i32, i32) {
    %c0_i32 = arith.constant 0 : i32
    %c0_i32_0 = arith.constant 0 : i32
    %c0_i32_1 = arith.constant 0 : i32
    %c0_i32_2 = arith.constant 0 : i32
    return %c0_i32, %c0_i32_0, %c0_i32_1 : i32, i32, i32
  }
  func.func @transform_6(%arg0: i32) -> (i32, i32) {
    %c0_i32 = arith.constant 0 : i32
    %c0_i32_0 = arith.constant 0 : i32
    %c0_i32_1 = arith.constant 0 : i32
    return %c0_i32, %c0_i32_0 : i32, i32
  }
  func.func @transform_7(%arg0: i32) -> (i32, i32, i32) {
    %c0_i32 = arith.constant 0 : i32
    %c0_i32_0 = arith.constant 0 : i32
    %c0_i32_1 = arith.constant 0 : i32
    %c0_i32_2 = arith.constant 0 : i32
    return %c0_i32, %c0_i32_0, %c0_i32_1 : i32, i32, i32
  }
  func.func @transform_8(%arg0: i32) -> (i32, i32) {
    %c0_i32 = arith.constant 0 : i32
    %c0_i32_0 = arith.constant 0 : i32
    %c0_i32_1 = arith.constant 0 : i32
    return %c0_i32, %c0_i32_0 : i32, i32
  }
  func.func @transform_9(%arg0: i32) -> (i32, i32) {
    %c0_i32 = arith.constant 0 : i32
    %c0_i32_0 = arith.constant 0 : i32
    %c0_i32_1 = arith.constant 0 : i32
    return %c0_i32, %c0_i32_0 : i32, i32
  }
  func.func @transform_10(%arg0: i32) -> (i32, i32) {
    %c0_i32 = arith.constant 0 : i32
    %c0_i32_0 = arith.constant 0 : i32
    %c0_i32_1 = arith.constant 0 : i32
    return %c0_i32, %c0_i32_0 : i32, i32
  }
  func.func @transform_11(%arg0: i32) -> (i32, i32) {
    %c0_i32 = arith.constant 0 : i32
    %c0_i32_0 = arith.constant 0 : i32
    %c0_i32_1 = arith.constant 0 : i32
    return %c0_i32, %c0_i32_0 : i32, i32
  }
  func.func @transform_12(%arg0: i32) -> (i32, i32) {
    %c0_i32 = arith.constant 0 : i32
    %c0_i32_0 = arith.constant 0 : i32
    %c0_i32_1 = arith.constant 0 : i32
    return %c0_i32, %c0_i32_0 : i32, i32
  }
  func.func @transform_13(%arg0: i32) -> (i32, i32, i32) {
    %c0_i32 = arith.constant 0 : i32
    %c0_i32_0 = arith.constant 0 : i32
    %c0_i32_1 = arith.constant 0 : i32
    return %arg0, %c0_i32, %c0_i32_0 : i32, i32, i32
  }
}

</mosaic_0001>

<bundles_post_ra>
// kernel: tsception_forward.1
= control target key start
LH: loop header
LB: loop body
LE: loop exit
PB: predicated region body
PF: predicated region fallthrough
CT: control target
= control target key end

     0   :  { %s10175_s0 = inlined_call_operand.vmem [shape: bf16[2,1536,51], index: 0, kind: input, shape index: {}]   ;;  %s10176_s1 = inlined_call_operand.vmem [shape: bf16[51,15], index: 1, kind: input, shape index: {}]   ;;  %s10177_s2 = inlined_call_operand.vmem [shape: bf16[8,24], index: 2, kind: input, shape index: {}]   ;;  %s10178_s3 = inlined_call_operand.vmem [shape: bf16[8,15,15], index: 3, kind: input, shape index: {}]   ;;  %s10179_s4 = inlined_call_operand.vmem [shape: f32[1,15], index: 4, kind: input, shape index: {}]   ;;  %s10180_s5 = inlined_call_operand.vmem [shape: bf16[4,15,15], index: 5, kind: input, shape index: {}]   ;;  %s10181_s6 = inlined_call_operand.vmem [shape: f32[1,15], index: 6, kind: input, shape index: {}]   ;;  %s10182_s7 = inlined_call_operand.vmem [shape: bf16[3,15,15], index: 7, kind: input, shape index: {}]   ;;  %s10183_s8 = inlined_call_operand.vmem [shape: f32[1,15], index: 8, kind: input, shape index: {}]   ;;  %s10184_s9 = inlined_call_operand.vmem [shape: bf16[15,32], index: 9, kind: input, shape index: {}]   ;;  %s10185_s10 = inlined_call_operand.vmem [shape: f32[1,32], index: 10, kind: input, shape index: {}]   ;;  %s10186_s11 = inlined_call_operand.vmem [shape: bf16[32,2], index: 11, kind: input, shape index: {}]   ;;  %s10187_s12 = inlined_call_operand.vmem [shape: f32[1,2], index: 12, kind: input, shape index: {}]   ;;  %s10188_s13 = inlined_call_operand.hbm [shape: f32[2,1,2], index: 13, kind: output, shape index: {}]  }
   0x1   :  { %10248 = sst [smem:[#allocation43_spill]] %s10175_s0 }
   0x2   :  { %10249 = sst [smem:[#allocation44_spill]] %s10176_s1 }
   0x3   :  { %18 = vsyncpa [#allocation3], 0 }
   0x4   :  { %20 = vsyncpa [#allocation3 + $0x1], 0  ;;  %s7722_s25 = smov 0   ;;  %s7724_s26 = smov 0  }
   0x5   :  { %s7726_s27 = smov 0   ;;  %s7728_s28 = smov 0  }
   0x6 LB: > { %s7743_s29 = sadd.s32 4294967295, %s7646_s28   ;;  %s6613_s30 = sadd.s32 4294967294, %s7646_s28   ;;  %s7646_s28 = sphi %s7728_s28, %s10444_s28   ;;  %s7642_s27 = sphi %s7726_s27, %s10443_s27   ;;  %s7638_s26 = sphi %s7724_s26, %s10442_s26   ;;  %s7634_s25 = sphi %s7722_s25, %s10441_s25  }
   0x7   : > { %s7747_s14 = sadd.s32 1, %s7646_s28   ;;  %s311_s15 = sadd.s32 1, %s7642_s27 }
   0x8   : > { %s308_s16 = ssub.s32 %s7646_s28, %s7747_s14  ;;  %p321_p0 = scmp.ne.s32.totalorder %s7642_s27, %s7638_s26 }
   0x9   : > { %p309_p1 = scmp.eq.s32.totalorder %s308_s16, 0  ;;  %p322_p2 = scmp.eq.s32.totalorder %s7743_s29, 1 }
   0xa   : > { %p327_p3 = scmp.ne.s32.totalorder %s7638_s26, %s7634_s25  ;;  %p328_p4 = scmp.eq.s32.totalorder %s6613_s30, 1 }
   0xb   : > { %s7758_s17 = scalar_select %p309_p1, %s7642_s27, %s311_s15  }
   0xc   : > { %p7760_p5 = por %p322_p2, %p321_p0  ;;  %p7764_p6 = por %p328_p4, %p327_p3 }
   0xd   : > { %p6616_p7 = scmp.ge.s32.totalorder %s7646_s28, 1  ;;  %p390_p8 = scmp.lt.s32.totalorder %s7646_s28, 3 }
   0xf   : > { %p391_p9 = pnand %p6616_p7, %p390_p8 }
  0x11   : > { %394 = sbr.rel (%p391_p9) target bundleno = 2116 (0x844), region = 72 }
  0x18   : > { %s10252_s1 = sld [smem:[#allocation44_spill]]  ;;  %vm1428_vm0 = vcmask 1040384   ;;  %vm1429_vm1 = vcmask 1041408   ;;  %v7648_v2 = vmov 65535   ;;  %p433_p10 = scmp.lt.s32.totalorder %s7743_s29, 1  ;;  %vm1139_vm2 = vcmask 416768  }
  0x19   : > { %v1430_v3 = vsel %vm1428_vm0, 4294967295, %v7648_v2  ;;  %s10253_s0 = sld [smem:[#allocation43_spill]]  ;;  %vm2812_vm3 = vcmask 121856   ;;  %vm4638_vm8 = vcmask 1046528   ;;  %vm4597_vm12 = vcmask 1041409   ;;  %s431_s23 = sand.u32 1, %s7638_s26  }
  0x1a   : > { %v1431_v6 = vsel %vm1429_vm1, %v1430_v3, 0  ;;  %s434_s20 = scalar_select %p433_p10, %s7743_s29, 1  ;;  %vm4639_vm14 = vcmask 1047552   ;;  %vm4599_vm15 = vcmask 1042434  }
  0x1b   : > { %s6900_s15 = sshll.u32 %s7743_s29, 4  ;;  %s432_s16 = scalar_lea.vmem [#allocation2], %s431_s23 }
  0x1c   : > { %s7423_s21 = smul.u32 768, %s434_s20  ;;  %s6558_s20 = sshll.u32 %s432_s16, 4  ;;  %s10135_s20 = int_to_ptr.vmem [resolvable:$true] %s6558_s20 }
  0x1d   : > { %s6546_s29 = scalar_lea.sflag [#allocation3], %s431_s23  ;;  %s7651_s30 = smov [#allocation2]  }
  0x1e   : > { %v7466_v0 = vld [vmem:[%s10252_s1] sm:$0xff]   ;;  %v7467_v1 = vld [vmem:[%s10252_s1 + $0x8] sm:$0xff]   ;;  %v7468_v4 = vld [vmem:[%s10252_s1 + $0x10] sm:$0xff]  }
  0x1f   : > { %7068 = vmatprep.subr.bf16.mxu0 %v7466_v0  ;;  %7404 = vmatprep.subr.bf16.mxu1 %v7466_v0  ;;  %v7469_v5 = vld [vmem:[%s10252_s1 + $0x18] ss:$0 sps:$4 sm:$0x33]   ;;  %s7788_s24 = scalar_lea.vmem %s10253_s0, %s7423_s21  ;;  %s10133_s0 = scalar_lea.hbm %s10188_s13, %s6900_s15 }
  0x20   : > { %7069 = vmatpush3.bf16.msra.mxu0 %v7466_v0  ;;  %7408 = vmatpush3.bf16.msra.mxu1 %v7466_v0  ;;  %v1433_v7 = vand.u32 %v7469_v5, %v1431_v6  ;;  %v7470_v8 = vld [vmem:[%s7788_s24] sm:$0xff]   ;;  %v7471_v9 = vld [vmem:[%s7788_s24 + $0x8] sm:$0xff]   ;;  %v7472_v10 = vld [vmem:[%s7788_s24 + $0x10] sm:$0xff]   ;;  %s7588_s1 = sshll.u32 %s7651_s30, 4  ;;  %s7589_s1 = int_to_ptr.vmem [resolvable:$false] %s7588_s1 }
  0x21   : > { %7070 = vmatprep.subr.bf16.mxu0 %v7467_v1  ;;  %7405 = vmatprep.subr.bf16.mxu1 %v7467_v1  ;;  %v7473_v11 = vld [vmem:[%s7788_s24 + $0x18] sm:$0xff]   ;;  %v7474_v12 = vld [vmem:[%s7788_s24 + $0x20] sm:$0xff]   ;;  %v7475_v13 = vld [vmem:[%s7788_s24 + $0x28] sm:$0xff]   ;;  %s7590_s21 = scalar_lea.vmem %s7589_s1, 32  ;;  %p7591_p0 = scmp.lt.s32.totalorder %s10135_s20, %s7589_s1 }
  0x22   : > { %7076 = vmatprep.mubr.msk.bf16.mxu0 %vm1139_vm2, %v7470_v8  ;;  %v7476_v14 = vld [vmem:[%s7788_s24 + $0x30] sm:$0xff]   ;;  %v7477_v15 = vld [vmem:[%s7788_s24 + $0x38] sm:$0xff]   ;;  %v7478_v16 = vld [vmem:[%s7788_s24 + $0x40] sm:$0xff]  }
  0x23   : > { %v7479_v17 = vld [vmem:[%s7788_s24 + $0x48] sm:$0xff]   ;;  %v7480_v18 = vld [vmem:[%s7788_s24 + $0x50] sm:$0xff]   ;;  %v7481_v19 = vld [vmem:[%s7788_s24 + $0x58] sm:$0xff]  }
  0x24   : > { %7071 = vmatpush3.bf16.msra.mxu0 %v7467_v1  ;;  %7409 = vmatpush3.bf16.msra.mxu1 %v7467_v1  ;;  %v7482_v20 = vld [vmem:[%s7788_s24 + $0x60] sm:$0xff]   ;;  %v7483_v21 = vld [vmem:[%s7788_s24 + $0x68] sm:$0xff]   ;;  %v7484_v22 = vld [vmem:[%s7788_s24 + $0x70] sm:$0xff]  }
  0x25   : > { %7072 = vmatprep.subr.bf16.mxu0 %v7468_v4  ;;  %7406 = vmatprep.subr.bf16.mxu1 %v7468_v4  ;;  %v7485_v23 = vld [vmem:[%s7788_s24 + $0x78] sm:$0xff]   ;;  %v7486_v24 = vld [vmem:[%s7788_s24 + $0x80] sm:$0xff]   ;;  %v7518_v25 = vld [vmem:[%s7788_s24 + $0x230] sm:$0xff]  }
  0x26   : > { %v7519_v26 = vld [vmem:[%s7788_s24 + $0x238] sm:$0xff]   ;;  %v7487_v27 = vld [vmem:[%s7788_s24 + $0x88] sm:$0xff]   ;;  %7216 = vmatprep.mubr.msk.bf16.mxu1 %vm1139_vm2, %v7518_v25  ;;  %v7488_v28 = vld [vmem:[%s7788_s24 + $0x90] sm:$0xff]  }
  0x27   : > { %v7522_v29 = vld [vmem:[%s7788_s24 + $0x240] sm:$0xff]   ;;  %v7523_v30 = vld [vmem:[%s7788_s24 + $0x248] sm:$0xff]   ;;  %v7489_v31 = vld [vmem:[%s7788_s24 + $0x98] sm:$0xff]  }
  0x28   : > { %7073 = vmatpush3.bf16.msra.mxu0 %v7468_v4  ;;  %7410 = vmatpush3.bf16.msra.mxu1 %v7468_v4  ;;  %v7490_v32 = vld [vmem:[%s7788_s24 + $0xa0] sm:$0xff]   ;;  %v7526_v33 = vld [vmem:[%s7788_s24 + $0x250] sm:$0xff]   ;;  %v7527_v34 = vld [vmem:[%s7788_s24 + $0x258] sm:$0xff]  }
  0x29   : > { %7074 = vmatprep.subr.bf16.mxu0 %v1433_v7  ;;  %7407 = vmatprep.subr.bf16.mxu1 %v1433_v7  ;;  %v7491_v35 = vld [vmem:[%s7788_s24 + $0xa8] sm:$0xff]   ;;  %v7492_v36 = vld [vmem:[%s7788_s24 + $0xb0] sm:$0xff]   ;;  %v7530_v37 = vld [vmem:[%s7788_s24 + $0x260] sm:$0xff]  }
  0x2a   : > { %v7531_v38 = vld [vmem:[%s7788_s24 + $0x268] sm:$0xff]   ;;  %v7493_v39 = vld [vmem:[%s7788_s24 + $0xb8] sm:$0xff]   ;;  %v7494_v40 = vld [vmem:[%s7788_s24 + $0xc0] sm:$0xff]  }
  0x2b   : > { %v7534_v41 = vld [vmem:[%s7788_s24 + $0x270] sm:$0xff]   ;;  %v7535_v42 = vld [vmem:[%s7788_s24 + $0x278] sm:$0xff]   ;;  %v7495_v43 = vld [vmem:[%s7788_s24 + $0xc8] sm:$0xff]  }
  0x2c   : > { %7075 = vmatpush3.bf16.msra.mxu0 %v1433_v7  ;;  %7411 = vmatpush3.bf16.msra.mxu1 %v1433_v7  ;;  %v7496_v44 = vld [vmem:[%s7788_s24 + $0xd0] sm:$0xff]   ;;  %v7497_v45 = vld [vmem:[%s7788_s24 + $0xd8] sm:$0xff]   ;;  %v7498_v46 = vld [vmem:[%s7788_s24 + $0xe0] sm:$0xff]  }
  0x2d   : > { %v7538_v47 = vld [vmem:[%s7788_s24 + $0x280] sm:$0xff]   ;;  %v7539_v48 = vld [vmem:[%s7788_s24 + $0x288] sm:$0xff]   ;;  %v7500_v50 = vld [vmem:[%s7788_s24 + $0xf0] sm:$0xff]  }
  0x2e   : > { %v7499_v49 = vld [vmem:[%s7788_s24 + $0xe8] sm:$0xff]   ;;  %v7501_v51 = vld [vmem:[%s7788_s24 + $0xf8] sm:$0xff]   ;;  %v7542_v52 = vld [vmem:[%s7788_s24 + $0x290] sm:$0xff]  }
  0x2f   : > { %7077 = vmatmul.mubr.msk.bf16.vlgmr.msra.gmra.mrb[0].mxu0 %vm1139_vm2, %v7471_v9  ;;  %7217 = vmatmul.mubr.msk.bf16.vlgmr.msra.gmra.mrb[0].mxu1 %vm1139_vm2, %v7519_v26  ;;  %v7502_v53 = vld [vmem:[%s7788_s24 + $0x100] sm:$0xff]   ;;  %v7543_v54 = vld [vmem:[%s7788_s24 + $0x298] sm:$0xff]   ;;  %v7503_v55 = vld [vmem:[%s7788_s24 + $0x108] sm:$0xff]  }
  0x30   : > { %7080 = vmatprep.mubr.msk.bf16.mxu0 %vm1139_vm2, %v7472_v10  ;;  %7220 = vmatprep.mubr.msk.bf16.mxu1 %vm1139_vm2, %v7522_v29  ;;  %v7504_v56 = vld [vmem:[%s7788_s24 + $0x110] sm:$0xff]   ;;  %v7546_v57 = vld [vmem:[%s7788_s24 + $0x2a0] sm:$0xff]   ;;  %v7505_v58 = vld [vmem:[%s7788_s24 + $0x118] sm:$0xff]  }
  0x31   : > { %v7547_v59 = vld [vmem:[%s7788_s24 + $0x2a8] sm:$0xff]   ;;  %v7506_v60 = vld [vmem:[%s7788_s24 + $0x120] sm:$0xff]   ;;  %v7508_v62 = vld [vmem:[%s7788_s24 + $0x130] sm:$0xff]  }
  0x32   : > { %v7507_v61 = vld [vmem:[%s7788_s24 + $0x128] sm:$0xff]   ;;  %v7550_v63 = vld [vmem:[%s7788_s24 + $0x2b0] sm:$0xff]   ;;  %v7551_v0 = vld [vmem:[%s7788_s24 + $0x2b8] sm:$0xff]  }
  0x33   : > { %v7509_v1 = vld [vmem:[%s7788_s24 + $0x138] sm:$0xff]   ;;  %v7510_v3 = vld [vmem:[%s7788_s24 + $0x140] sm:$0xff]   ;;  %v7511_v4 = vld [vmem:[%s7788_s24 + $0x148] sm:$0xff]  }
  0x34   : > { %v7512_v5 = vld [vmem:[%s7788_s24 + $0x150] sm:$0xff]   ;;  %v7554_v6 = vld [vmem:[%s7788_s24 + $0x2c0] sm:$0xff]   ;;  %v7555_v7 = vld [vmem:[%s7788_s24 + $0x2c8] sm:$0xff]  }
  0x35   : > { %v7513_v8 = vld [vmem:[%s7788_s24 + $0x158] sm:$0xff]   ;;  %v7514_v9 = vld [vmem:[%s7788_s24 + $0x160] sm:$0xff]   ;;  %v7558_v10 = vld [vmem:[%s7788_s24 + $0x2d0] sm:$0xff]  }
  0x36   : > { %v7533_v25 = vld [vmem:[%s7788_s24 + $0x1b8] sm:$0xff]   ;;  %v7562_v26 = vld [vmem:[%s7788_s24 + $0x2e0] sm:$0xff]  }
  0x37   : > { %7081 = vmatmul.mubr.msk.bf16.gmra.mrb[4].mxu0 %vm1139_vm2, %v7473_v11  ;;  %7221 = vmatmul.mubr.msk.bf16.gmra.mrb[4].mxu1 %vm1139_vm2, %v7523_v30  ;;  %v7559_v11 = vld [vmem:[%s7788_s24 + $0x2d8] sm:$0xff]   ;;  %v7536_v29 = vld [vmem:[%s7788_s24 + $0x1c0] sm:$0xff]   ;;  %v7563_v30 = vld [vmem:[%s7788_s24 + $0x2e8] sm:$0xff]  }
  0x38   : > { %7084 = vmatprep.mubr.msk.bf16.mxu0 %vm1139_vm2, %v7474_v12  ;;  %7224 = vmatprep.mubr.msk.bf16.mxu1 %vm1139_vm2, %v7526_v33  ;;  %v7515_v12 = vld [vmem:[%s7788_s24 + $0x168] sm:$0xff]  }
  0x3f   : > { %7085 = vmatmul.mubr.msk.bf16.gmra.mrb[8].mxu0 %vm1139_vm2, %v7475_v13  ;;  %7225 = vmatmul.mubr.msk.bf16.gmra.mrb[8].mxu1 %vm1139_vm2, %v7527_v34  ;;  %v7516_v13 = vld [vmem:[%s7788_s24 + $0x170] sm:$0xff]  }
  0x40   : > { %7088 = vmatprep.mubr.msk.bf16.mxu0 %vm1139_vm2, %v7476_v14  ;;  %7228 = vmatprep.mubr.msk.bf16.mxu1 %vm1139_vm2, %v7530_v37  ;;  %v7517_v14 = vld [vmem:[%s7788_s24 + $0x178] sm:$0xff]  }
  0x47   : > { %7089 = vmatmul.mubr.msk.bf16.gmra.mrb[12].mxu0 %vm1139_vm2, %v7477_v15  ;;  %7229 = vmatmul.mubr.msk.bf16.gmra.mrb[12].mxu1 %vm1139_vm2, %v7531_v38  ;;  %v7520_v15 = vld [vmem:[%s7788_s24 + $0x180] sm:$0xff]  }
  0x48   : > { %7092 = vmatprep.mubr.msk.bf16.mxu0 %vm1139_vm2, %v7478_v16  ;;  %7232 = vmatprep.mubr.msk.bf16.mxu1 %vm1139_vm2, %v7534_v41  ;;  %v7521_v16 = vld [vmem:[%s7788_s24 + $0x188] sm:$0xff]  }
  0x4f   : > { %7093 = vmatmul.mubr.msk.bf16.gmra.mrb[16].mxu0 %vm1139_vm2, %v7479_v17  ;;  %7233 = vmatmul.mubr.msk.bf16.gmra.mrb[16].mxu1 %vm1139_vm2, %v7535_v42  ;;  %v7524_v17 = vld [vmem:[%s7788_s24 + $0x190] sm:$0xff]  }
  0x50   : > { %7096 = vmatprep.mubr.msk.bf16.mxu0 %vm1139_vm2, %v7480_v18  ;;  %7236 = vmatprep.mubr.msk.bf16.mxu1 %vm1139_vm2, %v7538_v47  ;;  %v7525_v18 = vld [vmem:[%s7788_s24 + $0x198] sm:$0xff]  }
  0x57   : > { %7097 = vmatmul.mubr.msk.bf16.gmra.mrb[20].mxu0 %vm1139_vm2, %v7481_v19  ;;  %7237 = vmatmul.mubr.msk.bf16.gmra.mrb[20].mxu1 %vm1139_vm2, %v7539_v48  ;;  %v7528_v19 = vld [vmem:[%s7788_s24 + $0x1a0] sm:$0xff]  }
  0x58   : > { %7100 = vmatprep.mubr.msk.bf16.mxu0 %vm1139_vm2, %v7482_v20  ;;  %7240 = vmatprep.mubr.msk.bf16.mxu1 %vm1139_vm2, %v7542_v52  ;;  %v7529_v20 = vld [vmem:[%s7788_s24 + $0x1a8] sm:$0xff]  }
  0x5f   : > { %7101 = vmatmul.mubr.msk.bf16.gmra.mrb[24].mxu0 %vm1139_vm2, %v7483_v21  ;;  %7241 = vmatmul.mubr.msk.bf16.gmra.mrb[24].mxu1 %vm1139_vm2, %v7543_v54  ;;  %v7532_v21 = vld [vmem:[%s7788_s24 + $0x1b0] sm:$0xff]   ;;  %v7537_v54 = vld [vmem:[%s7788_s24 + $0x1c8] sm:$0xff]  }
  0x60   : > { %7104 = vmatprep.mubr.msk.bf16.mxu0 %vm1139_vm2, %v7484_v22  ;;  %7244 = vmatprep.mubr.msk.bf16.mxu1 %vm1139_vm2, %v7546_v57 }
  0x67   : > { %7105 = vmatmul.mubr.msk.bf16.gmra.mrb[28].mxu0 %vm1139_vm2, %v7485_v23  ;;  %7245 = vmatmul.mubr.msk.bf16.gmra.mrb[28].mxu1 %vm1139_vm2, %v7547_v59  ;;  %v7540_v59 = vld [vmem:[%s7788_s24 + $0x1d0] sm:$0xff]  }
  0x68   : > { %7108 = vmatprep.mubr.msk.bf16.mxu0 %vm1139_vm2, %v7486_v24  ;;  %7248 = vmatprep.mubr.msk.bf16.mxu1 %vm1139_vm2, %v7550_v63 }
  0x6f   : > { %7109 = vmatmul.mubr.msk.bf16.gmra.mrb[32].mxu0 %vm1139_vm2, %v7487_v27  ;;  %7249 = vmatmul.mubr.msk.bf16.gmra.mrb[32].mxu1 %vm1139_vm2, %v7551_v0 }
  0x70   : > { %7112 = vmatprep.mubr.msk.bf16.mxu0 %vm1139_vm2, %v7488_v28  ;;  %7252 = vmatprep.mubr.msk.bf16.mxu1 %vm1139_vm2, %v7554_v6 }
  0x77   : > { %7113 = vmatmul.mubr.msk.bf16.gmra.mrb[36].mxu0 %vm1139_vm2, %v7489_v31  ;;  %7253 = vmatmul.mubr.msk.bf16.gmra.mrb[36].mxu1 %vm1139_vm2, %v7555_v7 }
  0x78   : > { %7116 = vmatprep.mubr.msk.bf16.mxu0 %vm1139_vm2, %v7490_v32  ;;  %7256 = vmatprep.mubr.msk.bf16.mxu1 %vm1139_vm2, %v7558_v10 }
  0x7f   : > { %7117 = vmatmul.mubr.msk.bf16.gmra.mrb[40].mxu0 %vm1139_vm2, %v7491_v35  ;;  %7257 = vmatmul.mubr.msk.bf16.gmra.mrb[40].mxu1 %vm1139_vm2, %v7559_v11 }
  0x80   : > { %7120 = vmatprep.mubr.msk.bf16.mxu0 %vm1139_vm2, %v7492_v36  ;;  %7260 = vmatprep.mubr.msk.bf16.mxu1 %vm1139_vm2, %v7562_v26 }
  0x87   : > { %7121 = vmatmul.mubr.msk.bf16.gmra.mrb[44].mxu0 %vm1139_vm2, %v7493_v39  ;;  %7261 = vmatmul.mubr.msk.bf16.gmra.mrb[44].mxu1 %vm1139_vm2, %v7563_v30 }
  0x88   : > { %7124 = vmatprep.mubr.msk.bf16.mxu0 %vm1139_vm2, %v7494_v40 }
  0x8f   : > { %7125 = vmatmul.mubr.msk.bf16.gmra.mrb[48].mxu0 %vm1139_vm2, %v7495_v43 }
  0x90   : > { %7128 = vmatprep.mubr.msk.bf16.mxu0 %vm1139_vm2, %v7496_v44 }
  0x97   : > { %7129 = vmatmul.mubr.msk.bf16.gmra.mrb[52].mxu0 %vm1139_vm2, %v7497_v45 }
  0x98   : > { %7132 = vmatprep.mubr.msk.bf16.mxu0 %vm1139_vm2, %v7498_v46  ;;  %v7957_v46 = vsel %vm4638_vm8, 4294967295, %v7648_v2 }
  0x9f   : > { %7133 = vmatmul.mubr.msk.bf16.gmra.mrb[56].mxu0 %vm1139_vm2, %v7499_v49 }
  0xa0   : > { %7136 = vmatprep.mubr.msk.bf16.mxu0 %vm1139_vm2, %v7500_v50 }
  0xa7   : > { %7137 = vmatmul.mubr.msk.bf16.gmra.mrb[60].mxu0 %vm1139_vm2, %v7501_v51 }
  0xa8   : > { %7140 = vmatprep.mubr.msk.bf16.mxu0 %vm1139_vm2, %v7502_v53 }
  0xaf   : > { %7141 = vmatmul.mubr.msk.bf16.gmra.mrb[64].mxu0 %vm1139_vm2, %v7503_v55 }
  0xb0   : > { %7144 = vmatprep.mubr.msk.bf16.mxu0 %vm1139_vm2, %v7504_v56 }
  0xb7   : > { %7145 = vmatmul.mubr.msk.bf16.gmra.mrb[68].mxu0 %vm1139_vm2, %v7505_v58 }
  0xb8   : > { %7148 = vmatprep.mubr.msk.bf16.mxu0 %vm1139_vm2, %v7506_v60 }
  0xbf   : > { %7149 = vmatmul.mubr.msk.bf16.gmra.mrb[72].mxu0 %vm1139_vm2, %v7507_v61 }
  0xc0   : > { %7152 = vmatprep.mubr.msk.bf16.mxu0 %vm1139_vm2, %v7508_v62 }
  0xc7   : > { %7153 = vmatmul.mubr.msk.bf16.gmra.mrb[76].mxu0 %vm1139_vm2, %v7509_v1 }
  0xc8   : > { %7156 = vmatprep.mubr.msk.bf16.mxu0 %vm1139_vm2, %v7510_v3 }
  0xcf   : > { %7157 = vmatmul.mubr.msk.bf16.gmra.mrb[80].mxu0 %vm1139_vm2, %v7511_v4 }
  0xd0   : > { %7160 = vmatprep.mubr.msk.bf16.mxu0 %vm1139_vm2, %v7512_v5 }
  0xd7   : > { %7161 = vmatmul.mubr.msk.bf16.gmra.mrb[84].mxu0 %vm1139_vm2, %v7513_v8  ;;  %v7564_v8 = vld [vmem:[%s7788_s24 + $0x2f0] sm:$0xff]  }
  0xd8   : > { %7164 = vmatprep.mubr.msk.bf16.mxu0 %vm1139_vm2, %v7514_v9  ;;  %7264 = vmatprep.mubr.msk.bf16.mxu1 %vm1139_vm2, %v7564_v8 }
  0xdf   : > { %7165 = vmatmul.mubr.msk.bf16.gmra.mrb[88].mxu0 %vm1139_vm2, %v7515_v12 }
  0xe0   : > { %7168 = vmatprep.mubr.msk.bf16.mxu0 %vm1139_vm2, %v7516_v13  ;;  %v7565_v13 = vld [vmem:[%s7788_s24 + $0x2f8] sm:$0xff]  }
  0xe1   : > { %7265 = vmatmul.mubr.msk.bf16.gmra.mrb[48].mxu1 %vm1139_vm2, %v7565_v13 }
  0xe7   : > { %7169 = vmatmul.mubr.msk.bf16.gmra.mrb[92].mxu0 %vm1139_vm2, %v7517_v14 }
  0xe8   : > { %7172 = vmatprep.mubr.msk.bf16.mxu0 %vm1139_vm2, %v7520_v15 }
  0xef   : > { %7173 = vmatmul.mubr.msk.bf16.gmra.mrb[96].mxu0 %vm1139_vm2, %v7521_v16 }
  0xf0   : > { %7176 = vmatprep.mubr.msk.bf16.mxu0 %vm1139_vm2, %v7524_v17 }
  0xf7   : > { %7177 = vmatmul.mubr.msk.bf16.gmra.mrb[100].mxu0 %vm1139_vm2, %v7525_v18 }
  0xf8   : > { %7180 = vmatprep.mubr.msk.bf16.mxu0 %vm1139_vm2, %v7528_v19 }
  0xff   : > { %7181 = vmatmul.mubr.msk.bf16.gmra.mrb[104].mxu0 %vm1139_vm2, %v7529_v20 }
 0x100   : > { %7184 = vmatprep.mubr.msk.bf16.mxu0 %vm1139_vm2, %v7532_v21 }
 0x102   : > { %v7078_v22 = vpop.f32.mrb[0].mxu0 }
 0x103   : > { %vm2238_vm4 = vcmp.ge.f32.partialorder %v7078_v22, 0.0  ;;  %v2430_v23 = vmul.f32 0.01, %v7078_v22  ;;  %v1469_v24 = vpop.f32.mrb[1].mxu0 }
 0x104   : > { %vm2236_vm5 = vcmp.ge.f32.partialorder %v1469_v24, 0.0  ;;  %v2428_v27 = vmul.f32 0.01, %v1469_v24  ;;  %v7079_v28 = vpop.f32.mrb[2].mxu0 }
 0x105   : > { %v2622_v31 = vsel %vm2238_vm4, %v7078_v22, %v2430_v23  ;;  %vm2239_vm6 = vcmp.ge.f32.partialorder %v7079_v28, 0.0  ;;  %v2431_v32 = vmul.f32 0.01, %v7079_v28  ;;  %v1472_v33 = vpop.f32.mrb[3].mxu0 }
 0x106   : > { %v2827_v34 = vsel %vm2812_vm3, %v2622_v31, 0.0  ;;  %v2620_v35 = vsel %vm2236_vm5, %v1469_v24, %v2428_v27  ;;  %vm2237_vm7 = vcmp.ge.f32.partialorder %v1472_v33, 0.0  ;;  %v2429_v36 = vmul.f32 0.01, %v1472_v33  ;;  %v7541_v27 = vld [vmem:[%s7788_s24 + $0x1d8] sm:$0xff]  }
 0x107   : > { %v2828_v37 = vrot.slane %v2827_v34, 4  ;;  %v2813_v38 = vsel %vm2812_vm3, %v2620_v35, 0.0  ;;  %v2623_v39 = vsel %vm2239_vm6, %v7079_v28, %v2431_v32  ;;  %7185 = vmatmul.mubr.msk.bf16.gmra.mrb[108].mxu0 %vm1139_vm2, %v7533_v25 }
 0x108   : > { %v2814_v40 = vrot.slane %v2813_v38, 4  ;;  %v2834_v41 = vsel %vm2812_vm3, %v2623_v39, 0.0  ;;  %v2621_v42 = vsel %vm2237_vm7, %v1472_v33, %v2429_v36  ;;  %7188 = vmatprep.mubr.msk.bf16.mxu0 %vm1139_vm2, %v7536_v29  ;;  %v7544_v33 = vld [vmem:[%s7788_s24 + $0x1e0] sm:$0xff]  }
 0x109   : > { %v2829_v43 = vadd.f32 %v2828_v37, %v2827_v34  ;;  %v2835_v44 = vrot.slane %v2834_v41, 4  ;;  %v2820_v45 = vsel %vm2812_vm3, %v2621_v42, 0.0 }
 0x10a   : > { %v2815_v47 = vadd.f32 %v2814_v40, %v2813_v38  ;;  %v2821_v48 = vrot.slane %v2820_v45, 4  ;;  %v7082_v49 = vpop.f32.mrb[4].mxu0 }
 0x10b   : > { %v2830_v50 = vrot.slane %v2829_v43, 2  ;;  %v2836_v51 = vadd.f32 %v2835_v44, %v2834_v41  ;;  %vm2242_vm9 = vcmp.ge.f32.partialorder %v7082_v49, 0.0  ;;  %v2434_v52 = vmul.f32 0.01, %v7082_v49  ;;  %v1485_v53 = vpop.f32.mrb[5].mxu0 }
 0x10c   : > { %v2816_v55 = vrot.slane %v2815_v47, 2  ;;  %v2822_v56 = vadd.f32 %v2821_v48, %v2820_v45  ;;  %vm2240_vm10 = vcmp.ge.f32.partialorder %v1485_v53, 0.0  ;;  %v2432_v57 = vmul.f32 0.01, %v1485_v53  ;;  %v7083_v58 = vpop.f32.mrb[6].mxu0 }
 0x10d   : > { %v2831_v60 = vadd.f32 %v2830_v50, %v2829_v43  ;;  %v2837_v61 = vrot.slane %v2836_v51, 2  ;;  %v2626_v2 = vsel %vm2242_vm9, %v7082_v49, %v2434_v52  ;;  %vm2243_vm11 = vcmp.ge.f32.partialorder %v7083_v58, 0.0  ;;  %v1488_v62 = vpop.f32.mrb[7].mxu0 }
 0x10e   : > { %v2817_v63 = vadd.f32 %v2816_v55, %v2815_v47  ;;  %v2823_v0 = vrot.slane %v2822_v56, 2  ;;  %v2855_v1 = vsel %vm2812_vm3, %v2626_v2, 0.0  ;;  %v2624_v3 = vsel %vm2240_vm10, %v1485_v53, %v2432_v57 }
 0x10f   : > { %v2832_v4 = vrot.slane %v2831_v60, 1  ;;  %v2838_v5 = vadd.f32 %v2837_v61, %v2836_v51  ;;  %v2856_v6 = vrot.slane %v2855_v1, 4  ;;  %v2841_v7 = vsel %vm2812_vm3, %v2624_v3, 0.0  ;;  %7189 = vmatmul.mubr.msk.bf16.gmra.mrb[112].mxu0 %vm1139_vm2, %v7537_v54 }
 0x110   : > { %v2818_v9 = vrot.slane %v2817_v63, 1  ;;  %v2824_v10 = vadd.f32 %v2823_v0, %v2822_v56  ;;  %v2842_v11 = vrot.slane %v2841_v7, 4  ;;  %v2435_v12 = vmul.f32 0.01, %v7083_v58  ;;  %7192 = vmatprep.mubr.msk.bf16.mxu0 %vm1139_vm2, %v7540_v59  ;;  %v7545_v59 = vld [vmem:[%s7788_s24 + $0x1e8] sm:$0xff]  }
 0x111   : > { %v2833_v14 = vadd.f32 %v2832_v4, %v2831_v60  ;;  %v2839_v15 = vrot.slane %v2838_v5, 1  ;;  %v2857_v16 = vadd.f32 %v2856_v6, %v2855_v1  ;;  %vm2241_vm13 = vcmp.ge.f32.partialorder %v1488_v62, 0.0  ;;  %v7548_v4 = vld [vmem:[%s7788_s24 + $0x1f0] sm:$0xff]  }
 0x112   : > { %v2819_v17 = vadd.f32 %v2818_v9, %v2817_v63  ;;  %v2825_v18 = vrot.slane %v2824_v10, 1  ;;  %v2843_v19 = vadd.f32 %v2842_v11, %v2841_v7  ;;  %v2627_v20 = vsel %vm2243_vm11, %v7083_v58, %v2435_v12  ;;  %v7086_v21 = vpop.f32.mrb[8].mxu0 }
 0x113   : > { %v4160_v22 = vmul.f32 0.125, %v2833_v14  ;;  %v2840_v23 = vadd.f32 %v2839_v15, %v2838_v5  ;;  %v2858_v24 = vrot.slane %v2857_v16, 2  ;;  %v2862_v25 = vsel %vm2812_vm3, %v2627_v20, 0.0  ;;  %v1501_v26 = vpop.f32.mrb[9].mxu0 }
 0x114   : > { %v4158_v28 = vmul.f32 0.125, %v2819_v17  ;;  %v2826_v29 = vadd.f32 %v2825_v18, %v2824_v10  ;;  %v2844_v30 = vrot.slane %v2843_v19, 2  ;;  %v2863_v31 = vrot.slane %v2862_v25, 4  ;;  %v7972_v32 = vpop.f32.mrb[10].mxu0 }
 0x115   : > { %v4352_v34 = vpack.c.bf16 %v4160_v22, %v4160_v22  ;;  %v4161_v35 = vmul.f32 0.125, %v2840_v23  ;;  %v2859_v36 = vadd.f32 %v2858_v24, %v2857_v16  ;;  %v2433_v37 = vmul.f32 0.01, %v1488_v62  ;;  %v7975_v38 = vpop.f32.mrb[11].mxu0 }
 0x116   : > { %v4350_v39 = vpack.c.bf16 %v4158_v28, %v4158_v28  ;;  %v4159_v40 = vmul.f32 0.125, %v2826_v29  ;;  %v2845_v41 = vadd.f32 %v2844_v30, %v2843_v19  ;;  %v2864_v42 = vadd.f32 %v2863_v31, %v2862_v25 }
 0x117   : > { %v4719_v43 = vunpack.c.l.b16 %v4352_v34  ;;  %v2860_v44 = vrot.slane %v2859_v36, 1  ;;  %v2625_v45 = vsel %vm2241_vm13, %v1488_v62, %v2433_v37  ;;  %7193 = vmatmul.mubr.msk.bf16.gmra.mrb[116].mxu0 %vm1139_vm2, %v7541_v27  ;;  %v4353_v47 = vpack.c.bf16 %v4161_v35, %v4161_v35 }
 0x118   : > { %v4351_v48 = vpack.c.bf16 %v4159_v40, %v4159_v40  ;;  %v2846_v49 = vrot.slane %v2845_v41, 1  ;;  %v2865_v50 = vrot.slane %v2864_v42, 2  ;;  %7196 = vmatprep.mubr.msk.bf16.mxu0 %vm1139_vm2, %v7544_v33  ;;  %v4717_v51 = vunpack.c.l.b16 %v4350_v39  ;;  %v7549_v33 = vld [vmem:[%s7788_s24 + $0x1f8] sm:$0xff]   ;;  %v7552_v40 = vld [vmem:[%s7788_s24 + $0x200] sm:$0xff]  }
 0x119   : > { %v2861_v52 = vadd.f32 %v2860_v44, %v2859_v36  ;;  %v2848_v53 = vsel %vm2812_vm3, %v2625_v45, 0.0  ;;  %vm2246_vm0 = vcmp.ge.f32.partialorder %v7086_v21, 0.0  ;;  %v2438_v61 = vmul.f32 0.01, %v7086_v21 }
 0x11a   : > { %v4718_v54 = vunpack.c.l.b16 %v4351_v48  ;;  %v2847_v55 = vadd.f32 %v2846_v49, %v2845_v41  ;;  %v2866_v56 = vadd.f32 %v2865_v50, %v2864_v42  ;;  %v2849_v57 = vrot.slane %v2848_v53, 4  ;;  %v7090_v58 = vpop.f32.mrb[12].mxu0 }
 0x11b   : > { %v4164_v60 = vmul.f32 0.125, %v2861_v52  ;;  %vm2244_vm1 = vcmp.ge.f32.partialorder %v1501_v26, 0.0  ;;  %v2436_v2 = vmul.f32 0.01, %v1501_v26  ;;  %v7985_v3 = vpop.f32.mrb[13].mxu0  ;;  %v2630_v6 = vsel %vm2246_vm0, %v7086_v21, %v2438_v61 }
 0x11c   : > { %v4741_v62 = vsel %vm4597_vm12, %v4718_v54, %v4717_v51  ;;  %v7983_v63 = vmul.f32 0.125, %v2847_v55  ;;  %v2867_v0 = vrot.slane %v2866_v56, 1  ;;  %v2850_v1 = vadd.f32 %v2849_v57, %v2848_v53  ;;  %v7992_v8 = vpop.f32.mrb[14].mxu0 }
 0x11d   : > { %v7989_v5 = vsel %vm4599_vm15, %v4719_v43, %v4741_v62  ;;  %v2628_v7 = vsel %vm2244_vm1, %v1501_v26, %v2436_v2  ;;  %v7996_v9 = vsel %vm4639_vm14, %v7957_v46, 0  ;;  %v4356_v10 = vpack.c.bf16 %v4164_v60, %v4164_v60  ;;  %v7999_v13 = vpop.f32.mrb[15].mxu0 }
 0x11e   : > { %10254 = vst [vmem:[#allocation5_spill] sm:$0xff] %v7996_v9  ;;  %v2851_v11 = vrot.slane %v2850_v1, 2  ;;  %v2883_v12 = vsel %vm2812_vm3, %v2630_v6, 0.0  ;;  %v8001_v14 = vunpack.c.l.b16 %v4353_v47  ;;  %v4354_v15 = vpack.c.bf16 %v7983_v63, %v7983_v63 }
 0x11f   : > { %v2884_v16 = vrot.slane %v2883_v12, 4  ;;  %v2869_v17 = vsel %vm2812_vm3, %v2628_v7, 0.0  ;;  %7197 = vmatmul.mubr.msk.bf16.gmra.mrb[120].mxu0 %vm1139_vm2, %v7545_v59  ;;  %v2868_v18 = vadd.f32 %v2867_v0, %v2866_v56  ;;  %vm2247_vm4 = vcmp.ge.f32.partialorder %v7972_v32, 0.0 }
 0x120   : > { %v2852_v19 = vadd.f32 %v2851_v11, %v2850_v1  ;;  %v2870_v46 = vrot.slane %v2869_v17, 4  ;;  %7200 = vmatprep.mubr.msk.bf16.mxu0 %vm1139_vm2, %v7548_v4  ;;  %v2439_v21 = vmul.f32 0.01, %v7972_v32  ;;  %vm2245_vm5 = vcmp.ge.f32.partialorder %v7975_v38, 0.0 }
 0x121   : > { %v2885_v20 = vadd.f32 %v2884_v16, %v2883_v12  ;;  %v2437_v22 = vmul.f32 0.01, %v7975_v38  ;;  %v8012_v23 = vunpack.c.l.b16 %v4356_v10  ;;  %vm2250_vm6 = vcmp.ge.f32.partialorder %v7090_v58, 0.0  ;;  %v7553_v10 = vld [vmem:[%s7788_s24 + $0x208] sm:$0xff]  }
 0x122   : > { %v2853_v24 = vrot.slane %v2852_v19, 1  ;;  %v2871_v25 = vadd.f32 %v2870_v46, %v2869_v17  ;;  %v8014_v26 = vpop.f32.mrb[16].mxu0  ;;  %v2631_v28 = vsel %vm2247_vm4, %v7972_v32, %v2439_v21  ;;  %v2442_v30 = vmul.f32 0.01, %v7090_v58 }
 0x123   : > { %v2886_v27 = vrot.slane %v2885_v20, 2  ;;  %v2629_v29 = vsel %vm2245_vm5, %v7975_v38, %v2437_v22  ;;  %v8018_v31 = vpop.f32.mrb[17].mxu0  ;;  %v4165_v34 = vmul.f32 0.125, %v2868_v18  ;;  %v2890_v37 = vsel %vm2812_vm3, %v2631_v28, 0.0  ;;  %v7556_v18 = vld [vmem:[%s7788_s24 + $0x210] sm:$0xff]  }
 0x124   : > { %v2854_v35 = vadd.f32 %v2853_v24, %v2852_v19  ;;  %v2872_v36 = vrot.slane %v2871_v25, 2  ;;  %v8022_v39 = vpop.f32.mrb[18].mxu0  ;;  %v2891_v42 = vrot.slane %v2890_v37, 4  ;;  %v2876_v43 = vsel %vm2812_vm3, %v2629_v29, 0.0 }
 0x125   : > { %v2887_v41 = vadd.f32 %v2886_v27, %v2885_v20  ;;  %v2634_v32 = vsel %vm2250_vm6, %v7090_v58, %v2442_v30  ;;  %v8027_v44 = vpop.f32.mrb[19].mxu0  ;;  %v2877_v47 = vrot.slane %v2876_v43, 4  ;;  %vm2248_vm7 = vcmp.ge.f32.partialorder %v7985_v3, 0.0 }
 0x126   : > { %v4163_v38 = vmul.f32 0.125, %v2854_v35  ;;  %v2873_v45 = vadd.f32 %v2872_v36, %v2871_v25  ;;  %v2911_v48 = vsel %vm2812_vm3, %v2634_v32, 0.0  ;;  %v2892_v50 = vadd.f32 %v2891_v42, %v2890_v37 }
 0x127   : > { %v2888_v49 = vrot.slane %v2887_v41, 1  ;;  %v2912_v51 = vrot.slane %v2911_v48, 4  ;;  %7201 = vmatmul.mubr.msk.bf16.gmra.mrb[124].mxu0 %vm1139_vm2, %v7549_v33  ;;  %v4357_v52 = vpack.c.bf16 %v4165_v34, %v4165_v34  ;;  %v2878_v54 = vadd.f32 %v2877_v47, %v2876_v43 }
 0x128   : > { %v2874_v53 = vrot.slane %v2873_v45, 1  ;;  %v2440_v55 = vmul.f32 0.01, %v7985_v3  ;;  %7204 = vmatprep.mubr.msk.bf16.mxu0 %vm1139_vm2, %v7552_v40  ;;  %v4355_v56 = vpack.c.bf16 %v4163_v38, %v4163_v38  ;;  %v2893_v58 = vrot.slane %v2892_v50, 2 }
 0x129   : > { %v2889_v57 = vadd.f32 %v2888_v49, %v2887_v41  ;;  %v2913_v59 = vadd.f32 %v2912_v51, %v2911_v48  ;;  %v2879_v61 = vrot.slane %v2878_v54, 2  ;;  %vm2251_vm8 = vcmp.ge.f32.partialorder %v7992_v8, 0.0 }
 0x12a   : > { %v2875_v60 = vadd.f32 %v2874_v53, %v2873_v45  ;;  %v2632_v2 = vsel %vm2248_vm7, %v7985_v3, %v2440_v55  ;;  %v8036_v62 = vpop.f32.mrb[20].mxu0  ;;  %v2894_v1 = vadd.f32 %v2893_v58, %v2892_v50  ;;  %v8045_v11 = vunpack.c.l.b16 %v4354_v15  ;;  %v7557_v50 = vld [vmem:[%s7788_s24 + $0x218] sm:$0xff]  }
 0x12b   : > { %v4168_v0 = vmul.f32 0.125, %v2889_v57  ;;  %v2914_v4 = vrot.slane %v2913_v59, 2  ;;  %v2897_v6 = vsel %vm2812_vm3, %v2632_v2, 0.0  ;;  %v8039_v7 = vpop.f32.mrb[21].mxu0  ;;  %v2880_v12 = vadd.f32 %v2879_v61, %v2878_v54 }
 0x12c   : > { %v2898_v16 = vrot.slane %v2897_v6, 4  ;;  %v2443_v3 = vmul.f32 0.01, %v7992_v8  ;;  %v8048_v17 = vpop.f32.mrb[22].mxu0  ;;  %v8051_v19 = vunpack.c.l.b16 %v4357_v52  ;;  %v4166_v46 = vmul.f32 0.125, %v2875_v60 }
 0x12d   : > { %v2895_v20 = vrot.slane %v2894_v1, 1  ;;  %v2915_v21 = vadd.f32 %v2914_v4, %v2913_v59  ;;  %v8053_v22 = vpop.f32.mrb[23].mxu0  ;;  %v8055_v24 = vunpack.c.l.b16 %v4355_v56  ;;  %v2881_v25 = vrot.slane %v2880_v12, 1  ;;  %v7560_v56 = vld [vmem:[%s7788_s24 + $0x220] sm:$0xff]  }
 0x12e   : > { %v2899_v63 = vadd.f32 %v2898_v16, %v2897_v6  ;;  %v2635_v15 = vsel %vm2251_vm8, %v7992_v8, %v2443_v3  ;;  %v4360_v27 = vpack.c.bf16 %v4168_v0, %v4168_v0  ;;  %vm2249_vm9 = vcmp.ge.f32.partialorder %v7999_v13, 0.0 }
 0x12f   : > { %v2896_v28 = vadd.f32 %v2895_v20, %v2894_v1  ;;  %v2916_v29 = vrot.slane %v2915_v21, 1  ;;  %v2918_v30 = vsel %vm2812_vm3, %v2635_v15, 0.0  ;;  %7205 = vmatmul.mubr.msk.bf16.gmra.mrb[128].mxu0 %vm1139_vm2, %v7553_v10  ;;  %v2882_v33 = vadd.f32 %v2881_v25, %v2880_v12 }
 0x130   : > { %v2900_v34 = vrot.slane %v2899_v63, 2  ;;  %v2919_v35 = vrot.slane %v2918_v30, 4  ;;  %7208 = vmatprep.mubr.msk.bf16.mxu0 %vm1139_vm2, %v7556_v18  ;;  %v4358_v36 = vpack.c.bf16 %v4166_v46, %v4166_v46  ;;  %v2441_v40 = vmul.f32 0.01, %v7999_v13 }
 0x131   : > { %v2917_v37 = vadd.f32 %v2916_v29, %v2915_v21  ;;  %vm2254_vm10 = vcmp.ge.f32.partialorder %v8014_v26, 0.0  ;;  %v4167_v8 = vmul.f32 0.125, %v2882_v33  ;;  %v2446_v43 = vmul.f32 0.01, %v8014_v26 }
 0x132   : > { %v2901_v41 = vadd.f32 %v2900_v34, %v2899_v63  ;;  %v2920_v42 = vadd.f32 %v2919_v35, %v2918_v30  ;;  %v8067_v32 = vpop.f32.mrb[24].mxu0  ;;  %v4727_v38 = vunpack.c.l.b16 %v4360_v27  ;;  %v4169_v45 = vmul.f32 0.125, %v2896_v28  ;;  %v7561_v34 = vld [vmem:[%s7788_s24 + $0x228] sm:$0xff]   ;;  %s7584_s24 = scalar_lea.vmem %s10135_s20, 16 }
 0x133   : > { %v4172_v47 = vmul.f32 0.125, %v2917_v37  ;;  %v2633_v48 = vsel %vm2249_vm9, %v7999_v13, %v2441_v40  ;;  %v8070_v49 = vpop.f32.mrb[25].mxu0  ;;  %v4359_v51 = vpack.c.bf16 %v4167_v8, %v4167_v8  ;;  %v4725_v57 = vunpack.c.l.b16 %v4358_v36  ;;  %p7585_p11 = scmp.ne.s32.totalorder %s10135_s20, %s7584_s24  ;;  %p7592_p1 = scmp.lt.s32.totalorder %s7590_s21, %s7584_s24 }
 0x134   : > { %v2902_v52 = vrot.slane %v2901_v41, 1  ;;  %v2921_v53 = vrot.slane %v2920_v42, 2  ;;  %v2904_v54 = vsel %vm2812_vm3, %v2633_v48, 0.0  ;;  %v8074_v55 = vpop.f32.mrb[26].mxu0  ;;  %v2638_v59 = vsel %vm2254_vm10, %v8014_v26, %v2446_v43 }
 0x135   : > { %v2905_v58 = vrot.slane %v2904_v54, 4  ;;  %vm2252_vm11 = vcmp.ge.f32.partialorder %v8018_v31, 0.0  ;;  %v8081_v13 = vpop.f32.mrb[27].mxu0  ;;  %v4726_v60 = vunpack.c.l.b16 %v4359_v51  ;;  %v2939_v0 = vsel %vm2812_vm3, %v2638_v59, 0.0  ;;  %p7586_p12 = pnand %p7585_p11, %p7760_p5  ;;  %p7593_p2 = por %p7592_p1, %p7591_p0 }
 0x136   : > { %v2903_v61 = vadd.f32 %v2902_v52, %v2901_v41  ;;  %v2922_v2 = vadd.f32 %v2921_v53, %v2920_v42  ;;  %v4361_v1 = vpack.c.bf16 %v4169_v45, %v4169_v45  ;;  %v2940_v6 = vrot.slane %v2939_v0, 4 }
 0x137   : > { %v2906_v4 = vadd.f32 %v2905_v58, %v2904_v54  ;;  %v2444_v10 = vmul.f32 0.01, %v8018_v31  ;;  %7209 = vmatmul.mubr.msk.bf16.gmra.mrb[132].mxu0 %vm1139_vm2, %v7557_v50  ;;  %v4748_v12 = vsel %vm4597_vm12, %v4726_v60, %v4725_v57  ;;  %v4364_v16 = vpack.c.bf16 %v4172_v47, %v4172_v47  ;;  %p7587_p13 = pneg %p7586_p12 }
 0x138   : > { %v2923_v26 = vrot.slane %v2922_v2, 1  ;;  %vm2255_vm13 = vcmp.ge.f32.partialorder %v8022_v39, 0.0  ;;  %7212 = vmatprep.mubr.msk.bf16.mxu0 %vm1139_vm2, %v7560_v56  ;;  %v8090_v3 = vsel %vm4599_vm15, %v4727_v38, %v4748_v12  ;;  %v2941_v46 = vadd.f32 %v2940_v6, %v2939_v0 }
 0x139   : > { %v2907_v18 = vrot.slane %v2906_v4, 2  ;;  %v2636_v20 = vsel %vm2252_vm11, %v8018_v31, %v2444_v10  ;;  %v4170_v21 = vmul.f32 0.125, %v2903_v61  ;;  %v2447_v15 = vmul.f32 0.01, %v8022_v39  ;;  %p7594_p3 = pnand %p7593_p2, %p7587_p13 }
 0x13a   : > { %v2924_v25 = vadd.f32 %v2923_v26, %v2922_v2  ;;  %v2925_v63 = vsel %vm2812_vm3, %v2636_v20, 0.0  ;;  %v8097_v27 = vpop.f32.mrb[28].mxu0  ;;  %v2942_v29 = vrot.slane %v2941_v46, 2  ;;  %vm2253_vm14 = vcmp.ge.f32.partialorder %v8027_v44, 0.0 }
 0x13b   : > { %v2908_v28 = vadd.f32 %v2907_v18, %v2906_v4  ;;  %v2926_v30 = vrot.slane %v2925_v63, 4  ;;  %v8100_v33 = vpop.f32.mrb[29].mxu0  ;;  %v8103_v35 = vunpack.c.l.b16 %v4361_v1  ;;  %v2639_v31 = vsel %vm2255_vm13, %v8022_v39, %v2447_v15 }
 0x13c   : > { %v4173_v36 = vmul.f32 0.125, %v2924_v25  ;;  %v2445_v37 = vmul.f32 0.01, %v8027_v44  ;;  %v8109_v40 = vpop.f32.mrb[30].mxu0  ;;  %v2943_v41 = vadd.f32 %v2942_v29, %v2941_v46  ;;  %v2946_v43 = vsel %vm2812_vm3, %v2639_v31, 0.0 }
 0x13d   : > { %v2909_v8 = vrot.slane %v2908_v28, 1  ;;  %v2927_v42 = vadd.f32 %v2926_v30, %v2925_v63  ;;  %v8112_v38 = vpop.f32.mrb[31].mxu0  ;;  %v8114_v45 = vunpack.c.l.b16 %v4364_v16  ;;  %v4362_v47 = vpack.c.bf16 %v4170_v21, %v4170_v21 }
 0x13e   : > { %v2947_v48 = vrot.slane %v2946_v43, 4  ;;  %v2637_v50 = vsel %vm2253_vm14, %v8027_v44, %v2445_v37  ;;  %v2944_v39 = vrot.slane %v2943_v41, 1  ;;  %vm2258_vm0 = vcmp.ge.f32.partialorder %v8036_v62, 0.0 }
 0x13f   : > { %10255 = vst [vmem:[#allocation6_spill] sm:$0xff] %v8114_v45  ;;  %v2928_v51 = vrot.slane %v2927_v42, 2  ;;  %v2932_v52 = vsel %vm2812_vm3, %v2637_v50, 0.0  ;;  %7213 = vmatmul.mubr.msk.bf16.gmra.mrb[136].mxu0 %vm1139_vm2, %v7561_v34  ;;  %v4365_v53 = vpack.c.bf16 %v4173_v36, %v4173_v36  ;;  %v2450_v57 = vmul.f32 0.01, %v8036_v62 }
 0x140   : > { %v2948_v54 = vadd.f32 %v2947_v48, %v2946_v43  ;;  %v2933_v56 = vrot.slane %v2932_v52, 4  ;;  %v2910_v58 = vadd.f32 %v2909_v8, %v2908_v28  ;;  %v2945_v59 = vadd.f32 %v2944_v39, %v2943_v41 }
 0x141   : > { %v2929_v60 = vadd.f32 %v2928_v51, %v2927_v42  ;;  %vm2256_vm1 = vcmp.ge.f32.partialorder %v8039_v7, 0.0  ;;  %v2642_v2 = vsel %vm2258_vm0, %v8036_v62, %v2450_v57  ;;  %v2448_v0 = vmul.f32 0.01, %v8039_v7 }
 0x142   : > { %v2949_v61 = vrot.slane %v2948_v54, 2  ;;  %v2934_v44 = vadd.f32 %v2933_v56, %v2932_v52  ;;  %v8126_v1 = vpop.f32.mrb[32].mxu0  ;;  %v8128_v4 = vunpack.c.l.b16 %v4362_v47  ;;  %v4176_v6 = vmul.f32 0.125, %v2945_v59 }
 0x143   : > { %v2930_v10 = vrot.slane %v2929_v60, 1  ;;  %v2967_v12 = vsel %vm2812_vm3, %v2642_v2, 0.0  ;;  %v8131_v16 = vpop.f32.mrb[33].mxu0  ;;  %v2640_v20 = vsel %vm2256_vm1, %v8039_v7, %v2448_v0  ;;  %v8136_v62 = vunpack.c.l.b16 %v4365_v53 }
 0x144   : > { %v2950_v26 = vadd.f32 %v2949_v61, %v2948_v54  ;;  %v2935_v18 = vrot.slane %v2934_v44, 2  ;;  %v2968_v46 = vrot.slane %v2967_v12, 4  ;;  %v8134_v21 = vpop.f32.mrb[34].mxu0  ;;  %v8138_v25 = vmul.f32 0.125, %v2910_v58 }
 0x145   : > { %10256 = vst [vmem:[#allocation7_spill] sm:$0xff] %v8136_v62  ;;  %v2931_v63 = vadd.f32 %v2930_v10, %v2929_v60  ;;  %v2953_v15 = vsel %vm2812_vm3, %v2640_v20, 0.0  ;;  %v8141_v28 = vpop.f32.mrb[35].mxu0  ;;  %v4368_v31 = vpack.c.bf16 %v4176_v6, %v4176_v6  ;;  %vm2259_vm2 = vcmp.ge.f32.partialorder %v8048_v17, 0.0 }
 0x146   : > { %v2951_v29 = vrot.slane %v2950_v26, 1  ;;  %v2936_v30 = vadd.f32 %v2935_v18, %v2934_v44  ;;  %v2969_v34 = vadd.f32 %v2968_v46, %v2967_v12  ;;  %v2954_v36 = vrot.slane %v2953_v15, 4 }
 0x147   : > { %v4174_v37 = vmul.f32 0.125, %v2931_v63  ;;  %v2451_v7 = vmul.f32 0.01, %v8048_v17  ;;  %vm2257_vm4 = vcmp.ge.f32.partialorder %v8053_v22, 0.0  ;;  %v2449_v50 = vmul.f32 0.01, %v8053_v22 }
 0x148   : > { %v2952_v8 = vadd.f32 %v2951_v29, %v2950_v26  ;;  %v2937_v41 = vrot.slane %v2936_v30, 1  ;;  %v2970_v42 = vrot.slane %v2969_v34, 2  ;;  %v2955_v43 = vadd.f32 %v2954_v36, %v2953_v15 }
 0x149   : > { %v4366_v47 = vpack.c.bf16 %v4174_v37, %v4174_v37  ;;  %v2643_v48 = vsel %vm2259_vm2, %v8048_v17, %v2451_v7  ;;  %v4363_v56 = vpack.c.bf16 %v8138_v25, %v8138_v25  ;;  %v4735_v57 = vunpack.c.l.b16 %v4368_v31 }
 0x14a   : > { %v4177_v39 = vmul.f32 0.125, %v2952_v8  ;;  %v2938_v51 = vadd.f32 %v2937_v41, %v2936_v30  ;;  %v2971_v52 = vadd.f32 %v2970_v42, %v2969_v34  ;;  %v2956_v53 = vrot.slane %v2955_v43, 2  ;;  %v8148_v54 = vpop.f32.mrb[36].mxu0 }
 0x14b   : > { %vm4601_vm5 = vcmask 1043459   ;;  %v2974_v58 = vsel %vm2812_vm3, %v2643_v48, 0.0  ;;  %v2641_v59 = vsel %vm2257_vm4, %v8053_v22, %v2449_v50  ;;  %v8154_v17 = vpop.f32.mrb[37].mxu0  ;;  %vm2262_vm6 = vcmp.ge.f32.partialorder %v8067_v32, 0.0 }
 0x14c   : > { %v4369_v60 = vpack.c.bf16 %v4177_v39, %v4177_v39  ;;  %v4175_v61 = vmul.f32 0.125, %v2938_v51  ;;  %v2957_v44 = vadd.f32 %v2956_v53, %v2955_v43  ;;  %v8157_v2 = vpop.f32.mrb[38].mxu0  ;;  %v4733_v0 = vunpack.c.l.b16 %v4366_v47 }
 0x14d   : > { %v2975_v6 = vrot.slane %v2974_v58, 4  ;;  %v2960_v10 = vsel %vm2812_vm3, %v2641_v59, 0.0  ;;  %v2454_v12 = vmul.f32 0.01, %v8067_v32  ;;  %v8161_v26 = vpop.f32.mrb[39].mxu0  ;;  %v2972_v46 = vrot.slane %v2971_v52, 1 }
 0x14e   : > { %v4367_v18 = vpack.c.bf16 %v4175_v61, %v4175_v61  ;;  %v2958_v22 = vrot.slane %v2957_v44, 1  ;;  %vm2260_vm7 = vcmp.ge.f32.partialorder %v8070_v49, 0.0  ;;  %vm4603_vm8 = vcmask 1044484  }
 0x14f   : > { %v2976_v20 = vadd.f32 %v2975_v6, %v2974_v58  ;;  %v2961_v25 = vrot.slane %v2960_v10, 4  ;;  %v2646_v63 = vsel %vm2262_vm6, %v8067_v32, %v2454_v12  ;;  %v2452_v15 = vmul.f32 0.01, %v8070_v49 }
 0x150   : > { %v4736_v29 = vunpack.c.l.b16 %v4369_v60  ;;  %v4734_v30 = vunpack.c.l.b16 %v4367_v18  ;;  %v2959_v34 = vadd.f32 %v2958_v22, %v2957_v44  ;;  %v2995_v36 = vsel %vm2812_vm3, %v2646_v63, 0.0 }
 0x151   : > { %v2977_v31 = vrot.slane %v2976_v20, 2  ;;  %v2962_v37 = vadd.f32 %v2961_v25, %v2960_v10  ;;  %v2996_v7 = vrot.slane %v2995_v36, 4  ;;  %v2644_v8 = vsel %vm2260_vm7, %v8070_v49, %v2452_v15 }
 0x152   : > { %v4755_v41 = vsel %vm4597_vm12, %v4734_v30, %v4733_v0  ;;  %v2973_v42 = vadd.f32 %v2972_v46, %v2971_v52  ;;  %v4178_v43 = vmul.f32 0.125, %v2959_v34  ;;  %v2981_v47 = vsel %vm2812_vm3, %v2644_v8, 0.0  ;;  %v8170_v48 = vpop.f32.mrb[40].mxu0 }
 0x153   : > { %v4756_v32 = vsel %vm4599_vm15, %v4735_v57, %v4755_v41  ;;  %v2978_v50 = vadd.f32 %v2977_v31, %v2976_v20  ;;  %v2963_v39 = vrot.slane %v2962_v37, 2  ;;  %v2997_v51 = vadd.f32 %v2996_v7, %v2995_v36  ;;  %v8173_v53 = vpop.f32.mrb[41].mxu0 }
 0x154   : > { %v8175_v58 = vunpack.c.l.b16 %v4363_v56  ;;  %v4370_v59 = vpack.c.bf16 %v4178_v43, %v4178_v43  ;;  %v4757_v49 = vsel %vm4601_vm5, %v4736_v29, %v4756_v32  ;;  %v2982_v60 = vrot.slane %v2981_v47, 4  ;;  %v8178_v61 = vpop.f32.mrb[42].mxu0 }
 0x155   : > { %v2979_v52 = vrot.slane %v2978_v50, 1  ;;  %v2964_v44 = vadd.f32 %v2963_v39, %v2962_v37  ;;  %v2998_v0 = vrot.slane %v2997_v51, 2  ;;  %vm2263_vm9 = vcmp.ge.f32.partialorder %v8074_v55, 0.0  ;;  %v8181_v6 = vpop.f32.mrb[43].mxu0 }
 0x156   : > { %10257 = vst [vmem:[#allocation8_spill] sm:$0xff] %v8175_v58  ;;  %v4180_v57 = vmul.f32 0.125, %v2973_v42  ;;  %v4737_v10 = vunpack.c.l.b16 %v4370_v59  ;;  %v2983_v12 = vadd.f32 %v2982_v60, %v2981_v47  ;;  %v2455_v18 = vmul.f32 0.01, %v8074_v55 }
 0x157   : > { %v2965_v56 = vrot.slane %v2964_v44, 1  ;;  %v2999_v46 = vadd.f32 %v2998_v0, %v2997_v51  ;;  %vm2261_vm10 = vcmp.ge.f32.partialorder %v8081_v13, 0.0  ;;  %v2453_v22 = vmul.f32 0.01, %v8081_v13 }
 0x158   : > { %v4758_v20 = vsel %vm4603_vm8, %v4737_v10, %v4757_v49  ;;  %v2980_v25 = vadd.f32 %v2979_v52, %v2978_v50  ;;  %vm4605_vm11 = vcmask 1045509   ;;  %v2984_v63 = vrot.slane %v2983_v12, 2 }
 0x159   : > { %v2647_v15 = vsel %vm2263_vm9, %v8074_v55, %v2455_v18  ;;  %v2966_v29 = vadd.f32 %v2965_v56, %v2964_v44  ;;  %v3000_v30 = vrot.slane %v2999_v46, 1  ;;  %vm2266_vm13 = vcmp.ge.f32.partialorder %v8097_v27, 0.0 }
 0x15a   : > { %v3002_v34 = vsel %vm2812_vm3, %v2647_v15, 0.0  ;;  %v2985_v36 = vadd.f32 %v2984_v63, %v2983_v12  ;;  %v2645_v37 = vsel %vm2261_vm10, %v8081_v13, %v2453_v22  ;;  %v2458_v7 = vmul.f32 0.01, %v8097_v27  ;;  %v8192_v8 = vpop.f32.mrb[44].mxu0 }
 0x15b   : > { %v3003_v31 = vrot.slane %v3002_v34, 4  ;;  %v4372_v41 = vpack.c.bf16 %v4180_v57, %v4180_v57  ;;  %v4179_v42 = vmul.f32 0.125, %v2966_v29  ;;  %v3001_v43 = vadd.f32 %v3000_v30, %v2999_v46  ;;  %v8195_v55 = vpop.f32.mrb[45].mxu0 }
 0x15c   : > { %v2988_v47 = vsel %vm2812_vm3, %v2645_v37, 0.0  ;;  %v2986_v32 = vrot.slane %v2985_v36, 1  ;;  %v2650_v51 = vsel %vm2266_vm13, %v8097_v27, %v2458_v7  ;;  %v8198_v59 = vpop.f32.mrb[46].mxu0  ;;  %v8200_v49 = vmul.f32 0.125, %v2980_v25 }
 0x15d   : > { %v3004_v50 = vadd.f32 %v3003_v31, %v3002_v34  ;;  %v2989_v39 = vrot.slane %v2988_v47, 4  ;;  %v4371_v13 = vpack.c.bf16 %v4179_v42, %v4179_v42  ;;  %v4184_v60 = vmul.f32 0.125, %v3001_v43  ;;  %v8203_v44 = vpop.f32.mrb[47].mxu0 }
 0x15e   : > { %v3023_v52 = vsel %vm2812_vm3, %v2650_v51, 0.0  ;;  %v2987_v0 = vadd.f32 %v2986_v32, %v2985_v36  ;;  %v8205_v18 = vunpack.c.l.b16 %v4372_v41  ;;  %vm2264_vm14 = vcmp.ge.f32.partialorder %v8100_v33, 0.0 }
 0x15f   : > { %v3005_v57 = vrot.slane %v3004_v50, 2  ;;  %v2990_v10 = vadd.f32 %v2989_v39, %v2988_v47  ;;  %v3024_v12 = vrot.slane %v3023_v52, 4  ;;  %v4738_v56 = vunpack.c.l.b16 %v4371_v13 }
 0x160   : > { %10258 = vst [vmem:[#allocation9_spill] sm:$0xff] %v8205_v18  ;;  %v2456_v27 = vmul.f32 0.01, %v8100_v33  ;;  %v4376_v46 = vpack.c.bf16 %v4184_v60, %v4184_v60  ;;  %v4182_v30 = vmul.f32 0.125, %v2987_v0  ;;  %vm2267_vm0 = vcmp.ge.f32.partialorder %v8109_v40, 0.0 }
 0x161   : > { %v3006_v22 = vadd.f32 %v3005_v57, %v3004_v50  ;;  %v2991_v25 = vrot.slane %v2990_v10, 2  ;;  %v3025_v63 = vadd.f32 %v3024_v12, %v3023_v52  ;;  %v8212_v29 = vsel %vm4605_vm11, %v4738_v56, %v4758_v20 }
 0x162   : > { %10259 = vst [vmem:[#allocation10_spill] sm:$0xff] %v8212_v29  ;;  %v2648_v34 = vsel %vm2264_vm14, %v8100_v33, %v2456_v27  ;;  %v8216_v7 = vpop.f32.mrb[48].mxu0  ;;  %v2459_v42 = vmul.f32 0.01, %v8109_v40  ;;  %vm2265_vm1 = vcmp.ge.f32.partialorder %v8112_v38, 0.0  ;;  %v4575_v20 = vunpack.c.l.b16 %v4376_v46 }
 0x163   : > { %v3007_v36 = vrot.slane %v3006_v22, 1  ;;  %v2992_v31 = vadd.f32 %v2991_v25, %v2990_v10  ;;  %v3026_v37 = vrot.slane %v3025_v63, 2  ;;  %v3009_v41 = vsel %vm2812_vm3, %v2648_v34, 0.0  ;;  %v8222_v33 = vpop.f32.mrb[49].mxu0 }
 0x164   : > { %v2457_v43 = vmul.f32 0.01, %v8112_v38  ;;  %v4374_v39 = vpack.c.bf16 %v4182_v30, %v4182_v30  ;;  %v3010_v51 = vrot.slane %v3009_v41, 4  ;;  %v2651_v13 = vsel %vm2267_vm0, %v8109_v40, %v2459_v42  ;;  %v8226_v52 = vpop.f32.mrb[50].mxu0 }
 0x165   : > { %v3008_v47 = vadd.f32 %v3007_v36, %v3006_v22  ;;  %v2993_v32 = vrot.slane %v2992_v31, 1  ;;  %v3027_v50 = vadd.f32 %v3026_v37, %v3025_v63  ;;  %v3030_v10 = vsel %vm2812_vm3, %v2651_v13, 0.0  ;;  %v8230_v12 = vpop.f32.mrb[51].mxu0 }
 0x166   : > { %v2649_v60 = vsel %vm2265_vm1, %v8112_v38, %v2457_v43  ;;  %vm2270_vm2 = vcmp.ge.f32.partialorder %v8126_v1, 0.0  ;;  %v3011_v56 = vadd.f32 %v3010_v51, %v3009_v41  ;;  %v3031_v27 = vrot.slane %v3030_v10, 4 }
 0x167   : > { %v2994_v0 = vadd.f32 %v2993_v32, %v2992_v31  ;;  %v3028_v57 = vrot.slane %v3027_v50, 1  ;;  %v3016_v46 = vsel %vm2812_vm3, %v2649_v60, 0.0  ;;  %v2462_v22 = vmul.f32 0.01, %v8126_v1 }
 0x168   : > { %v4185_v25 = vmul.f32 0.125, %v3008_v47  ;;  %v3017_v38 = vrot.slane %v3016_v46, 4  ;;  %v4573_v30 = vunpack.c.l.b16 %v4374_v39  ;;  %v3012_v34 = vrot.slane %v3011_v56, 2 }
 0x169   : > { %v4183_v40 = vmul.f32 0.125, %v2994_v0  ;;  %v3029_v63 = vadd.f32 %v3028_v57, %v3027_v50  ;;  %v3032_v36 = vadd.f32 %v3031_v27, %v3030_v10  ;;  %v2654_v31 = vsel %vm2270_vm2, %v8126_v1, %v2462_v22 }
 0x16a   : > { %v3018_v43 = vadd.f32 %v3017_v38, %v3016_v46  ;;  %vm2268_vm4 = vcmp.ge.f32.partialorder %v8131_v16, 0.0  ;;  %v8236_v41 = vpop.f32.mrb[52].mxu0  ;;  %v3013_v32 = vadd.f32 %v3012_v34, %v3011_v56  ;;  %v3051_v13 = vsel %vm2812_vm3, %v2654_v31, 0.0 }
 0x16b   : > { %v4375_v37 = vpack.c.bf16 %v4183_v40, %v4183_v40  ;;  %v4188_v42 = vmul.f32 0.125, %v3029_v63  ;;  %v3033_v51 = vrot.slane %v3032_v36, 2  ;;  %v2460_v47 = vmul.f32 0.01, %v8131_v16  ;;  %v8240_v50 = vpop.f32.mrb[53].mxu0 }
 0x16c   : > { %v4377_v39 = vpack.c.bf16 %v4185_v25, %v4185_v25  ;;  %v3019_v0 = vrot.slane %v3018_v43, 2  ;;  %v3052_v57 = vrot.slane %v3051_v13, 4  ;;  %v8242_v1 = vpop.f32.mrb[54].mxu0  ;;  %v3014_v27 = vrot.slane %v3013_v32, 1 }
 0x16d   : > { %v4574_v60 = vunpack.c.l.b16 %v4375_v37  ;;  %v4380_v10 = vpack.c.bf16 %v4188_v42, %v4188_v42  ;;  %v3034_v46 = vadd.f32 %v3033_v51, %v3032_v36  ;;  %v2652_v22 = vsel %vm2268_vm4, %v8131_v16, %v2460_v47  ;;  %v8245_v40 = vpop.f32.mrb[55].mxu0 }
 0x16e   : > { %v3020_v63 = vadd.f32 %v3019_v0, %v3018_v43  ;;  %v3053_v38 = vadd.f32 %v3052_v57, %v3051_v13  ;;  %vm2271_vm6 = vcmp.ge.f32.partialorder %v8134_v21, 0.0  ;;  %v3015_v34 = vadd.f32 %v3014_v27, %v3013_v32 }
 0x16f   : > { %v4598_v56 = vsel %vm4597_vm12, %v4574_v60, %v4573_v30  ;;  %v3035_v31 = vrot.slane %v3034_v46, 1  ;;  %v3037_v37 = vsel %vm2812_vm3, %v2652_v22, 0.0  ;;  %v2463_v16 = vmul.f32 0.01, %v8134_v21 }
 0x170   : > { %v8250_v25 = vsel %vm4599_vm15, %v4575_v20, %v4598_v56  ;;  %v3021_v42 = vrot.slane %v3020_v63, 1  ;;  %v3054_v15 = vrot.slane %v3053_v38, 2  ;;  %v3038_v36 = vrot.slane %v3037_v37, 4 }
 0x171   : > { %v4186_v51 = vmul.f32 0.125, %v3015_v34  ;;  %v3036_v47 = vadd.f32 %v3035_v31, %v3034_v46  ;;  %vm2269_vm7 = vcmp.ge.f32.partialorder %v8141_v28, 0.0  ;;  %v2461_v30 = vmul.f32 0.01, %v8141_v28 }
 0x172   : > { %v3022_v43 = vadd.f32 %v3021_v42, %v3020_v63  ;;  %v3055_v13 = vadd.f32 %v3054_v15, %v3053_v38  ;;  %v3039_v60 = vadd.f32 %v3038_v36, %v3037_v37  ;;  %v2655_v20 = vsel %vm2271_vm6, %v8134_v21, %v2463_v16  ;;  %v8259_v32 = vpop.f32.mrb[56].mxu0 }
 0x173   : > { %v4378_v0 = vpack.c.bf16 %v4186_v51, %v4186_v51  ;;  %v8261_v57 = vmul.f32 0.125, %v3036_v47  ;;  %v3058_v27 = vsel %vm2812_vm3, %v2655_v20, 0.0  ;;  %v2653_v46 = vsel %vm2269_vm7, %v8141_v28, %v2461_v30  ;;  %v8265_v22 = vpop.f32.mrb[57].mxu0 }
 0x174   : > { %v10260_v56 = vpack.c.bf16 %v8200_v49, %v8200_v49  ;;  %v3056_v63 = vrot.slane %v3055_v13, 1  ;;  %v3040_v38 = vrot.slane %v3039_v60, 2  ;;  %v3059_v34 = vrot.slane %v3058_v27, 4  ;;  %v8272_v21 = vpop.f32.mrb[58].mxu0 }
 0x175   : > { %v8274_v31 = vunpack.c.l.b16 %v4377_v39  ;;  %v8276_v37 = vunpack.c.l.b16 %v4380_v10  ;;  %v8278_v42 = vmul.f32 0.125, %v3022_v43  ;;  %v3044_v28 = vsel %vm2812_vm3, %v2653_v46, 0.0  ;;  %v8281_v36 = vpop.f32.mrb[59].mxu0 }
 0x176   : > { %v8270_v15 = vunpack.c.l.b16 %v10260_v56  ;;  %v3057_v16 = vadd.f32 %v3056_v63, %v3055_v13  ;;  %v3041_v51 = vadd.f32 %v3040_v38, %v3039_v60  ;;  %v3060_v49 = vadd.f32 %v3059_v34, %v3058_v27 }
 0x177   : > { %vm2274_vm9 = vcmp.ge.f32.partialorder %v8148_v54, 0.0  ;;  %v8284_v47 = vunpack.c.l.b16 %v4378_v0  ;;  %v3045_v39 = vrot.slane %v3044_v28, 4  ;;  %v2466_v10 = vmul.f32 0.01, %v8148_v54 }
 0x178   : > { %10261 = vst [vmem:[#allocation11_spill] sm:$0xff] %v8270_v15  ;;  %v4192_v20 = vmul.f32 0.125, %v3057_v16  ;;  %v3042_v43 = vrot.slane %v3041_v51, 1  ;;  %v3061_v56 = vrot.slane %v3060_v49, 2  ;;  %vm2272_vm10 = vcmp.ge.f32.partialorder %v8154_v17, 0.0 }
 0x179   : > { %v3046_v60 = vadd.f32 %v3045_v39, %v3044_v28  ;;  %v2658_v27 = vsel %vm2274_vm9, %v8148_v54, %v2466_v10  ;;  %v2464_v0 = vmul.f32 0.01, %v8154_v17  ;;  %vm2275_vm13 = vcmp.ge.f32.partialorder %v8157_v2, 0.0 }
 0x17a   : > { %v3043_v46 = vadd.f32 %v3042_v43, %v3041_v51  ;;  %v3062_v63 = vadd.f32 %v3061_v56, %v3060_v49  ;;  %v3079_v38 = vsel %vm2812_vm3, %v2658_v27, 0.0  ;;  %v8296_v34 = vpop.f32.mrb[60].mxu0  ;;  %v2467_v18 = vmul.f32 0.01, %v8157_v2 }
 0x17b   : > { %v3047_v16 = vrot.slane %v3046_v60, 2  ;;  %v3080_v30 = vrot.slane %v3079_v38, 4  ;;  %v2656_v15 = vsel %vm2272_vm10, %v8154_v17, %v2464_v0  ;;  %v8300_v13 = vpop.f32.mrb[61].mxu0  ;;  %v4384_v28 = vpack.c.bf16 %v4192_v20, %v4192_v20 }
 0x17c   : > { %10262 = vst [vmem:[#allocation12_spill] sm:$0xff] %v8300_v13  ;;  %v4190_v54 = vmul.f32 0.125, %v3043_v46  ;;  %v3063_v39 = vrot.slane %v3062_v63, 1  ;;  %v3065_v51 = vsel %vm2812_vm3, %v2656_v15, 0.0  ;;  %v8303_v49 = vpop.f32.mrb[62].mxu0  ;;  %v2659_v27 = vsel %vm2275_vm13, %v8157_v2, %v2467_v18 }
 0x17d   : > { %v3048_v10 = vadd.f32 %v3047_v16, %v3046_v60  ;;  %v3081_v43 = vadd.f32 %v3080_v30, %v3079_v38  ;;  %v3066_v56 = vrot.slane %v3065_v51, 4  ;;  %v8306_v29 = vpop.f32.mrb[63].mxu0  ;;  %v3086_v0 = vsel %vm2812_vm3, %v2659_v27, 0.0 }
 0x17e   : > { %10263 = vst [vmem:[#allocation13_spill] sm:$0xff] %v8306_v29  ;;  %v4382_v62 = vpack.c.bf16 %v4190_v54, %v4190_v54  ;;  %v3064_v17 = vadd.f32 %v3063_v39, %v3062_v63  ;;  %vm2273_vm14 = vcmp.ge.f32.partialorder %v8161_v26, 0.0  ;;  %v3087_v13 = vrot.slane %v3086_v0, 4 }
 0x17f   : > { %v3049_v20 = vrot.slane %v3048_v10, 1  ;;  %v3082_v46 = vrot.slane %v3081_v43, 2  ;;  %v3067_v45 = vadd.f32 %v3066_v56, %v3065_v51  ;;  %v4583_v15 = vunpack.c.l.b16 %v4384_v28 }
 0x180   : > { %v4193_v58 = vmul.f32 0.125, %v3064_v17  ;;  %v2465_v60 = vmul.f32 0.01, %v8161_v26  ;;  %vm2278_vm0 = vcmp.ge.f32.partialorder %v8170_v48, 0.0  ;;  %v3088_v38 = vadd.f32 %v3087_v13, %v3086_v0 }
 0x181   : > { %v3050_v30 = vadd.f32 %v3049_v20, %v3048_v10  ;;  %v3083_v2 = vadd.f32 %v3082_v46, %v3081_v43  ;;  %v3068_v18 = vrot.slane %v3067_v45, 2  ;;  %v4581_v16 = vunpack.c.l.b16 %v4382_v62 }
 0x182   : > { %v2657_v63 = vsel %vm2273_vm14, %v8161_v26, %v2465_v60  ;;  %v2470_v54 = vmul.f32 0.01, %v8170_v48  ;;  %vm2276_vm1 = vcmp.ge.f32.partialorder %v8173_v53, 0.0  ;;  %v8315_v39 = vpop.f32.mrb[64].mxu0  ;;  %v3089_v27 = vrot.slane %v3088_v38, 2 }
 0x183   : > { %v4191_v51 = vmul.f32 0.125, %v3050_v30  ;;  %v3084_v28 = vrot.slane %v3083_v2, 1  ;;  %v3069_v56 = vadd.f32 %v3068_v18, %v3067_v45  ;;  %v8317_v17 = vpop.f32.mrb[65].mxu0  ;;  %v4385_v29 = vpack.c.bf16 %v4193_v58, %v4193_v58 }
 0x184   : > { %10264 = vst [vmem:[#allocation14_spill] sm:$0xff] %v8317_v17  ;;  %v3072_v10 = vsel %vm2812_vm3, %v2657_v63, 0.0  ;;  %v2662_v62 = vsel %vm2278_vm0, %v8170_v48, %v2470_v54  ;;  %v2468_v26 = vmul.f32 0.01, %v8173_v53  ;;  %v8324_v13 = vpop.f32.mrb[66].mxu0  ;;  %v3090_v46 = vadd.f32 %v3089_v27, %v3088_v38 }
 0x185   : > { %10265 = vst [vmem:[#allocation15_spill] sm:$0xff] %v8324_v13  ;;  %v4383_v43 = vpack.c.bf16 %v4191_v51, %v4191_v51  ;;  %v3085_v0 = vadd.f32 %v3084_v28, %v3083_v2  ;;  %v3070_v20 = vrot.slane %v3069_v56, 1  ;;  %v8326_v60 = vpop.f32.mrb[67].mxu0  ;;  %v3073_v45 = vrot.slane %v3072_v10, 4 }
 0x186   : > { %10266 = vst [vmem:[#allocation16_spill] sm:$0xff] %v8326_v60  ;;  %v3107_v30 = vsel %vm2812_vm3, %v2662_v62, 0.0  ;;  %v2660_v58 = vsel %vm2276_vm1, %v8173_v53, %v2468_v26  ;;  %vm2279_vm2 = vcmp.ge.f32.partialorder %v8178_v61, 0.0  ;;  %v3091_v54 = vrot.slane %v3090_v46, 1 }
 0x187   : > { %v4582_v48 = vunpack.c.l.b16 %v4383_v43  ;;  %v4196_v18 = vmul.f32 0.125, %v3085_v0  ;;  %v3071_v63 = vadd.f32 %v3070_v20, %v3069_v56  ;;  %v3074_v13 = vadd.f32 %v3073_v45, %v3072_v10 }
 0x188   : > { %v3108_v51 = vrot.slane %v3107_v30, 4  ;;  %v3093_v2 = vsel %vm2812_vm3, %v2660_v58, 0.0  ;;  %v2471_v38 = vmul.f32 0.01, %v8178_v61  ;;  %v10267_v28 = vpack.c.bf16 %v8261_v57, %v8261_v57 }
 0x189   : > { %v4611_v62 = vsel %vm4597_vm12, %v4582_v48, %v4581_v16  ;;  %v4388_v53 = vpack.c.bf16 %v4196_v18, %v4196_v18  ;;  %v3092_v26 = vadd.f32 %v3091_v54, %v3090_v46  ;;  %v3075_v56 = vrot.slane %v3074_v13, 2 }
 0x18a   : > { %v8338_v27 = vunpack.c.l.b16 %v10267_v28  ;;  %v8342_v43 = vsel %vm4599_vm15, %v4583_v15, %v4611_v62  ;;  %v3109_v0 = vadd.f32 %v3108_v51, %v3107_v30  ;;  %v3094_v10 = vrot.slane %v3093_v2, 4  ;;  %v8344_v20 = vpop.f32.mrb[68].mxu0 }
 0x18b   : > { %10268 = vst [vmem:[#allocation17_spill] sm:$0xff] %v8344_v20  ;;  %v10269_v45 = vpack.c.bf16 %v8278_v42, %v8278_v42  ;;  %v8351_v57 = vunpack.c.l.b16 %v4385_v29  ;;  %v4194_v28 = vmul.f32 0.125, %v3071_v63  ;;  %v2663_v16 = vsel %vm2279_vm2, %v8178_v61, %v2471_v38  ;;  %v8356_v46 = vpop.f32.mrb[69].mxu0 }
 0x18c   : > { %10270 = vst [vmem:[#allocation18_spill] sm:$0xff] %v8356_v46  ;;  %v3076_v15 = vadd.f32 %v3075_v56, %v3074_v13  ;;  %v3110_v48 = vrot.slane %v3109_v0, 2  ;;  %v3095_v30 = vadd.f32 %v3094_v10, %v3093_v2  ;;  %v3114_v18 = vsel %vm2812_vm3, %v2663_v16, 0.0  ;;  %v8359_v54 = vpop.f32.mrb[70].mxu0 }
 0x18d   : > { %v8349_v58 = vunpack.c.l.b16 %v10269_v45  ;;  %10271 = vst [vmem:[#allocation19_spill] sm:$0xff] %v8359_v54  ;;  %v8361_v51 = vunpack.c.l.b16 %v4388_v53  ;;  %v4197_v42 = vmul.f32 0.125, %v3092_v26  ;;  %v3115_v62 = vrot.slane %v3114_v18, 4  ;;  %v8364_v29 = vpop.f32.mrb[71].mxu0 }
 0x18e   : > { %vm2277_vm4 = vcmp.ge.f32.partialorder %v8181_v6, 0.0  ;;  %10272 = vst [vmem:[#allocation20_spill] sm:$0xff] %v8364_v29  ;;  %v3077_v63 = vrot.slane %v3076_v15, 1  ;;  %v3111_v45 = vadd.f32 %v3110_v48, %v3109_v0  ;;  %v3096_v61 = vrot.slane %v3095_v30, 2 }
 0x18f   : > { %v2469_v38 = vmul.f32 0.01, %v8181_v6  ;;  %v4386_v13 = vpack.c.bf16 %v4194_v28, %v4194_v28  ;;  %v3116_v56 = vadd.f32 %v3115_v62, %v3114_v18  ;;  %vm2282_vm6 = vcmp.ge.f32.partialorder %v8192_v8, 0.0 }
 0x190   : > { %v2474_v2 = vmul.f32 0.01, %v8192_v8  ;;  %v3078_v10 = vadd.f32 %v3077_v63, %v3076_v15  ;;  %v3112_v53 = vrot.slane %v3111_v45, 1  ;;  %v3097_v16 = vadd.f32 %v3096_v61, %v3095_v30 }
 0x191   : > { %v2661_v26 = vsel %vm2277_vm4, %v8181_v6, %v2469_v38  ;;  %v4389_v54 = vpack.c.bf16 %v4197_v42, %v4197_v42  ;;  %v3117_v46 = vrot.slane %v3116_v56, 2  ;;  %vm2280_vm7 = vcmp.ge.f32.partialorder %v8195_v55, 0.0 }
 0x192   : > { %v3100_v29 = vsel %vm2812_vm3, %v2661_v26, 0.0  ;;  %v2666_v0 = vsel %vm2282_vm6, %v8192_v8, %v2474_v2  ;;  %v3113_v48 = vadd.f32 %v3112_v53, %v3111_v45  ;;  %v3098_v20 = vrot.slane %v3097_v16, 1  ;;  %v8373_v28 = vpop.f32.mrb[72].mxu0 }
 0x193   : > { %v3101_v60 = vrot.slane %v3100_v29, 4  ;;  %10273 = vst [vmem:[#allocation21_spill] sm:$0xff] %v8373_v28  ;;  %v8375_v18 = vmul.f32 0.125, %v3078_v10  ;;  %v3118_v15 = vadd.f32 %v3117_v46, %v3116_v56  ;;  %v3135_v30 = vsel %vm2812_vm3, %v2666_v0, 0.0  ;;  %v8379_v42 = vpop.f32.mrb[73].mxu0 }
 0x194   : > { %v2472_v6 = vmul.f32 0.01, %v8195_v55  ;;  %10274 = vst [vmem:[#allocation22_spill] sm:$0xff] %v8379_v42  ;;  %v4200_v62 = vmul.f32 0.125, %v3113_v48  ;;  %v3099_v63 = vadd.f32 %v3098_v20, %v3097_v16  ;;  %vm2283_vm9 = vcmp.ge.f32.partialorder %v8198_v59, 0.0  ;;  %v8382_v8 = vpop.f32.mrb[74].mxu0 }
 0x195   : > { %v3102_v61 = vadd.f32 %v3101_v60, %v3100_v29  ;;  %10275 = vst [vmem:[#allocation23_spill] sm:$0xff] %v8382_v8  ;;  %v3119_v45 = vrot.slane %v3118_v15, 1  ;;  %v3136_v38 = vrot.slane %v3135_v30, 4  ;;  %v2475_v10 = vmul.f32 0.01, %v8198_v59  ;;  %v8386_v46 = vpop.f32.mrb[75].mxu0 }
 0x196   : > { %v2664_v2 = vsel %vm2280_vm7, %v8195_v55, %v2472_v6  ;;  %10276 = vst [vmem:[#allocation24_spill] sm:$0xff] %v8386_v46  ;;  %v8388_v56 = vunpack.c.l.b16 %v4386_v13  ;;  %v4392_v53 = vpack.c.bf16 %v4200_v62, %v4200_v62  ;;  %v4198_v26 = vmul.f32 0.125, %v3099_v63 }
 0x197   : > { %v3103_v0 = vrot.slane %v3102_v61, 2  ;;  %v3120_v48 = vadd.f32 %v3119_v45, %v3118_v15  ;;  %v3137_v20 = vadd.f32 %v3136_v38, %v3135_v30  ;;  %v3121_v60 = vsel %vm2812_vm3, %v2664_v2, 0.0 }
 0x198   : > { %v2667_v29 = vsel %vm2283_vm9, %v8198_v59, %v2475_v10  ;;  %v8392_v16 = vunpack.c.l.b16 %v4389_v54  ;;  %v4387_v55 = vpack.c.bf16 %v8375_v18, %v8375_v18  ;;  %v3122_v8 = vrot.slane %v3121_v60, 4 }
 0x199   : > { %v3104_v6 = vadd.f32 %v3103_v0, %v3102_v61  ;;  %v4591_v42 = vunpack.c.l.b16 %v4392_v53  ;;  %v4201_v46 = vmul.f32 0.125, %v3120_v48  ;;  %v3138_v13 = vrot.slane %v3137_v20, 2 }
 0x19a   : > { %v3142_v62 = vsel %vm2812_vm3, %v2667_v29, 0.0  ;;  %v3123_v28 = vadd.f32 %v3122_v8, %v3121_v60  ;;  %vm2281_vm10 = vcmp.ge.f32.partialorder %v8203_v44, 0.0  ;;  %v8398_v30 = vpop.f32.mrb[76].mxu0  ;;  %v4390_v59 = vpack.c.bf16 %v4198_v26, %v4198_v26 }
 0x19b   : > { %v3105_v63 = vrot.slane %v3104_v6, 1  ;;  %v3143_v15 = vrot.slane %v3142_v62, 4  ;;  %10277 = vst [vmem:[#allocation25_spill] sm:$0xff] %v8398_v30  ;;  %v3139_v54 = vadd.f32 %v3138_v13, %v3137_v20  ;;  %v2473_v45 = vmul.f32 0.01, %v8203_v44  ;;  %v8406_v20 = vpop.f32.mrb[77].mxu0 }
 0x19c   : > { %vm2286_vm13 = vcmp.ge.f32.partialorder %v8216_v7, 0.0  ;;  %v3124_v61 = vrot.slane %v3123_v28, 2  ;;  %v2478_v2 = vmul.f32 0.01, %v8216_v7  ;;  %v4393_v10 = vpack.c.bf16 %v4201_v46, %v4201_v46  ;;  %10278 = vst [vmem:[#allocation26_spill] sm:$0xff] %v8406_v20 }
 0x19d   : > { %v3106_v18 = vadd.f32 %v3105_v63, %v3104_v6  ;;  %v3144_v38 = vadd.f32 %v3143_v15, %v3142_v62  ;;  %v3140_v53 = vrot.slane %v3139_v54, 1  ;;  %v2665_v8 = vsel %vm2281_vm10, %v8203_v44, %v2473_v45 }
 0x19e   : > { %vm2284_vm14 = vcmp.ge.f32.partialorder %v8222_v33, 0.0  ;;  %v3125_v48 = vadd.f32 %v3124_v61, %v3123_v28  ;;  %v3128_v26 = vsel %vm2812_vm3, %v2665_v8, 0.0  ;;  %v2670_v6 = vsel %vm2286_vm13, %v8216_v7, %v2478_v2 }
 0x19f   : > { %v4199_v0 = vmul.f32 0.125, %v3106_v18  ;;  %v3145_v60 = vrot.slane %v3144_v38, 2  ;;  %v3141_v29 = vadd.f32 %v3140_v53, %v3139_v54  ;;  %v3129_v13 = vrot.slane %v3128_v26, 4  ;;  %v8416_v54 = vpop.f32.mrb[78].mxu0 }
 0x1a0   : > { %v2476_v46 = vmul.f32 0.01, %v8222_v33  ;;  %v3126_v63 = vrot.slane %v3125_v48, 1  ;;  %v3163_v15 = vsel %vm2812_vm3, %v2670_v6, 0.0  ;;  %v4589_v53 = vunpack.c.l.b16 %v4390_v59 }
 0x1a1   : > { %v4391_v62 = vpack.c.bf16 %v4199_v0, %v4199_v0  ;;  %v3146_v44 = vadd.f32 %v3145_v60, %v3144_v38  ;;  %v4204_v45 = vmul.f32 0.125, %v3141_v29  ;;  %v3130_v28 = vadd.f32 %v3129_v13, %v3128_v26  ;;  %v8419_v60 = vpop.f32.mrb[79].mxu0 }
 0x1a2   : > { %v3164_v18 = vrot.slane %v3163_v15, 4  ;;  %v2668_v61 = vsel %vm2284_vm14, %v8222_v33, %v2476_v46  ;;  %v3127_v20 = vadd.f32 %v3126_v63, %v3125_v48  ;;  %v4586_v29 = vunpack.c.l.b16 %v4387_v55  ;;  %v8422_v17 = vpop.f32.mrb[80].mxu0 }
 0x1a3   : > { %v4590_v8 = vunpack.c.l.b16 %v4391_v62  ;;  %v3149_v7 = vsel %vm2812_vm3, %v2668_v61, 0.0  ;;  %v3147_v2 = vrot.slane %v3146_v44, 1  ;;  %v3131_v0 = vrot.slane %v3130_v28, 2  ;;  %v8425_v62 = vpop.f32.mrb[81].mxu0 }
 0x1a4   : > { %v3165_v30 = vadd.f32 %v3164_v18, %v3163_v15  ;;  %v3150_v38 = vrot.slane %v3149_v7, 4  ;;  %v4592_v26 = vunpack.c.l.b16 %v4393_v10  ;;  %v4202_v6 = vmul.f32 0.125, %v3127_v20 }
 0x1a5   : > { %v4618_v13 = vsel %vm4597_vm12, %v4590_v8, %v4589_v53  ;;  %v4396_v59 = vpack.c.bf16 %v4204_v45, %v4204_v45  ;;  %v3132_v46 = vadd.f32 %v3131_v0, %v3130_v28  ;;  %vm2287_vm0 = vcmp.ge.f32.partialorder %v8226_v52, 0.0 }
 0x1a6   : > { %v4619_v33 = vsel %vm4599_vm15, %v4591_v42, %v4618_v13  ;;  %v3166_v48 = vrot.slane %v3165_v30, 2  ;;  %v4394_v63 = vpack.c.bf16 %v4202_v6, %v4202_v6  ;;  %v3151_v18 = vadd.f32 %v3150_v38, %v3149_v7 }
 0x1a7   : > { %v4620_v15 = vsel %vm4601_vm5, %v4592_v26, %v4619_v33  ;;  %v3148_v55 = vadd.f32 %v3147_v2, %v3146_v44  ;;  %v3133_v10 = vrot.slane %v3132_v46, 1  ;;  %vm4607_vm1 = vcmask 1046534   ;;  %v8438_v26 = vpop.f32.mrb[82].mxu0 }
 0x1a8   : > { %v3167_v61 = vadd.f32 %v3166_v48, %v3165_v30  ;;  %v2479_v20 = vmul.f32 0.01, %v8226_v52  ;;  %v4593_v53 = vunpack.c.l.b16 %v4394_v63  ;;  %v3152_v8 = vrot.slane %v3151_v18, 2 }
 0x1a9   : > { %vm2285_vm2 = vcmp.ge.f32.partialorder %v8230_v12, 0.0  ;;  %v2477_v42 = vmul.f32 0.01, %v8230_v12  ;;  %v3134_v45 = vadd.f32 %v3133_v10, %v3132_v46  ;;  %v4602_v7 = vsel %vm4601_vm5, %v8274_v31, %v8250_v25 }
 0x1aa   : > { %v3168_v28 = vrot.slane %v3167_v61, 1  ;;  %v2671_v0 = vsel %vm2287_vm0, %v8226_v52, %v2479_v20  ;;  %vm4609_vm4 = vcmask 1047559   ;;  %v4595_v44 = vunpack.c.l.b16 %v4396_v59 }
 0x1ab   : > { %v4621_v30 = vsel %vm4603_vm8, %v4593_v53, %v4620_v15  ;;  %v3153_v2 = vadd.f32 %v3152_v8, %v3151_v18  ;;  %v3170_v38 = vsel %vm2812_vm3, %v2671_v0, 0.0  ;;  %v4203_v13 = vmul.f32 0.125, %v3134_v45  ;;  %v8453_v53 = vpop.f32.mrb[83].mxu0 }
 0x1ac   : > { %v3169_v6 = vadd.f32 %v3168_v28, %v3167_v61  ;;  %v3171_v33 = vrot.slane %v3170_v38, 4  ;;  %v2669_v46 = vsel %vm2285_vm2, %v8230_v12, %v2477_v42  ;;  %v4604_v25 = vsel %vm4603_vm8, %v8284_v47, %v4602_v7 }
 0x1ad   : > { %v3154_v48 = vrot.slane %v3153_v2, 1  ;;  %v3156_v52 = vsel %vm2812_vm3, %v2669_v46, 0.0  ;;  %v4613_v31 = vsel %vm4601_vm5, %v8351_v57, %v8342_v43  ;;  %v8447_v59 = vmul.f32 0.125, %v3148_v55 }
 0x1ae   : > { %v4395_v63 = vpack.c.bf16 %v4203_v13, %v4203_v13  ;;  %v3172_v15 = vadd.f32 %v3171_v33, %v3170_v38  ;;  %v3157_v18 = vrot.slane %v3156_v52, 4  ;;  %v4208_v10 = vmul.f32 0.125, %v3169_v6 }
 0x1af   : > { %v3155_v61 = vadd.f32 %v3154_v48, %v3153_v2  ;;  %v4606_v12 = vsel %vm4605_vm11, %v8349_v58, %v4604_v25  ;;  %v4614_v20 = vsel %vm4603_vm8, %v8388_v56, %v4613_v31  ;;  %vm2290_vm6 = vcmp.ge.f32.partialorder %v8236_v41, 0.0 }
 0x1b0   : > { %v4594_v47 = vunpack.c.l.b16 %v4395_v63  ;;  %v3173_v8 = vrot.slane %v3172_v15, 2  ;;  %v3158_v42 = vadd.f32 %v3157_v18, %v3156_v52  ;;  %v4608_v57 = vsel %vm4607_vm1, %v8276_v37, %v4606_v12  ;;  %v8487_v18 = vpop.f32.mrb[84].mxu0 }
 0x1b1   : > { %v4206_v43 = vmul.f32 0.125, %v3155_v61  ;;  %v4615_v55 = vsel %vm4605_vm11, %v4586_v29, %v4614_v20  ;;  %v2482_v45 = vmul.f32 0.01, %v8236_v41  ;;  %v4397_v58 = vpack.c.bf16 %v8447_v59, %v8447_v59 }
 0x1b2   : > { %v4622_v56 = vsel %vm4605_vm11, %v4594_v47, %v4621_v30  ;;  %v3174_v28 = vadd.f32 %v3173_v8, %v3172_v15  ;;  %v3159_v0 = vrot.slane %v3158_v42, 2  ;;  %v4400_v2 = vpack.c.bf16 %v4208_v10, %v4208_v10 }
 0x1b3   : > { %v8464_v7 = vsel %vm4607_vm1, %v4595_v44, %v4622_v56  ;;  %v4610_v38 = vsel %vm4609_vm4, %v8338_v27, %v4608_v57  ;;  %v4616_v37 = vsel %vm4607_vm1, %v8361_v51, %v4615_v55  ;;  %v2674_v30 = vsel %vm2290_vm6, %v8236_v41, %v2482_v45  ;;  %v8498_v45 = vpop.f32.mrb[85].mxu0 }
 0x1b4   : > { %v3175_v29 = vrot.slane %v3174_v28, 1  ;;  %v3160_v13 = vadd.f32 %v3159_v0, %v3158_v42  ;;  %v4617_v6 = vsel %vm4609_vm4, %v8392_v16, %v4616_v37  ;;  %v4398_v33 = vpack.c.bf16 %v4206_v43, %v4206_v43 }
 0x1b5   : > { %v8475_v46 = vpack.c.b16 %v4617_v6, %v4610_v38  ;;  %v3191_v44 = vsel %vm2812_vm3, %v2674_v30, 0.0  ;;  %vm2288_vm7 = vcmp.ge.f32.partialorder %v8240_v50, 0.0  ;;  %v2480_v51 = vmul.f32 0.01, %v8240_v50 }
 0x1b6   : > { %v3176_v27 = vadd.f32 %v3175_v29, %v3174_v28  ;;  %v3161_v48 = vrot.slane %v3160_v13, 1  ;;  %v3192_v52 = vrot.slane %v3191_v44, 4  ;;  %vm2291_vm9 = vcmp.ge.f32.partialorder %v8242_v1, 0.0 }
 0x1b7   : > { %7270 = vmatprep.mubr.msk.bf16.mxu1 %vm2812_vm3, %v8475_v46  ;;  %v2483_v16 = vmul.f32 0.01, %v8242_v1  ;;  %vm2289_vm10 = vcmp.ge.f32.partialorder %v8245_v40, 0.0  ;;  %v2481_v41 = vmul.f32 0.01, %v8245_v40  ;;  %v4970_v25 = vunpack.c.l.b16 %v4400_v2 }
 0x1b8   : > { %v3162_v31 = vadd.f32 %v3161_v48, %v3160_v13  ;;  %v3193_v63 = vadd.f32 %v3192_v52, %v3191_v44  ;;  %v2672_v15 = vsel %vm2288_vm7, %v8240_v50, %v2480_v51  ;;  %v4968_v10 = vunpack.c.l.b16 %v4398_v33 }
 0x1b9   : > { %v3177_v61 = vsel %vm2812_vm3, %v2672_v15, 0.0  ;;  %v2675_v12 = vsel %vm2291_vm9, %v8242_v1, %v2483_v16  ;;  %v2673_v20 = vsel %vm2289_vm10, %v8245_v40, %v2481_v41  ;;  %vm2294_vm13 = vcmp.ge.f32.partialorder %v8259_v32, 0.0  ;;  %v8501_v40 = vpop.f32.mrb[86].mxu0 }
 0x1ba   : > { %v4207_v47 = vmul.f32 0.125, %v3162_v31  ;;  %v3194_v8 = vrot.slane %v3193_v63, 2  ;;  %v3178_v42 = vrot.slane %v3177_v61, 4  ;;  %v8493_v43 = vmul.f32 0.125, %v3176_v27  ;;  %v8505_v29 = vpop.f32.mrb[87].mxu0 }
 0x1bb   : > { %v3198_v57 = vsel %vm2812_vm3, %v2675_v12, 0.0  ;;  %v3184_v50 = vsel %vm2812_vm3, %v2673_v20, 0.0  ;;  %v2486_v55 = vmul.f32 0.01, %v8259_v32  ;;  %vm2292_vm14 = vcmp.ge.f32.partialorder %v8265_v22, 0.0  ;;  %v8511_v31 = vpop.f32.mrb[88].mxu0 }
 0x1bc   : > { %v4399_v56 = vpack.c.bf16 %v4207_v47, %v4207_v47  ;;  %v3195_v28 = vadd.f32 %v3194_v8, %v3193_v63  ;;  %v3179_v1 = vadd.f32 %v3178_v42, %v3177_v61  ;;  %v3199_v0 = vrot.slane %v3198_v57, 4 }
 0x1bd   : > { %v3185_v2 = vrot.slane %v3184_v50, 4  ;;  %v2678_v38 = vsel %vm2294_vm13, %v8259_v32, %v2486_v55  ;;  %v2484_v37 = vmul.f32 0.01, %v8265_v22  ;;  %vm2295_vm0 = vcmp.ge.f32.partialorder %v8272_v21, 0.0 }
 0x1be   : > { %v4969_v13 = vunpack.c.l.b16 %v4399_v56  ;;  %v3196_v6 = vrot.slane %v3195_v28, 1  ;;  %v3180_v30 = vrot.slane %v3179_v1, 2  ;;  %v3219_v33 = vsel %vm2812_vm3, %v2678_v38, 0.0 }
 0x1bf   : > { %v3200_v44 = vadd.f32 %v3199_v0, %v3198_v57  ;;  %v3186_v27 = vadd.f32 %v3185_v2, %v3184_v50  ;;  %v3220_v48 = vrot.slane %v3219_v33, 4  ;;  %v2676_v52 = vsel %vm2292_vm14, %v8265_v22, %v2484_v37 }
 0x1c0   : > { %v4992_v51 = vsel %vm4597_vm12, %v4969_v13, %v4968_v10  ;;  %v3197_v16 = vadd.f32 %v3196_v6, %v3195_v28  ;;  %v3181_v41 = vadd.f32 %v3180_v30, %v3179_v1  ;;  %v3205_v32 = vsel %vm2812_vm3, %v2676_v52, 0.0  ;;  %v7566_v28 = vld [vmem:[%s10178_s3 + $0x8] sm:$0xff]   ;;  %v8523_v1 = vpop.f32.mrb[89].mxu0 }
 0x1c1   : > { %v8514_v63 = vsel %vm4599_vm15, %v4970_v25, %v4992_v51  ;;  %v3201_v15 = vrot.slane %v3200_v44, 2  ;;  %v3187_v61 = vrot.slane %v3186_v27, 2  ;;  %v3221_v12 = vadd.f32 %v3220_v48, %v3219_v33  ;;  %v8528_v48 = vpop.f32.mrb[90].mxu0 }
 0x1c2   : > { %v4212_v20 = vmul.f32 0.125, %v3197_v16  ;;  %v3182_v47 = vrot.slane %v3181_v41, 1  ;;  %v3206_v8 = vrot.slane %v3205_v32, 4  ;;  %v2487_v57 = vmul.f32 0.01, %v8272_v21 }
 0x1c3   : > { %v3202_v22 = vadd.f32 %v3201_v15, %v3200_v44  ;;  %v3188_v42 = vadd.f32 %v3187_v61, %v3186_v27  ;;  %v3222_v10 = vrot.slane %v3221_v12, 2  ;;  %v4401_v50 = vpack.c.bf16 %v8493_v43, %v8493_v43 }
 0x1c4   : > { %v4404_v55 = vpack.c.bf16 %v4212_v20, %v4212_v20  ;;  %v3183_v56 = vadd.f32 %v3182_v47, %v3181_v41  ;;  %v3207_v25 = vadd.f32 %v3206_v8, %v3205_v32  ;;  %v2679_v37 = vsel %vm2295_vm0, %v8272_v21, %v2487_v57 }
 0x1c5   : > { %v3203_v0 = vrot.slane %v3202_v22, 1  ;;  %v3189_v2 = vrot.slane %v3188_v42, 1  ;;  %v3223_v38 = vadd.f32 %v3222_v10, %v3221_v12  ;;  %v3226_v30 = vsel %vm2812_vm3, %v2679_v37, 0.0 }
 0x1c6   : > { %v4210_v13 = vmul.f32 0.125, %v3183_v56  ;;  %v3208_v6 = vrot.slane %v3207_v25, 2  ;;  %vm2293_vm2 = vcmp.ge.f32.partialorder %v8281_v36, 0.0  ;;  %v3227_v27 = vrot.slane %v3226_v30, 4 }
 0x1c7   : > { %v3204_v43 = vadd.f32 %v3203_v0, %v3202_v22  ;;  %v3190_v33 = vadd.f32 %v3189_v2, %v3188_v42  ;;  %v3224_v44 = vrot.slane %v3223_v38, 1  ;;  %v4596_v52 = vunpack.c.l.b16 %v4397_v58 }
 0x1c8   : > { %v3209_v51 = vadd.f32 %v3208_v6, %v3207_v25  ;;  %v2485_v16 = vmul.f32 0.01, %v8281_v36  ;;  %v4643_v21 = vand.u32 %v7566_v28, %v7996_v9  ;;  %v4402_v41 = vpack.c.bf16 %v4210_v13, %v4210_v13  ;;  %v8549_v25 = vpop.f32.mrb[91].mxu0 }
 0x1c9   : > { %v4213_v32 = vmul.f32 0.125, %v3204_v43  ;;  %v3225_v15 = vadd.f32 %v3224_v44, %v3223_v38  ;;  %v3228_v61 = vadd.f32 %v3227_v27, %v3226_v30  ;;  %v8535_v12 = vunpack.c.l.b16 %v4401_v50 }
 0x1ca   : > { %v3210_v20 = vrot.slane %v3209_v51, 1  ;;  %v2677_v47 = vsel %vm2293_vm2, %v8281_v36, %v2485_v16  ;;  %7268 = vmatprep.subr.bf16.mxu1 %v4643_v21  ;;  %v4624_v59 = vsel %vm4609_vm4, %v4596_v52, %v8464_v7  ;;  %v8542_v58 = vunpack.c.l.b16 %v4404_v55 }
 0x1cb   : > { %v8544_v8 = vmul.f32 0.125, %v3190_v33  ;;  %v4216_v22 = vmul.f32 0.125, %v3225_v15  ;;  %v3229_v42 = vrot.slane %v3228_v61, 2  ;;  %7269 = vmatpush3.bf16.msra.mxu1 %v4643_v21  ;;  %v4405_v10 = vpack.c.bf16 %v4213_v32, %v4213_v32  ;;  %v10279_v21 = vld [vmem:[#allocation8_spill] sm:$0xff] }
 0x1cc   : > { %v3211_v57 = vadd.f32 %v3210_v20, %v3209_v51  ;;  %v3212_v50 = vsel %vm2812_vm3, %v2677_v47, 0.0  ;;  %v8547_v56 = vpack.c.b16 %v4624_v59, %v4624_v59  ;;  %v8551_v36 = vunpack.c.l.b16 %v4402_v41  ;;  %v10280_v41 = vld [vmem:[#allocation12_spill] sm:$0xff]  ;;  %v8588_v20 = vpop.f32.mrb[92].mxu0  ;;  %v10282_v59 = vld [vmem:[#allocation7_spill] sm:$0xff] }
 0x1cd   : > { %v4408_v28 = vpack.c.bf16 %v4216_v22, %v4216_v22  ;;  %v3230_v0 = vadd.f32 %v3229_v42, %v3228_v61  ;;  %vm2298_vm6 = vcmp.ge.f32.partialorder %v8296_v34, 0.0  ;;  %v3213_v55 = vrot.slane %v3212_v50, 4  ;;  %v10281_v61 = vld [vmem:[#allocation6_spill] sm:$0xff] }
 0x1ce   : > { %v4214_v7 = vmul.f32 0.125, %v3211_v57  ;;  %7271 = vmatmul.mubr.msk.bf16.vlgmr.msra.gmra.mrb[52].mxu1 %vm2812_vm3, %v8547_v56  ;;  %v2490_v2 = vmul.f32 0.01, %v8296_v34  ;;  %v4743_v38 = vsel %vm4601_vm5, %v8001_v14, %v7989_v5  ;;  %v4403_v37 = vpack.c.bf16 %v8544_v8, %v8544_v8  ;;  %v8597_v57 = vpop.f32.mrb[93].mxu0 }
 0x1cf   : > { %v3231_v13 = vrot.slane %v3230_v0, 1  ;;  %v4744_v6 = vsel %vm4603_vm8, %v8045_v11, %v4743_v38  ;;  %v4750_v30 = vsel %vm4601_vm5, %v8103_v35, %v8090_v3  ;;  %v8567_v43 = vunpack.c.l.b16 %v4405_v10  ;;  %v7567_v10 = vld [vmem:[%s10178_s3] sm:$0xff]  }
 0x1d0   : > { %v3214_v33 = vadd.f32 %v3213_v55, %v3212_v50  ;;  %v2682_v44 = vsel %vm2298_vm6, %v8296_v34, %v2490_v2  ;;  %v4745_v27 = vsel %vm4605_vm11, %v8055_v24, %v4744_v6  ;;  %v4406_v5 = vpack.c.bf16 %v4214_v7, %v4214_v7  ;;  %v8602_v55 = vpop.f32.mrb[94].mxu0  ;;  %v10283_v6 = vld [vmem:[#allocation13_spill] sm:$0xff] }
 0x1d1   : > { %v3247_v14 = vsel %vm2812_vm3, %v2682_v44, 0.0  ;;  %v4746_v52 = vsel %vm4607_vm1, %v8012_v23, %v4745_v27  ;;  %v4751_v11 = vsel %vm4603_vm8, %v8128_v4, %v4750_v30  ;;  %v8577_v51 = vunpack.c.l.b16 %v4408_v28 }
 0x1d2   : > { %v3215_v3 = vrot.slane %v3214_v33, 2  ;;  %v3248_v35 = vrot.slane %v3247_v14, 4  ;;  %v4747_v16 = vsel %vm4609_vm4, %v8051_v19, %v4746_v52  ;;  %v3232_v34 = vadd.f32 %v3231_v13, %v3230_v0 }
 0x1d3   : > { %v4752_v24 = vsel %vm4605_vm11, %v10279_v21, %v4751_v11  ;;  %vm2296_vm7 = vcmp.ge.f32.partialorder %v10280_v41, 0.0  ;;  %v2488_v32 = vmul.f32 0.01, %v10280_v41  ;;  %vm2299_vm9 = vcmp.ge.f32.partialorder %v8303_v49, 0.0  ;;  %v10284_v11 = vld [vmem:[#allocation10_spill] sm:$0xff] }
 0x1d4   : > { %v3216_v15 = vadd.f32 %v3215_v3, %v3214_v33  ;;  %v3249_v23 = vadd.f32 %v3248_v35, %v3247_v14  ;;  %v4753_v4 = vsel %vm4607_vm1, %v10281_v61, %v4752_v24  ;;  %v4976_v47 = vunpack.c.l.b16 %v4406_v5  ;;  %v10285_v3 = vld [vmem:[#allocation9_spill] sm:$0xff]  ;;  %v10286_v24 = vld [vmem:[#allocation11_spill] sm:$0xff] }
 0x1d5   : > { %v4754_v19 = vsel %vm4609_vm4, %v10282_v59, %v4753_v4  ;;  %v2680_v22 = vsel %vm2296_vm7, %v10280_v41, %v2488_v32  ;;  %v2491_v42 = vmul.f32 0.01, %v8303_v49  ;;  %v8604_v2 = vmul.f32 0.125, %v3232_v34 }
 0x1d6   : > { %v3217_v50 = vrot.slane %v3216_v15, 1  ;;  %v3250_v28 = vrot.slane %v3249_v23, 2  ;;  %v8599_v0 = vpack.c.b16 %v4754_v19, %v4747_v16  ;;  %v3233_v7 = vsel %vm2812_vm3, %v2680_v22, 0.0 }
 0x1d7   : > { %v3234_v38 = vrot.slane %v3233_v7, 4  ;;  %v2683_v13 = vsel %vm2299_vm9, %v8303_v49, %v2491_v42  ;;  %vm2297_vm10 = vcmp.ge.f32.partialorder %v10283_v6, 0.0  ;;  %v2489_v27 = vmul.f32 0.01, %v10283_v6  ;;  %v8616_v49 = vpop.f32.mrb[95].mxu0 }
 0x1d8   : > { %v3218_v30 = vadd.f32 %v3217_v50, %v3216_v15  ;;  %v3251_v33 = vadd.f32 %v3250_v28, %v3249_v23  ;;  %7276 = vmatprep.mubr.msk.bf16.mxu1 %vm2812_vm3, %v8599_v0  ;;  %v3254_v44 = vsel %vm2812_vm3, %v2683_v13, 0.0  ;;  %v4776_v52 = vand.u32 %v7567_v10, %v7996_v9 }
 0x1d9   : > { %v3235_v5 = vadd.f32 %v3234_v38, %v3233_v7  ;;  %v3255_v14 = vrot.slane %v3254_v44, 4  ;;  %v4760_v35 = vsel %vm4607_vm1, %v10285_v3, %v10284_v11  ;;  %v2681_v21 = vsel %vm2297_vm10, %v10283_v6, %v2489_v27  ;;  %v10287_v38 = vld [vmem:[#allocation14_spill] sm:$0xff]  ;;  %v8629_v6 = vpop.f32.mrb[96].mxu0 }
 0x1da   : > { %v4215_v16 = vmul.f32 0.125, %v3218_v30  ;;  %v3252_v34 = vrot.slane %v3251_v33, 1  ;;  %v4761_v41 = vsel %vm4609_vm4, %v10286_v24, %v4760_v35  ;;  %v4409_v32 = vpack.c.bf16 %v8604_v2, %v8604_v2  ;;  %7274 = vmatprep.subr.bf16.mxu1 %v4776_v52  ;;  %v8640_v11 = vpop.f32.mrb[97].mxu0 }
 0x1db   : > { %v3236_v15 = vrot.slane %v3235_v5, 2  ;;  %v3256_v23 = vadd.f32 %v3255_v14, %v3254_v44  ;;  %v3240_v61 = vsel %vm2812_vm3, %v2681_v21, 0.0  ;;  %7275 = vmatpush3.bf16.msra.mxu1 %v4776_v52  ;;  %vm2302_vm13 = vcmp.ge.f32.partialorder %v8315_v39, 0.0  ;;  %v10288_v52 = vld [vmem:[#allocation15_spill] sm:$0xff] }
 0x1dc   : > { %v4407_v4 = vpack.c.bf16 %v4215_v16, %v4215_v16  ;;  %v3253_v59 = vadd.f32 %v3252_v34, %v3251_v33  ;;  %v3241_v19 = vrot.slane %v3240_v61, 4  ;;  %v8625_v10 = vpack.c.b16 %v4761_v41, %v4761_v41  ;;  %v8648_v41 = vpop.f32.mrb[98].mxu0 }
 0x1dd   : > { %v3237_v22 = vadd.f32 %v3236_v15, %v3235_v5  ;;  %v3257_v42 = vrot.slane %v3256_v23, 2  ;;  %v2494_v50 = vmul.f32 0.01, %v8315_v39  ;;  %v2492_v13 = vmul.f32 0.01, %v10287_v38 }
 0x1de   : > { %v4977_v28 = vunpack.c.l.b16 %v4407_v4  ;;  %v4220_v7 = vmul.f32 0.125, %v3253_v59  ;;  %v3242_v2 = vadd.f32 %v3241_v19, %v3240_v61  ;;  %7277 = vmatmul.mubr.msk.bf16.vlgmr.msra.gmra.mrb[56].mxu1 %vm2812_vm3, %v8625_v10  ;;  %vm2300_vm14 = vcmp.ge.f32.partialorder %v10287_v38, 0.0 }
 0x1df   : > { %v3238_v30 = vrot.slane %v3237_v22, 1  ;;  %v3258_v44 = vadd.f32 %v3257_v42, %v3256_v23  ;;  %v2686_v33 = vsel %vm2302_vm13, %v8315_v39, %v2494_v50  ;;  %7282 = vmatprep.mubr.msk.bf16.mxu1 %vm2812_vm3, %v8475_v46  ;;  %vm2303_vm0 = vcmp.ge.f32.partialorder %v10288_v52, 0.0 }
 0x1e0   : > { %v4999_v27 = vsel %vm4597_vm12, %v4977_v28, %v4976_v47  ;;  %v3243_v5 = vrot.slane %v3242_v2, 2  ;;  %v3275_v14 = vsel %vm2812_vm3, %v2686_v33, 0.0  ;;  %v4412_v34 = vpack.c.bf16 %v4220_v7, %v4220_v7 }
 0x1e1   : > { %v8644_v3 = vsel %vm4599_vm15, %v8577_v51, %v4999_v27  ;;  %v3239_v35 = vadd.f32 %v3238_v30, %v3237_v22  ;;  %v3259_v39 = vrot.slane %v3258_v44, 1  ;;  %v3276_v16 = vrot.slane %v3275_v14, 4  ;;  %v7568_v51 = vld [vmem:[%s10180_s5 + $0x8] sm:$0xff]   ;;  %v10289_v22 = vld [vmem:[#allocation16_spill] sm:$0xff] }
 0x1e2   : > { %v3244_v21 = vadd.f32 %v3243_v5, %v3242_v2  ;;  %v2684_v47 = vsel %vm2300_vm14, %v10287_v38, %v2492_v13  ;;  %v2495_v24 = vmul.f32 0.01, %v10288_v52  ;;  %vm2301_vm2 = vcmp.ge.f32.partialorder %v10289_v22, 0.0 }
 0x1e3   : > { %v4218_v46 = vmul.f32 0.125, %v3239_v35  ;;  %v3260_v15 = vadd.f32 %v3259_v39, %v3258_v44  ;;  %v3277_v23 = vadd.f32 %v3276_v16, %v3275_v14  ;;  %v3261_v61 = vsel %vm2812_vm3, %v2684_v47, 0.0  ;;  %v8672_v14 = vpop.f32.mrb[99].mxu0 }
 0x1e4   : > { %v3245_v4 = vrot.slane %v3244_v21, 1  ;;  %v3262_v59 = vrot.slane %v3261_v61, 4  ;;  %v2687_v19 = vsel %vm2303_vm0, %v10288_v52, %v2495_v24  ;;  %v8662_v2 = vunpack.c.l.b16 %v4403_v37 }
 0x1e5   : > { %v4410_v42 = vpack.c.bf16 %v4218_v46, %v4218_v46  ;;  %v4221_v50 = vmul.f32 0.125, %v3260_v15  ;;  %v3278_v28 = vrot.slane %v3277_v23, 2  ;;  %v3282_v7 = vsel %vm2812_vm3, %v2687_v19, 0.0 }
 0x1e6   : > { %v3263_v38 = vadd.f32 %v3262_v59, %v3261_v61  ;;  %v3283_v13 = vrot.slane %v3282_v7, 4  ;;  %v2493_v30 = vmul.f32 0.01, %v10289_v22  ;;  %v8665_v44 = vunpack.c.l.b16 %v4409_v32  ;;  %v10292_v61 = vld [vmem:[#allocation18_spill] sm:$0xff] }
 0x1e7   : > { %v8667_v33 = vunpack.c.l.b16 %v4412_v34  ;;  %v3279_v27 = vadd.f32 %v3278_v28, %v3277_v23  ;;  %v8670_v5 = vand.u32 %v7568_v51, %v7996_v9  ;;  %v3246_v52 = vadd.f32 %v3245_v4, %v3244_v21  ;;  %v10291_v21 = vld [vmem:[#allocation17_spill] sm:$0xff] }
 0x1e8   : > { %v3264_v35 = vrot.slane %v3263_v38, 2  ;;  %v3284_v39 = vadd.f32 %v3283_v13, %v3282_v7  ;;  %v2685_v8 = vsel %vm2301_vm2, %v10289_v22, %v2493_v30  ;;  %v8677_v37 = vunpack.c.l.b16 %v4410_v42  ;;  %v10293_v7 = vld [vmem:[#allocation19_spill] sm:$0xff] }
 0x1e9   : > { %10290 = vst [vmem:[#allocation8_spill] sm:$0xff] %v8670_v5  ;;  %v4413_v16 = vpack.c.bf16 %v4221_v50, %v4221_v50  ;;  %v3280_v32 = vrot.slane %v3279_v27, 1  ;;  %v3268_v34 = vsel %vm2812_vm3, %v2685_v8, 0.0  ;;  %7280 = vmatprep.subr.bf16.mxu1 %v8670_v5  ;;  %vm2306_vm6 = vcmp.ge.f32.partialorder %v10291_v21, 0.0 }
 0x1ea   : > { %v3265_v47 = vadd.f32 %v3264_v35, %v3263_v38  ;;  %v3285_v24 = vrot.slane %v3284_v39, 2  ;;  %v3269_v46 = vrot.slane %v3268_v34, 4  ;;  %7281 = vmatpush3.bf16.msra.mxu1 %v8670_v5  ;;  %v2498_v23 = vmul.f32 0.01, %v10291_v21 }
 0x1eb   : > { %v3281_v15 = vadd.f32 %v3280_v32, %v3279_v27  ;;  %vm2304_vm7 = vcmp.ge.f32.partialorder %v10292_v61, 0.0  ;;  %v2496_v51 = vmul.f32 0.01, %v10292_v61  ;;  %v8686_v4 = vmul.f32 0.125, %v3246_v52  ;;  %v8696_v52 = vpop.f32.mrb[100].mxu0  ;;  %v7569_v32 = vld [vmem:[%s10180_s5] sm:$0xff]  }
 0x1ec   : > { %v3266_v59 = vrot.slane %v3265_v47, 1  ;;  %v3286_v19 = vadd.f32 %v3285_v24, %v3284_v39  ;;  %v3270_v22 = vadd.f32 %v3269_v46, %v3268_v34  ;;  %v2690_v50 = vsel %vm2306_vm6, %v10291_v21, %v2498_v23  ;;  %10294 = vst [vmem:[#allocation12_spill] sm:$0xff] %v8696_v52 }
 0x1ed   : > { %v4224_v42 = vmul.f32 0.125, %v3281_v15  ;;  %7283 = vmatmul.mubr.msk.bf16.vlgmr.msra.gmra.mrb[60].mxu1 %vm2812_vm3, %v8547_v56  ;;  %v2688_v28 = vsel %vm2304_vm7, %v10292_v61, %v2496_v51  ;;  %vm2307_vm9 = vcmp.ge.f32.partialorder %v10293_v7, 0.0  ;;  %v3303_v27 = vsel %vm2812_vm3, %v2690_v50, 0.0 }
 0x1ee   : > { %v3267_v38 = vadd.f32 %v3266_v59, %v3265_v47  ;;  %v3287_v13 = vrot.slane %v3286_v19, 1  ;;  %v3271_v30 = vrot.slane %v3270_v22, 2  ;;  %7288 = vmatprep.mubr.msk.bf16.mxu1 %vm2812_vm3, %v8599_v0  ;;  %v3304_v39 = vrot.slane %v3303_v27, 4 }
 0x1ef   : > { %v4416_v35 = vpack.c.bf16 %v4224_v42, %v4224_v42  ;;  %v3289_v56 = vsel %vm2812_vm3, %v2688_v28, 0.0  ;;  %v2499_v8 = vmul.f32 0.01, %v10293_v7  ;;  %v8703_v21 = vunpack.c.l.b16 %v4413_v16  ;;  %v10295_v42 = vld [vmem:[#allocation20_spill] sm:$0xff]  ;;  %v8716_v28 = vpop.f32.mrb[101].mxu0 }
 0x1f0   : > { %v4222_v34 = vmul.f32 0.125, %v3267_v38  ;;  %v3288_v47 = vadd.f32 %v3287_v13, %v3286_v19  ;;  %v3272_v24 = vadd.f32 %v3271_v30, %v3270_v22  ;;  %v3290_v46 = vrot.slane %v3289_v56, 4  ;;  %10297 = vst [vmem:[#allocation7_spill] sm:$0xff] %v8716_v28 }
 0x1f1   : > { %v4411_v0 = vpack.c.bf16 %v8686_v4, %v8686_v4  ;;  %v3305_v15 = vadd.f32 %v3304_v39, %v3303_v27  ;;  %v2691_v23 = vsel %vm2307_vm9, %v10293_v7, %v2499_v8  ;;  %vm2305_vm10 = vcmp.ge.f32.partialorder %v10295_v42, 0.0 }
 0x1f2   : > { %v4225_v61 = vmul.f32 0.125, %v3288_v47  ;;  %v3273_v51 = vrot.slane %v3272_v24, 1  ;;  %v3291_v59 = vadd.f32 %v3290_v46, %v3289_v56  ;;  %v3310_v19 = vsel %vm2812_vm3, %v2691_v23, 0.0  ;;  %v8723_v23 = vpop.f32.mrb[102].mxu0 }
 0x1f3   : > { %v3306_v50 = vrot.slane %v3305_v15, 2  ;;  %v2497_v22 = vmul.f32 0.01, %v10295_v42  ;;  %v8714_v16 = vand.u32 %v7569_v32, %v7996_v9  ;;  %v4986_v4 = vunpack.c.l.b16 %v4416_v35  ;;  %v10298_v32 = vld [vmem:[#allocation21_spill] sm:$0xff]  ;;  %10299 = vst [vmem:[#allocation13_spill] sm:$0xff] %v8723_v23 }
 0x1f4   : > { %v4414_v38 = vpack.c.bf16 %v4222_v34, %v4222_v34  ;;  %v3274_v13 = vadd.f32 %v3273_v51, %v3272_v24  ;;  %v3292_v30 = vrot.slane %v3291_v59, 2  ;;  %v4417_v7 = vpack.c.bf16 %v4225_v61, %v4225_v61 }
 0x1f5   : > { %10296 = vst [vmem:[#allocation6_spill] sm:$0xff] %v8714_v16  ;;  %v3307_v27 = vadd.f32 %v3306_v50, %v3305_v15  ;;  %v3311_v39 = vrot.slane %v3310_v19, 4  ;;  %v2689_v56 = vsel %vm2305_vm10, %v10295_v42, %v2497_v22  ;;  %7286 = vmatprep.subr.bf16.mxu1 %v8714_v16  ;;  %vm2310_vm13 = vcmp.ge.f32.partialorder %v10298_v32, 0.0  ;;  %v10300_v42 = vld [vmem:[#allocation22_spill] sm:$0xff] }
 0x1f6   : > { %v4223_v8 = vmul.f32 0.125, %v3274_v13  ;;  %v3293_v47 = vadd.f32 %v3292_v30, %v3291_v59  ;;  %v3296_v46 = vsel %vm2812_vm3, %v2689_v56, 0.0  ;;  %7287 = vmatpush3.bf16.msra.mxu1 %v8714_v16  ;;  %v2502_v15 = vmul.f32 0.01, %v10298_v32  ;;  %v8728_v59 = vpop.f32.mrb[103].mxu0 }
 0x1f7   : > { %v3308_v35 = vrot.slane %v3307_v27, 1  ;;  %v3312_v34 = vadd.f32 %v3311_v39, %v3310_v19  ;;  %v3297_v24 = vrot.slane %v3296_v46, 4  ;;  %vm2308_vm14 = vcmp.ge.f32.partialorder %v10300_v42, 0.0  ;;  %10301 = vst [vmem:[#allocation10_spill] sm:$0xff] %v8728_v59  ;;  %v8733_v19 = vpop.f32.mrb[0].mxu1 }
 0x1f8   : > { %v4415_v61 = vpack.c.bf16 %v4223_v8, %v4223_v8  ;;  %v3294_v51 = vrot.slane %v3293_v47, 1  ;;  %v2500_v50 = vmul.f32 0.01, %v10300_v42  ;;  %v4984_v22 = vunpack.c.l.b16 %v4414_v38  ;;  %v8737_v23 = vpop.f32.mrb[1].mxu1 }
 0x1f9   : > { %v3313_v13 = vrot.slane %v3312_v34, 2  ;;  %v3298_v30 = vadd.f32 %v3297_v24, %v3296_v46  ;;  %7289 = vmatmul.mubr.msk.bf16.vlgmr.msra.gmra.mrb[64].mxu1 %vm2812_vm3, %v8625_v10  ;;  %v2694_v56 = vsel %vm2310_vm13, %v10298_v32, %v2502_v15  ;;  %v3309_v28 = vadd.f32 %v3308_v35, %v3307_v27 }
 0x1fa   : > { %v4985_v39 = vunpack.c.l.b16 %v4415_v61  ;;  %v3295_v16 = vadd.f32 %v3294_v51, %v3293_v47  ;;  %v3331_v8 = vsel %vm2812_vm3, %v2694_v56, 0.0  ;;  %v2692_v5 = vsel %vm2308_vm14, %v10300_v42, %v2500_v50  ;;  %v10302_v51 = vld [vmem:[#allocation23_spill] sm:$0xff] }
 0x1fb   : > { %v3314_v59 = vadd.f32 %v3313_v13, %v3312_v34  ;;  %v3299_v38 = vrot.slane %v3298_v30, 2  ;;  %v3332_v52 = vrot.slane %v3331_v8, 4  ;;  %v4987_v46 = vunpack.c.l.b16 %v4417_v7 }
 0x1fc   : > { %v5006_v24 = vsel %vm4597_vm12, %v4985_v39, %v4984_v22  ;;  %v4226_v10 = vmul.f32 0.125, %v3295_v16  ;;  %v3317_v32 = vsel %vm2812_vm3, %v2692_v5, 0.0  ;;  %vm2311_vm0 = vcmp.ge.f32.partialorder %v10302_v51, 0.0  ;;  %v8745_v22 = vpop.f32.mrb[2].mxu1 }
 0x1fd   : > { %v5007_v15 = vsel %vm4599_vm15, %v4986_v4, %v5006_v24  ;;  %v3315_v61 = vrot.slane %v3314_v59, 1  ;;  %v3300_v47 = vadd.f32 %v3299_v38, %v3298_v30  ;;  %v3333_v50 = vadd.f32 %v3332_v52, %v3331_v8  ;;  %v10303_v4 = vld [vmem:[#allocation24_spill] sm:$0xff]  ;;  %v8748_v30 = vpop.f32.mrb[3].mxu1 }
 0x1fe   : > { %v4418_v56 = vpack.c.bf16 %v4226_v10, %v4226_v10  ;;  %v5008_v42 = vsel %vm4601_vm5, %v4987_v46, %v5007_v15  ;;  %v3318_v27 = vrot.slane %v3317_v32, 4  ;;  %v4981_v35 = vunpack.c.l.b16 %v4411_v0  ;;  %v8758_v15 = vpop.f32.mrb[104].mxu0 }
 0x1ff   : > { %v4228_v34 = vmul.f32 0.125, %v3309_v28  ;;  %v3301_v13 = vrot.slane %v3300_v47, 1  ;;  %v2503_v7 = vmul.f32 0.01, %v10302_v51  ;;  %v3334_v5 = vrot.slane %v3333_v50, 2  ;;  %v8754_v28 = vpop.f32.mrb[4].mxu1 }
 0x200   : > { %v4988_v16 = vunpack.c.l.b16 %v4418_v56  ;;  %v3319_v39 = vadd.f32 %v3318_v27, %v3317_v32  ;;  %vm2309_vm2 = vcmp.ge.f32.partialorder %v10303_v4, 0.0  ;;  %v3316_v38 = vadd.f32 %v3315_v61, %v3314_v59  ;;  %v8760_v56 = vpop.f32.mrb[5].mxu1  ;;  %v8765_v27 = vpop.f32.mrb[105].mxu0 }
 0x201   : > { %v3302_v24 = vadd.f32 %v3301_v13, %v3300_v47  ;;  %v2695_v52 = vsel %vm2311_vm0, %v10302_v51, %v2503_v7  ;;  %v2501_v0 = vmul.f32 0.01, %v10303_v4  ;;  %v3335_v46 = vadd.f32 %v3334_v5, %v3333_v50  ;;  %10304 = vst [vmem:[#allocation9_spill] sm:$0xff] %v8760_v56  ;;  %v8767_v13 = vpop.f32.mrb[6].mxu1  ;;  %v8773_v5 = vpop.f32.mrb[106].mxu0 }
 0x202   : > { %v5009_v8 = vsel %vm4603_vm8, %v4988_v16, %v5008_v42  ;;  %v3320_v10 = vrot.slane %v3319_v39, 2  ;;  %v3338_v32 = vsel %vm2812_vm3, %v2695_v52, 0.0  ;;  %v4420_v59 = vpack.c.bf16 %v4228_v34, %v4228_v34  ;;  %10305 = vst [vmem:[#allocation11_spill] sm:$0xff] %v8767_v13 }
 0x203   : > { %v4227_v61 = vmul.f32 0.125, %v3302_v24  ;;  %v3339_v47 = vrot.slane %v3338_v32, 4  ;;  %v2693_v51 = vsel %vm2309_vm2, %v10303_v4, %v2501_v0  ;;  %v3336_v42 = vrot.slane %v3335_v46, 1 }
 0x204   : > { %v3321_v50 = vadd.f32 %v3320_v10, %v3319_v39  ;;  %v3324_v7 = vsel %vm2812_vm3, %v2693_v51, 0.0  ;;  %v4994_v16 = vsel %vm4601_vm5, %v8535_v12, %v8514_v63  ;;  %v8775_v34 = vmul.f32 0.125, %v3316_v38  ;;  %v8782_v10 = vpop.f32.mrb[7].mxu1 }
 0x205   : > { %v4419_v24 = vpack.c.bf16 %v4227_v61, %v4227_v61  ;;  %v3340_v52 = vadd.f32 %v3339_v47, %v3338_v32  ;;  %v3325_v56 = vrot.slane %v3324_v7, 4  ;;  %v3337_v4 = vadd.f32 %v3336_v42, %v3335_v46  ;;  %v8786_v61 = vpop.f32.mrb[107].mxu0 }
 0x206   : > { %v3322_v0 = vrot.slane %v3321_v50, 1  ;;  %v4995_v13 = vsel %vm4603_vm8, %v8551_v36, %v4994_v16  ;;  %v5001_v39 = vsel %vm4601_vm5, %v8665_v44, %v8644_v3  ;;  %v10306_v16 = vld [vmem:[#allocation25_spill] sm:$0xff]  ;;  %vm2315_vm9 = vcmp.ge.f32.partialorder %v8416_v54, 0.0 }
 0x207   : > { %v4989_v51 = vunpack.c.l.b16 %v4419_v24  ;;  %v3341_v63 = vrot.slane %v3340_v52, 2  ;;  %v3326_v12 = vadd.f32 %v3325_v56, %v3324_v7  ;;  %v4996_v38 = vsel %vm4605_vm11, %v8662_v2, %v4995_v13 }
 0x208   : > { %v4232_v32 = vmul.f32 0.125, %v3337_v4  ;;  %v3323_v46 = vadd.f32 %v3322_v0, %v3321_v50  ;;  %v4997_v47 = vsel %vm4607_vm1, %v8542_v58, %v4996_v38  ;;  %v5002_v36 = vsel %vm4603_vm8, %v8677_v37, %v5001_v39 }
 0x209   : > { %v8793_v3 = vsel %vm4605_vm11, %v4989_v51, %v5009_v8  ;;  %v3342_v44 = vadd.f32 %v3341_v63, %v3340_v52  ;;  %v3327_v42 = vrot.slane %v3326_v12, 2  ;;  %v4998_v56 = vsel %vm4609_vm4, %v8567_v43, %v4997_v47  ;;  %v10307_v51 = vld [vmem:[#allocation26_spill] sm:$0xff]  ;;  %v8812_v63 = vpop.f32.mrb[8].mxu1 }
 0x20a   : > { %v4424_v7 = vpack.c.bf16 %v4232_v32, %v4232_v32  ;;  %v4230_v2 = vmul.f32 0.125, %v3323_v46  ;;  %v5003_v13 = vsel %vm4605_vm11, %v4981_v35, %v5002_v36  ;;  %vm2314_vm6 = vcmp.ge.f32.partialorder %v10306_v16, 0.0 }
 0x20b   : > { %v3343_v50 = vrot.slane %v3342_v44, 1  ;;  %v3328_v24 = vadd.f32 %v3327_v42, %v3326_v12  ;;  %v5004_v58 = vsel %vm4607_vm1, %v8667_v33, %v5003_v13  ;;  %v2506_v37 = vmul.f32 0.01, %v10306_v16 }
 0x20c   : > { %v8802_v8 = vunpack.c.l.b16 %v4420_v59  ;;  %v4422_v4 = vpack.c.bf16 %v4230_v2, %v4230_v2  ;;  %v5005_v43 = vsel %vm4609_vm4, %v8703_v21, %v5004_v58  ;;  %vm2312_vm7 = vcmp.ge.f32.partialorder %v10307_v51, 0.0 }
 0x20d   : > { %v3329_v0 = vrot.slane %v3328_v24, 1  ;;  %v8808_v35 = vpack.c.b16 %v5005_v43, %v4998_v56  ;;  %v2698_v39 = vsel %vm2314_vm6, %v10306_v16, %v2506_v37  ;;  %v5171_v33 = vunpack.c.l.b16 %v4424_v7 }
 0x20e   : > { %v3344_v12 = vadd.f32 %v3343_v50, %v3342_v44  ;;  %v3359_v59 = vsel %vm2812_vm3, %v2698_v39, 0.0  ;;  %v2504_v38 = vmul.f32 0.01, %v10307_v51  ;;  %v2507_v46 = vmul.f32 0.01, %v8416_v54 }
 0x20f   : > { %v3330_v32 = vadd.f32 %v3329_v0, %v3328_v24  ;;  %7294 = vmatprep.mubr.msk.bf16.mxu1 %vm2812_vm3, %v8808_v35  ;;  %v3360_v21 = vrot.slane %v3359_v59, 4  ;;  %v5169_v47 = vunpack.c.l.b16 %v4422_v4  ;;  %vm2313_vm10 = vcmp.ge.f32.partialorder %v8419_v60, 0.0 }
 0x210   : > { %v2696_v36 = vsel %vm2312_vm7, %v10307_v51, %v2504_v38  ;;  %v2505_v44 = vmul.f32 0.01, %v8419_v60  ;;  %vm2318_vm13 = vcmp.ge.f32.partialorder %v8422_v17, 0.0  ;;  %v2699_v13 = vsel %vm2315_vm9, %v8416_v54, %v2507_v46 }
 0x211   : > { %v4231_v42 = vmul.f32 0.125, %v3330_v32  ;;  %v3361_v56 = vadd.f32 %v3360_v21, %v3359_v59  ;;  %v3345_v7 = vsel %vm2812_vm3, %v2696_v36, 0.0  ;;  %v2510_v50 = vmul.f32 0.01, %v8422_v17 }
 0x212   : > { %v3346_v2 = vrot.slane %v3345_v7, 4  ;;  %v2697_v16 = vsel %vm2313_vm10, %v8419_v60, %v2505_v44  ;;  %v8828_v24 = vmul.f32 0.125, %v3344_v12  ;;  %v3366_v4 = vsel %vm2812_vm3, %v2699_v13, 0.0  ;;  %v8834_v60 = vpop.f32.mrb[9].mxu1 }
 0x213   : > { %v4423_v58 = vpack.c.bf16 %v4231_v42, %v4231_v42  ;;  %v3362_v37 = vrot.slane %v3361_v56, 2  ;;  %v3367_v0 = vrot.slane %v3366_v4, 4  ;;  %v3352_v39 = vsel %vm2812_vm3, %v2697_v16, 0.0  ;;  %v8837_v36 = vpop.f32.mrb[10].mxu1 }
 0x214   : > { %v3347_v43 = vadd.f32 %v3346_v2, %v3345_v7  ;;  %v2702_v51 = vsel %vm2318_vm13, %v8422_v17, %v2510_v50  ;;  %v3353_v32 = vrot.slane %v3352_v39, 4  ;;  %vm2316_vm14 = vcmp.ge.f32.partialorder %v8425_v62, 0.0  ;;  %v8841_v2 = vpop.f32.mrb[11].mxu1 }
 0x215   : > { %v5170_v59 = vunpack.c.l.b16 %v4423_v58  ;;  %v3363_v38 = vadd.f32 %v3362_v37, %v3361_v56  ;;  %v3387_v54 = vsel %vm2812_vm3, %v2702_v51, 0.0  ;;  %v3368_v12 = vadd.f32 %v3367_v0, %v3366_v4  ;;  %v8846_v58 = vpop.f32.mrb[12].mxu1 }
 0x216   : > { %v3348_v21 = vrot.slane %v3347_v43, 2  ;;  %v3388_v46 = vrot.slane %v3387_v54, 4  ;;  %v3354_v7 = vadd.f32 %v3353_v32, %v3352_v39  ;;  %v2508_v17 = vmul.f32 0.01, %v8425_v62 }
 0x217   : > { %v5193_v44 = vsel %vm4597_vm12, %v5170_v59, %v5169_v47  ;;  %v3364_v42 = vrot.slane %v3363_v38, 1  ;;  %v3369_v16 = vrot.slane %v3368_v12, 2  ;;  %vm2319_vm0 = vcmp.ge.f32.partialorder %v8438_v26, 0.0 }
 0x218   : > { %v8844_v56 = vsel %vm4599_vm15, %v5171_v33, %v5193_v44  ;;  %v3349_v13 = vadd.f32 %v3348_v21, %v3347_v43  ;;  %v3389_v50 = vadd.f32 %v3388_v46, %v3387_v54  ;;  %v3355_v4 = vrot.slane %v3354_v7, 2 }
 0x219   : > { %v3365_v37 = vadd.f32 %v3364_v42, %v3363_v38  ;;  %v2700_v0 = vsel %vm2316_vm14, %v8425_v62, %v2508_v17  ;;  %v3370_v39 = vadd.f32 %v3369_v16, %v3368_v12  ;;  %v2511_v43 = vmul.f32 0.01, %v8438_v26  ;;  %v7570_v12 = vld [vmem:[%s10178_s3 + $0x10] sm:$0xff]  }
 0x21a   : > { %v3350_v47 = vrot.slane %v3349_v13, 1  ;;  %v3390_v51 = vrot.slane %v3389_v50, 2  ;;  %v3373_v59 = vsel %vm2812_vm3, %v2700_v0, 0.0  ;;  %v3356_v52 = vadd.f32 %v3355_v4, %v3354_v7 }
 0x21b   : > { %v4236_v32 = vmul.f32 0.125, %v3365_v37  ;;  %v3374_v33 = vrot.slane %v3373_v59, 4  ;;  %v4425_v54 = vpack.c.bf16 %v8828_v24, %v8828_v24  ;;  %v3371_v38 = vrot.slane %v3370_v39, 1 }
 0x21c   : > { %v3351_v21 = vadd.f32 %v3350_v47, %v3349_v13  ;;  %v3391_v46 = vadd.f32 %v3390_v51, %v3389_v50  ;;  %v3357_v44 = vrot.slane %v3356_v52, 1  ;;  %v2703_v42 = vsel %vm2319_vm0, %v8438_v26, %v2511_v43 }
 0x21d   : > { %v3375_v62 = vadd.f32 %v3374_v33, %v3373_v59  ;;  %vm2317_vm2 = vcmp.ge.f32.partialorder %v8453_v53, 0.0  ;;  %v3372_v17 = vadd.f32 %v3371_v38, %v3370_v39  ;;  %v3394_v37 = vsel %vm2812_vm3, %v2703_v42, 0.0 }
 0x21e   : > { %v4234_v7 = vmul.f32 0.125, %v3351_v21  ;;  %v3392_v16 = vrot.slane %v3391_v46, 1  ;;  %v4428_v4 = vpack.c.bf16 %v4236_v32, %v4236_v32  ;;  %v3358_v24 = vadd.f32 %v3357_v44, %v3356_v52 }
 0x21f   : > { %v3376_v13 = vrot.slane %v3375_v62, 2  ;;  %v3395_v0 = vrot.slane %v3394_v37, 4  ;;  %v8860_v47 = vmul.f32 0.125, %v3372_v17  ;;  %v2509_v26 = vmul.f32 0.01, %v8453_v53 }
 0x220   : > { %v4426_v50 = vpack.c.bf16 %v4234_v7, %v4234_v7  ;;  %v3393_v51 = vadd.f32 %v3392_v16, %v3391_v46  ;;  %v10308_v59 = vpack.c.bf16 %v8775_v34, %v8775_v34  ;;  %v5027_v39 = vand.u32 %v7570_v12, %v7996_v9 }
 0x221   : > { %v3377_v43 = vadd.f32 %v3376_v13, %v3375_v62  ;;  %v3396_v21 = vadd.f32 %v3395_v0, %v3394_v37  ;;  %v8867_v38 = vunpack.c.l.b16 %v4425_v54  ;;  %v8869_v32 = vmul.f32 0.125, %v3358_v24 }
 0x222   : > { %v4991_v33 = vunpack.c.l.b16 %v10308_v59  ;;  %v4240_v52 = vmul.f32 0.125, %v3393_v51  ;;  %v2701_v44 = vsel %vm2317_vm2, %v8453_v53, %v2509_v26  ;;  %v8874_v46 = vunpack.c.l.b16 %v4428_v4  ;;  %7292 = vmatprep.subr.bf16.mxu1 %v5027_v39  ;;  %v8892_v51 = vpop.f32.mrb[13].mxu1 }
 0x223   : > { %v3378_v42 = vrot.slane %v3377_v43, 1  ;;  %v3397_v7 = vrot.slane %v3396_v21, 2  ;;  %v3380_v34 = vsel %vm2812_vm3, %v2701_v44, 0.0  ;;  %v8877_v62 = vunpack.c.l.b16 %v4426_v50  ;;  %7293 = vmatpush3.bf16.msra.mxu1 %v5027_v39  ;;  %v8890_v50 = vpop.f32.mrb[108].mxu0 }
 0x224   : > { %v3381_v12 = vrot.slane %v3380_v34, 4  ;;  %v5011_v17 = vsel %vm4607_vm1, %v8802_v8, %v8793_v3  ;;  %v4432_v16 = vpack.c.bf16 %v4240_v52, %v4240_v52  ;;  %vm2322_vm6 = vcmp.ge.f32.partialorder %v8487_v18, 0.0  ;;  %v8896_v8 = vpop.f32.mrb[109].mxu0 }
 0x225   : > { %v3379_v53 = vadd.f32 %v3378_v42, %v3377_v43  ;;  %v3398_v37 = vadd.f32 %v3397_v7, %v3396_v21  ;;  %v5012_v4 = vsel %vm4609_vm4, %v4991_v33, %v5011_v17  ;;  %v2514_v3 = vmul.f32 0.01, %v8487_v18  ;;  %v7571_v7 = vld [vmem:[%s10180_s5 + $0x10] sm:$0xff]  }
 0x226   : > { %v3382_v13 = vadd.f32 %v3381_v12, %v3380_v34  ;;  %v8887_v0 = vpack.c.b16 %v5012_v4, %v5012_v4  ;;  %vm2320_vm7 = vcmp.ge.f32.partialorder %v8498_v45, 0.0  ;;  %v2512_v43 = vmul.f32 0.01, %v8498_v45  ;;  %v8913_v34 = vpop.f32.mrb[14].mxu1  ;;  %v8924_v4 = vpop.f32.mrb[110].mxu0 }
 0x227   : > { %v4238_v26 = vmul.f32 0.125, %v3379_v53  ;;  %v3399_v59 = vrot.slane %v3398_v37, 1  ;;  %vm2323_vm9 = vcmp.ge.f32.partialorder %v8501_v40, 0.0  ;;  %v2515_v21 = vmul.f32 0.01, %v8501_v40  ;;  %10309 = vst [vmem:[#allocation14_spill] sm:$0xff] %v8913_v34 }
 0x228   : > { %v3383_v33 = vrot.slane %v3382_v13, 2  ;;  %7295 = vmatmul.mubr.msk.bf16.vlgmr.msra.gmra.mrb[68].mxu1 %vm2812_vm3, %v8887_v0  ;;  %v8903_v39 = vunpack.c.l.b16 %v4432_v16  ;;  %v2706_v42 = vsel %vm2322_vm6, %v8487_v18, %v2514_v3  ;;  %v2704_v16 = vsel %vm2320_vm7, %v8498_v45, %v2512_v43  ;;  %10310 = vst [vmem:[#allocation15_spill] sm:$0xff] %v8924_v4  ;;  %v8934_v24 = vpop.f32.mrb[15].mxu1 }
 0x229   : > { %v4430_v52 = vpack.c.bf16 %v4238_v26, %v4238_v26  ;;  %v3400_v44 = vadd.f32 %v3399_v59, %v3398_v37  ;;  %7300 = vmatprep.mubr.msk.bf16.mxu1 %vm2812_vm3, %v8808_v35  ;;  %v3415_v17 = vsel %vm2812_vm3, %v2706_v42, 0.0  ;;  %v2707_v53 = vsel %vm2323_vm9, %v8501_v40, %v2515_v21  ;;  %10312 = vst [vmem:[#allocation17_spill] sm:$0xff] %v8934_v24 }
 0x22a   : > { %v3384_v12 = vadd.f32 %v3383_v33, %v3382_v13  ;;  %v3416_v18 = vrot.slane %v3415_v17, 4  ;;  %v3401_v35 = vsel %vm2812_vm3, %v2704_v16, 0.0  ;;  %vm2321_vm10 = vcmp.ge.f32.partialorder %v8505_v29, 0.0 }
 0x22b   : > { %v8920_v37 = vmul.f32 0.125, %v3400_v44  ;;  %v3402_v59 = vrot.slane %v3401_v35, 4  ;;  %v3422_v13 = vsel %vm2812_vm3, %v2707_v53, 0.0  ;;  %v2513_v3 = vmul.f32 0.01, %v8505_v29 }
 0x22c   : > { %v3385_v26 = vrot.slane %v3384_v12, 1  ;;  %v5177_v33 = vunpack.c.l.b16 %v4430_v52  ;;  %v3417_v42 = vadd.f32 %v3416_v18, %v3415_v17  ;;  %v3423_v45 = vrot.slane %v3422_v13, 4 }
 0x22d   : > { %v8929_v40 = vand.u32 %v7571_v7, %v7996_v9  ;;  %v4433_v43 = vpack.c.bf16 %v8920_v37, %v8920_v37  ;;  %v3403_v44 = vadd.f32 %v3402_v59, %v3401_v35  ;;  %v2705_v16 = vsel %vm2321_vm10, %v8505_v29, %v2513_v3  ;;  %v8944_v3 = vpop.f32.mrb[111].mxu0 }
 0x22e   : > { %v3386_v21 = vadd.f32 %v3385_v26, %v3384_v12  ;;  %v3418_v54 = vrot.slane %v3417_v42, 2  ;;  %v3424_v4 = vadd.f32 %v3423_v45, %v3422_v13  ;;  %v3408_v53 = vsel %vm2812_vm3, %v2705_v16, 0.0 }
 0x22f   : > { %10311 = vst [vmem:[#allocation16_spill] sm:$0xff] %v8929_v40  ;;  %7298 = vmatprep.subr.bf16.mxu1 %v8929_v40  ;;  %vm2326_vm13 = vcmp.ge.f32.partialorder %v8511_v31, 0.0  ;;  %v3404_v7 = vrot.slane %v3403_v44, 2  ;;  %v3409_v17 = vrot.slane %v3408_v53, 4  ;;  %v2518_v12 = vmul.f32 0.01, %v8511_v31 }
 0x230   : > { %v4239_v52 = vmul.f32 0.125, %v3386_v21  ;;  %7299 = vmatpush3.bf16.msra.mxu1 %v8929_v40  ;;  %v3419_v37 = vadd.f32 %v3418_v54, %v3417_v42  ;;  %v3425_v18 = vrot.slane %v3424_v4, 2  ;;  %vm2324_vm14 = vcmp.ge.f32.partialorder %v8523_v1, 0.0 }
 0x231   : > { %v2516_v29 = vmul.f32 0.01, %v8523_v1  ;;  %v3405_v26 = vadd.f32 %v3404_v7, %v3403_v44  ;;  %v3410_v59 = vadd.f32 %v3409_v17, %v3408_v53  ;;  %v2710_v13 = vsel %vm2326_vm13, %v8511_v31, %v2518_v12  ;;  %v8952_v31 = vpop.f32.mrb[16].mxu1 }
 0x232   : > { %v4431_v35 = vpack.c.bf16 %v4239_v52, %v4239_v52  ;;  %v3420_v45 = vrot.slane %v3419_v37, 1  ;;  %v3426_v21 = vadd.f32 %v3425_v18, %v3424_v4  ;;  %v3443_v16 = vsel %vm2812_vm3, %v2710_v13, 0.0  ;;  %10313 = vst [vmem:[#allocation18_spill] sm:$0xff] %v8952_v31 }
 0x233   : > { %7301 = vmatmul.mubr.msk.bf16.vlgmr.msra.gmra.mrb[72].mxu1 %vm2812_vm3, %v8887_v0  ;;  %v2708_v54 = vsel %vm2324_vm14, %v8523_v1, %v2516_v29  ;;  %v3406_v40 = vrot.slane %v3405_v26, 1  ;;  %v3411_v24 = vrot.slane %v3410_v59, 2  ;;  %v3444_v34 = vrot.slane %v3443_v16, 4 }
 0x234   : > { %v5178_v42 = vunpack.c.l.b16 %v4431_v35  ;;  %v3421_v52 = vadd.f32 %v3420_v45, %v3419_v37  ;;  %v3427_v44 = vrot.slane %v3426_v21, 1  ;;  %v3429_v53 = vsel %vm2812_vm3, %v2708_v54, 0.0 }
 0x235   : > { %vm2327_vm0 = vcmp.ge.f32.partialorder %v8528_v48, 0.0  ;;  %v3407_v7 = vadd.f32 %v3406_v40, %v3405_v26  ;;  %v3412_v0 = vadd.f32 %v3411_v24, %v3410_v59  ;;  %v3445_v17 = vadd.f32 %v3444_v34, %v3443_v16 }
 0x236   : > { %v5200_v4 = vsel %vm4597_vm12, %v5178_v42, %v5177_v33  ;;  %v4244_v12 = vmul.f32 0.125, %v3421_v52  ;;  %v3428_v18 = vadd.f32 %v3427_v44, %v3426_v21  ;;  %v3430_v29 = vrot.slane %v3429_v53, 4 }
 0x237   : > { %v8957_v1 = vsel %vm4599_vm15, %v8903_v39, %v5200_v4  ;;  %v4242_v37 = vmul.f32 0.125, %v3407_v7  ;;  %v3413_v35 = vrot.slane %v3412_v0, 1  ;;  %v3446_v13 = vrot.slane %v3445_v17, 2 }
 0x238   : > { %v2519_v45 = vmul.f32 0.01, %v8528_v48  ;;  %v10314_v54 = vpack.c.bf16 %v8860_v47, %v8860_v47  ;;  %v4436_v33 = vpack.c.bf16 %v4244_v12, %v4244_v12  ;;  %v4245_v24 = vmul.f32 0.125, %v3428_v18 }
 0x239   : > { %v3431_v34 = vadd.f32 %v3430_v29, %v3429_v53  ;;  %v10315_v39 = vpack.c.bf16 %v8869_v32, %v8869_v32  ;;  %v3414_v26 = vadd.f32 %v3413_v35, %v3412_v0  ;;  %v3447_v59 = vadd.f32 %v3446_v13, %v3445_v17 }
 0x23a   : > { %v8963_v31 = vunpack.c.l.b16 %v10314_v54  ;;  %v2711_v21 = vsel %vm2327_vm0, %v8528_v48, %v2519_v45  ;;  %v8973_v16 = vunpack.c.l.b16 %v4433_v43  ;;  %vm2325_vm2 = vcmp.ge.f32.partialorder %v8549_v25, 0.0 }
 0x23b   : > { %v8968_v40 = vunpack.c.l.b16 %v10315_v39  ;;  %v3432_v42 = vrot.slane %v3431_v34, 2  ;;  %v3450_v47 = vsel %vm2812_vm3, %v2711_v21, 0.0  ;;  %v4434_v52 = vpack.c.bf16 %v4242_v37, %v4242_v37 }
 0x23c   : > { %v4243_v44 = vmul.f32 0.125, %v3414_v26  ;;  %v3448_v53 = vrot.slane %v3447_v59, 1  ;;  %v3451_v4 = vrot.slane %v3450_v47, 4  ;;  %v8977_v32 = vunpack.c.l.b16 %v4436_v33  ;;  %v8988_v33 = vpop.f32.mrb[17].mxu1 }
 0x23d   : > { %v4437_v7 = vpack.c.bf16 %v4245_v24, %v4245_v24  ;;  %v3433_v0 = vadd.f32 %v3432_v42, %v3431_v34  ;;  %v2517_v17 = vmul.f32 0.01, %v8549_v25  ;;  %vm2330_vm6 = vcmp.ge.f32.partialorder %v8588_v20, 0.0  ;;  %10316 = vst [vmem:[#allocation19_spill] sm:$0xff] %v8988_v33 }
 0x23e   : > { %v3449_v12 = vadd.f32 %v3448_v53, %v3447_v59  ;;  %v3452_v18 = vadd.f32 %v3451_v4, %v3450_v47  ;;  %v2522_v48 = vmul.f32 0.01, %v8588_v20  ;;  %vm2328_vm7 = vcmp.ge.f32.partialorder %v8597_v57, 0.0  ;;  %v8992_v59 = vpop.f32.mrb[18].mxu1 }
 0x23f   : > { %v3434_v43 = vrot.slane %v3433_v0, 1  ;;  %v2709_v29 = vsel %vm2325_vm2, %v8549_v25, %v2517_v17  ;;  %v2520_v37 = vmul.f32 0.01, %v8597_v57  ;;  %v8985_v35 = vunpack.c.l.b16 %v4434_v52  ;;  %10317 = vst [vmem:[#allocation20_spill] sm:$0xff] %v8992_v59  ;;  %v8998_v52 = vpop.f32.mrb[19].mxu1 }
 0x240   : > { %v4435_v13 = vpack.c.bf16 %v4243_v44, %v4243_v44  ;;  %v3453_v45 = vrot.slane %v3452_v18, 2  ;;  %v3436_v54 = vsel %vm2812_vm3, %v2709_v29, 0.0  ;;  %v4248_v24 = vmul.f32 0.125, %v3449_v12  ;;  %10318 = vst [vmem:[#allocation21_spill] sm:$0xff] %v8998_v52 }
 0x241   : > { %v3437_v34 = vrot.slane %v3436_v54, 4  ;;  %v2714_v39 = vsel %vm2330_vm6, %v8588_v20, %v2522_v48  ;;  %v2712_v26 = vsel %vm2328_vm7, %v8597_v57, %v2520_v37  ;;  %v8994_v25 = vunpack.c.l.b16 %v4437_v7 }
 0x242   : > { %v3454_v21 = vadd.f32 %v3453_v45, %v3452_v18  ;;  %v3471_v42 = vsel %vm2812_vm3, %v2714_v39, 0.0  ;;  %v3457_v47 = vsel %vm2812_vm3, %v2712_v26, 0.0  ;;  %v3435_v44 = vadd.f32 %v3434_v43, %v3433_v0  ;;  %v9007_v43 = vpop.f32.mrb[112].mxu0 }
 0x243   : > { %v3438_v53 = vadd.f32 %v3437_v34, %v3436_v54  ;;  %v3472_v4 = vrot.slane %v3471_v42, 4  ;;  %v3458_v17 = vrot.slane %v3457_v47, 4  ;;  %v9000_v12 = vunpack.c.l.b16 %v4435_v13  ;;  %10319 = vst [vmem:[#allocation22_spill] sm:$0xff] %v9007_v43  ;;  %v9009_v26 = vpop.f32.mrb[113].mxu0 }
 0x244   : > { %v3455_v20 = vrot.slane %v3454_v21, 1  ;;  %vm2331_vm9 = vcmp.ge.f32.partialorder %v8602_v55, 0.0  ;;  %v2523_v57 = vmul.f32 0.01, %v8602_v55  ;;  %v4440_v7 = vpack.c.bf16 %v4248_v24, %v4248_v24  ;;  %10320 = vst [vmem:[#allocation23_spill] sm:$0xff] %v9009_v26 }
 0x245   : > { %v3439_v48 = vrot.slane %v3438_v53, 2  ;;  %v3473_v18 = vadd.f32 %v3472_v4, %v3471_v42  ;;  %v3459_v29 = vadd.f32 %v3458_v17, %v3457_v47  ;;  %vm2329_vm10 = vcmp.ge.f32.partialorder %v8616_v49, 0.0 }
 0x246   : > { %v3456_v37 = vadd.f32 %v3455_v20, %v3454_v21  ;;  %v2715_v45 = vsel %vm2331_vm9, %v8602_v55, %v2523_v57  ;;  %v2521_v0 = vmul.f32 0.01, %v8616_v49  ;;  %v4246_v13 = vmul.f32 0.125, %v3435_v44 }
 0x247   : > { %v3440_v54 = vadd.f32 %v3439_v48, %v3438_v53  ;;  %v3474_v34 = vrot.slane %v3473_v18, 2  ;;  %v3460_v39 = vrot.slane %v3459_v29, 2  ;;  %v3478_v24 = vsel %vm2812_vm3, %v2715_v45, 0.0  ;;  %v9017_v45 = vpop.f32.mrb[114].mxu0 }
 0x248   : > { %v4249_v52 = vmul.f32 0.125, %v3456_v37  ;;  %v2713_v42 = vsel %vm2329_vm10, %v8616_v49, %v2521_v0  ;;  %vm2334_vm13 = vcmp.ge.f32.partialorder %v8629_v6, 0.0  ;;  %v3479_v4 = vrot.slane %v3478_v24, 4  ;;  %10321 = vst [vmem:[#allocation24_spill] sm:$0xff] %v9017_v45 }
 0x249   : > { %v3441_v55 = vrot.slane %v3440_v54, 1  ;;  %v3475_v21 = vadd.f32 %v3474_v34, %v3473_v18  ;;  %v3461_v47 = vadd.f32 %v3460_v39, %v3459_v29  ;;  %v5187_v17 = vunpack.c.l.b16 %v4440_v7  ;;  %v9023_v29 = vpop.f32.mrb[115].mxu0 }
 0x24a   : > { %v3464_v20 = vsel %vm2812_vm3, %v2713_v42, 0.0  ;;  %v2526_v44 = vmul.f32 0.01, %v8629_v6  ;;  %vm2332_vm14 = vcmp.ge.f32.partialorder %v8640_v11, 0.0  ;;  %v3480_v37 = vadd.f32 %v3479_v4, %v3478_v24  ;;  %10322 = vst [vmem:[#allocation25_spill] sm:$0xff] %v9023_v29  ;;  %v9035_v33 = vpop.f32.mrb[116].mxu0 }
 0x24b   : > { %v3442_v53 = vadd.f32 %v3441_v55, %v3440_v54  ;;  %v3476_v57 = vrot.slane %v3475_v21, 1  ;;  %v3462_v48 = vrot.slane %v3461_v47, 1  ;;  %v4438_v49 = vpack.c.bf16 %v4246_v13, %v4246_v13 }
 0x24c   : > { %v3465_v0 = vrot.slane %v3464_v20, 4  ;;  %v2718_v18 = vsel %vm2334_vm13, %v8629_v6, %v2526_v44  ;;  %v2524_v7 = vmul.f32 0.01, %v8640_v11  ;;  %v4441_v34 = vpack.c.bf16 %v4249_v52, %v4249_v52 }
 0x24d   : > { %v4247_v39 = vmul.f32 0.125, %v3442_v53  ;;  %v3463_v42 = vadd.f32 %v3462_v48, %v3461_v47  ;;  %v3481_v26 = vrot.slane %v3480_v37, 2  ;;  %v3477_v54 = vadd.f32 %v3476_v57, %v3475_v21 }
 0x24e   : > { %v3466_v55 = vadd.f32 %v3465_v0, %v3464_v20  ;;  %v3499_v24 = vsel %vm2812_vm3, %v2718_v18, 0.0  ;;  %v2716_v13 = vsel %vm2332_vm14, %v8640_v11, %v2524_v7  ;;  %vm2335_vm0 = vcmp.ge.f32.partialorder %v8648_v41, 0.0 }
 0x24f   : > { %v4439_v4 = vpack.c.bf16 %v4247_v39, %v4247_v39  ;;  %v4250_v45 = vmul.f32 0.125, %v3463_v42  ;;  %v3482_v43 = vadd.f32 %v3481_v26, %v3480_v37  ;;  %v3500_v44 = vrot.slane %v3499_v24, 4 }
 0x250   : > { %v3467_v6 = vrot.slane %v3466_v55, 2  ;;  %v3485_v52 = vsel %vm2812_vm3, %v2716_v13, 0.0  ;;  %v2527_v47 = vmul.f32 0.01, %v8648_v41  ;;  %v5185_v53 = vunpack.c.l.b16 %v4438_v49 }
 0x251   : > { %v5186_v21 = vunpack.c.l.b16 %v4439_v4  ;;  %v4442_v20 = vpack.c.bf16 %v4250_v45, %v4250_v45  ;;  %v3483_v57 = vrot.slane %v3482_v43, 1  ;;  %v3501_v0 = vadd.f32 %v3500_v44, %v3499_v24 }
 0x252   : > { %v3468_v48 = vadd.f32 %v3467_v6, %v3466_v55  ;;  %v3486_v18 = vrot.slane %v3485_v52, 4  ;;  %v2719_v11 = vsel %vm2335_vm0, %v8648_v41, %v2527_v47  ;;  %v5188_v7 = vunpack.c.l.b16 %v4441_v34  ;;  %v9040_v41 = vpop.f32.mrb[117].mxu0 }
 0x253   : > { %v5207_v26 = vsel %vm4597_vm12, %v5186_v21, %v5185_v53  ;;  %v4252_v37 = vmul.f32 0.125, %v3477_v54  ;;  %v5189_v39 = vunpack.c.l.b16 %v4442_v20  ;;  %v3502_v13 = vrot.slane %v3501_v0, 2 }
 0x254   : > { %v5208_v42 = vsel %vm4599_vm15, %v5187_v17, %v5207_v26  ;;  %v3469_v29 = vrot.slane %v3468_v48, 1  ;;  %v3487_v59 = vadd.f32 %v3486_v18, %v3485_v52  ;;  %v3484_v49 = vadd.f32 %v3483_v57, %v3482_v43  ;;  %v9047_v43 = vpop.f32.mrb[118].mxu0 }
 0x255   : > { %v5209_v45 = vsel %vm4601_vm5, %v5188_v7, %v5208_v42  ;;  %v3506_v55 = vsel %vm2812_vm3, %v2719_v11, 0.0  ;;  %vm2333_vm2 = vcmp.ge.f32.partialorder %v8672_v14, 0.0  ;;  %v3503_v24 = vadd.f32 %v3502_v13, %v3501_v0  ;;  %v9066_v42 = vpop.f32.mrb[119].mxu0 }
 0x256   : > { %v5210_v34 = vsel %vm4603_vm8, %v5189_v39, %v5209_v45  ;;  %v3470_v54 = vadd.f32 %v3469_v29, %v3468_v48  ;;  %v3488_v4 = vrot.slane %v3487_v59, 2  ;;  %v4444_v17 = vpack.c.bf16 %v4252_v37, %v4252_v37 }
 0x257   : > { %v3507_v6 = vrot.slane %v3506_v55, 4  ;;  %v2525_v44 = vmul.f32 0.01, %v8672_v14  ;;  %v5195_v52 = vsel %vm4601_vm5, %v8867_v38, %v8844_v56  ;;  %v3504_v53 = vrot.slane %v3503_v24, 1 }
 0x258   : > { %v4251_v47 = vmul.f32 0.125, %v3470_v54  ;;  %v3489_v21 = vadd.f32 %v3488_v4, %v3487_v59  ;;  %v5196_v20 = vsel %vm4603_vm8, %v8877_v62, %v5195_v52  ;;  %v9051_v57 = vmul.f32 0.125, %v3484_v49 }
 0x259   : > { %v3508_v29 = vadd.f32 %v3507_v6, %v3506_v55  ;;  %v2717_v48 = vsel %vm2333_vm2, %v8672_v14, %v2525_v44  ;;  %v5197_v0 = vsel %vm4605_vm11, %v8968_v40, %v5196_v20  ;;  %v3505_v56 = vadd.f32 %v3504_v53, %v3503_v24  ;;  %v10323_v55 = vld [vmem:[#allocation12_spill] sm:$0xff] }
 0x25a   : > { %v4443_v18 = vpack.c.bf16 %v4251_v47, %v4251_v47  ;;  %v3490_v38 = vrot.slane %v3489_v21, 1  ;;  %v3492_v11 = vsel %vm2812_vm3, %v2717_v48, 0.0  ;;  %v5198_v62 = vsel %vm4607_vm1, %v8874_v46, %v5197_v0  ;;  %v9091_v48 = vpop.f32.mrb[120].mxu0 }
 0x25b   : > { %v3509_v7 = vrot.slane %v3508_v29, 2  ;;  %v3493_v59 = vrot.slane %v3492_v11, 4  ;;  %v5202_v26 = vsel %vm4601_vm5, %v8973_v16, %v8957_v1  ;;  %v4256_v39 = vmul.f32 0.125, %v3505_v56 }
 0x25c   : > { %v5190_v37 = vunpack.c.l.b16 %v4443_v18  ;;  %v3491_v14 = vadd.f32 %v3490_v38, %v3489_v21  ;;  %v5199_v40 = vsel %vm4609_vm4, %v8963_v31, %v5198_v62  ;;  %v5203_v49 = vsel %vm4603_vm8, %v8985_v35, %v5202_v26  ;;  %v10324_v21 = vld [vmem:[#allocation7_spill] sm:$0xff]  ;;  %v10325_v18 = vld [vmem:[#allocation13_spill] sm:$0xff]  ;;  %v9097_v38 = vpop.f32.mrb[121].mxu0 }
 0x25d   : > { %v3510_v13 = vadd.f32 %v3509_v7, %v3508_v29  ;;  %v3494_v45 = vadd.f32 %v3493_v59, %v3492_v11  ;;  %vm2338_vm6 = vcmp.ge.f32.partialorder %v10323_v55, 0.0  ;;  %v4448_v54 = vpack.c.bf16 %v4256_v39, %v4256_v39  ;;  %v10326_v59 = vld [vmem:[#allocation10_spill] sm:$0xff]  ;;  %v9102_v26 = vpop.f32.mrb[122].mxu0 }
 0x25e   : > { %v9072_v46 = vsel %vm4605_vm11, %v5190_v37, %v5210_v34  ;;  %v4254_v1 = vmul.f32 0.125, %v3491_v14  ;;  %v5204_v16 = vsel %vm4605_vm11, %v9000_v12, %v5203_v49  ;;  %v2530_v6 = vmul.f32 0.01, %v10323_v55 }
 0x25f   : > { %v3511_v24 = vrot.slane %v3510_v13, 1  ;;  %v3495_v4 = vrot.slane %v3494_v45, 2  ;;  %v5205_v31 = vsel %vm4607_vm1, %v8977_v32, %v5204_v16  ;;  %v9079_v44 = vunpack.c.l.b16 %v4444_v17 }
 0x260   : > { %v4445_v35 = vpack.c.bf16 %v9051_v57, %v9051_v57  ;;  %v4446_v52 = vpack.c.bf16 %v4254_v1, %v4254_v1  ;;  %v5206_v34 = vsel %vm4609_vm4, %v8994_v25, %v5205_v31  ;;  %v2722_v12 = vsel %vm2338_vm6, %v10323_v55, %v2530_v6 }
 0x261   : > { %v3496_v47 = vadd.f32 %v3495_v4, %v3494_v45  ;;  %v9085_v53 = vpack.c.b16 %v5206_v34, %v5199_v40  ;;  %vm2336_vm7 = vcmp.ge.f32.partialorder %v10324_v21, 0.0  ;;  %v5372_v20 = vunpack.c.l.b16 %v4448_v54 }
 0x262   : > { %v3512_v32 = vadd.f32 %v3511_v24, %v3510_v13  ;;  %v3527_v29 = vsel %vm2812_vm3, %v2722_v12, 0.0  ;;  %v2528_v17 = vmul.f32 0.01, %v10324_v21  ;;  %vm2339_vm9 = vcmp.ge.f32.partialorder %v10325_v18, 0.0 }
 0x263   : > { %v3497_v0 = vrot.slane %v3496_v47, 1  ;;  %7306 = vmatprep.mubr.msk.bf16.mxu1 %vm2812_vm3, %v9085_v53  ;;  %v3528_v25 = vrot.slane %v3527_v29, 4  ;;  %v2531_v56 = vmul.f32 0.01, %v10325_v18  ;;  %v5370_v11 = vunpack.c.l.b16 %v4446_v52 }
 0x264   : > { %v2720_v7 = vsel %vm2336_vm7, %v10324_v21, %v2528_v17  ;;  %vm2337_vm10 = vcmp.ge.f32.partialorder %v10326_v59, 0.0  ;;  %v2529_v62 = vmul.f32 0.01, %v10326_v59  ;;  %vm2378_vm13 = vcmp.ge.f32.partialorder %v8733_v19, 0.0 }
 0x265   : > { %v3498_v37 = vadd.f32 %v3497_v0, %v3496_v47  ;;  %v3529_v39 = vadd.f32 %v3528_v25, %v3527_v29  ;;  %v3513_v14 = vsel %vm2812_vm3, %v2720_v7, 0.0  ;;  %v2723_v13 = vsel %vm2339_vm9, %v10325_v18, %v2531_v56 }
 0x266   : > { %v3514_v40 = vrot.slane %v3513_v14, 4  ;;  %v2721_v45 = vsel %vm2337_vm10, %v10326_v59, %v2529_v62  ;;  %v2570_v49 = vmul.f32 0.01, %v8733_v19  ;;  %v9109_v55 = vmul.f32 0.125, %v3512_v32  ;;  %v9116_v32 = vpop.f32.mrb[123].mxu0 }
 0x267   : > { %v4255_v54 = vmul.f32 0.125, %v3498_v37  ;;  %v3530_v1 = vrot.slane %v3529_v39, 2  ;;  %v3534_v16 = vsel %vm2812_vm3, %v2723_v13, 0.0  ;;  %v3520_v31 = vsel %vm2812_vm3, %v2721_v45, 0.0 }
 0x268   : > { %v3515_v24 = vadd.f32 %v3514_v40, %v3513_v14  ;;  %v3535_v4 = vrot.slane %v3534_v16, 4  ;;  %v2762_v6 = vsel %vm2378_vm13, %v8733_v19, %v2570_v49  ;;  %v3521_v47 = vrot.slane %v3520_v31, 4 }
 0x269   : > { %v4447_v52 = vpack.c.bf16 %v4255_v54, %v4255_v54  ;;  %v3531_v34 = vadd.f32 %v3530_v1, %v3529_v39  ;;  %v3807_v12 = vsel %vm2812_vm3, %v2762_v6, 0.0  ;;  %vm2376_vm14 = vcmp.ge.f32.partialorder %v8737_v23, 0.0 }
 0x26a   : > { %v3516_v21 = vrot.slane %v3515_v24, 2  ;;  %v3536_v29 = vadd.f32 %v3535_v4, %v3534_v16  ;;  %v3808_v17 = vrot.slane %v3807_v12, 4  ;;  %v3522_v18 = vadd.f32 %v3521_v47, %v3520_v31 }
 0x26b   : > { %v5371_v0 = vunpack.c.l.b16 %v4447_v52  ;;  %v3532_v25 = vrot.slane %v3531_v34, 1  ;;  %v2568_v56 = vmul.f32 0.01, %v8737_v23  ;;  %vm2379_vm0 = vcmp.ge.f32.partialorder %v8745_v22, 0.0  ;;  %v9127_v52 = vpop.f32.mrb[20].mxu1 }
 0x26c   : > { %v3517_v7 = vadd.f32 %v3516_v21, %v3515_v24  ;;  %v3537_v59 = vrot.slane %v3536_v29, 2  ;;  %v3809_v19 = vadd.f32 %v3808_v17, %v3807_v12  ;;  %v3523_v39 = vrot.slane %v3522_v18, 2 }
 0x26d   : > { %v5394_v62 = vsel %vm4597_vm12, %v5371_v0, %v5370_v11  ;;  %v3533_v37 = vadd.f32 %v3532_v25, %v3531_v34  ;;  %v2760_v14 = vsel %vm2376_vm14, %v8737_v23, %v2568_v56  ;;  %v2571_v24 = vmul.f32 0.01, %v8745_v22 }
 0x26e   : > { %v9123_v40 = vsel %vm4599_vm15, %v5372_v20, %v5394_v62  ;;  %v3518_v13 = vrot.slane %v3517_v7, 1  ;;  %v3538_v45 = vadd.f32 %v3537_v59, %v3536_v29  ;;  %v3810_v49 = vrot.slane %v3809_v19, 2 }
 0x26f   : > { %v4260_v54 = vmul.f32 0.125, %v3533_v37  ;;  %v3524_v1 = vadd.f32 %v3523_v39, %v3522_v18  ;;  %v3793_v16 = vsel %vm2812_vm3, %v2760_v14, 0.0  ;;  %v4449_v23 = vpack.c.bf16 %v9109_v55, %v9109_v55 }
 0x270   : > { %v3519_v4 = vadd.f32 %v3518_v13, %v3517_v7  ;;  %v3539_v31 = vrot.slane %v3538_v45, 1  ;;  %v3811_v6 = vadd.f32 %v3810_v49, %v3809_v19  ;;  %v3794_v11 = vrot.slane %v3793_v16, 4 }
 0x271   : > { %v3525_v20 = vrot.slane %v3524_v1, 1  ;;  %v2763_v34 = vsel %vm2379_vm0, %v8745_v22, %v2571_v24  ;;  %vm2377_vm2 = vcmp.ge.f32.partialorder %v8748_v30, 0.0  ;;  %v4452_v17 = vpack.c.bf16 %v4260_v54, %v4260_v54 }
 0x272   : > { %v4258_v47 = vmul.f32 0.125, %v3519_v4  ;;  %v3540_v12 = vadd.f32 %v3539_v31, %v3538_v45  ;;  %v3812_v21 = vrot.slane %v3811_v6, 1  ;;  %v3795_v29 = vadd.f32 %v3794_v11, %v3793_v16 }
 0x273   : > { %v3526_v0 = vadd.f32 %v3525_v20, %v3524_v1  ;;  %v3814_v25 = vsel %vm2812_vm3, %v2763_v34, 0.0  ;;  %v2569_v18 = vmul.f32 0.01, %v8748_v30  ;;  %v9140_v22 = vunpack.c.l.b16 %v4445_v35 }
 0x274   : > { %v4450_v56 = vpack.c.bf16 %v4258_v47, %v4258_v47  ;;  %v4261_v7 = vmul.f32 0.125, %v3540_v12  ;;  %v3813_v55 = vadd.f32 %v3812_v21, %v3811_v6  ;;  %v3796_v59 = vrot.slane %v3795_v29, 2  ;;  %v10327_v21 = vld [vmem:[#allocation9_spill] sm:$0xff] }
 0x275   : > { %v4259_v19 = vmul.f32 0.125, %v3526_v0  ;;  %v3815_v62 = vrot.slane %v3814_v25, 4  ;;  %v2761_v37 = vsel %vm2377_vm2, %v8748_v30, %v2569_v18  ;;  %vm2382_vm6 = vcmp.ge.f32.partialorder %v8754_v28, 0.0 }
 0x276   : > { %v4453_v39 = vpack.c.bf16 %v4261_v7, %v4261_v7  ;;  %v4300_v14 = vmul.f32 0.125, %v3813_v55  ;;  %v3797_v13 = vadd.f32 %v3796_v59, %v3795_v29  ;;  %v9146_v45 = vunpack.c.l.b16 %v4449_v23 }
 0x277   : > { %v3816_v49 = vadd.f32 %v3815_v62, %v3814_v25  ;;  %v3800_v54 = vsel %vm2812_vm3, %v2761_v37, 0.0  ;;  %v2574_v57 = vmul.f32 0.01, %v8754_v28  ;;  %v9150_v35 = vunpack.c.l.b16 %v4452_v17 }
 0x278   : > { %v9152_v1 = vunpack.c.l.b16 %v4450_v56  ;;  %v3798_v16 = vrot.slane %v3797_v13, 1  ;;  %v3801_v24 = vrot.slane %v3800_v54, 4  ;;  %v9154_v4 = vunpack.c.l.b16 %v4453_v39 }
 0x279   : > { %v4451_v30 = vpack.c.bf16 %v4259_v19, %v4259_v19  ;;  %v3817_v31 = vrot.slane %v3816_v49, 2  ;;  %v2766_v6 = vsel %vm2382_vm6, %v8754_v28, %v2574_v57  ;;  %v4492_v11 = vpack.c.bf16 %v4300_v14, %v4300_v14 }
 0x27a   : > { %v3802_v23 = vadd.f32 %v3801_v24, %v3800_v54  ;;  %v3835_v20 = vsel %vm2812_vm3, %v2766_v6, 0.0  ;;  %vm2342_vm7 = vcmp.ge.f32.partialorder %v8758_v15, 0.0  ;;  %v2534_v12 = vmul.f32 0.01, %v8758_v15 }
 0x27b   : > { %v3818_v34 = vadd.f32 %v3817_v31, %v3816_v49  ;;  %v3836_v47 = vrot.slane %v3835_v20, 4  ;;  %vm2380_vm9 = vcmp.ge.f32.partialorder %v10327_v21, 0.0  ;;  %v3799_v29 = vadd.f32 %v3798_v16, %v3797_v13 }
 0x27c   : > { %v3803_v17 = vrot.slane %v3802_v23, 2  ;;  %v2572_v0 = vmul.f32 0.01, %v10327_v21  ;;  %vm2340_vm10 = vcmp.ge.f32.partialorder %v8765_v27, 0.0  ;;  %v2726_v18 = vsel %vm2342_vm7, %v8758_v15, %v2534_v12 }
 0x27d   : > { %v3819_v25 = vrot.slane %v3818_v34, 1  ;;  %v3837_v28 = vadd.f32 %v3836_v47, %v3835_v20  ;;  %v2532_v56 = vmul.f32 0.01, %v8765_v27  ;;  %v9165_v7 = vunpack.c.l.b16 %v4451_v30  ;;  %v10328_v20 = vld [vmem:[#allocation11_spill] sm:$0xff] }
 0x27e   : > { %v3804_v55 = vadd.f32 %v3803_v17, %v3802_v23  ;;  %v3555_v59 = vsel %vm2812_vm3, %v2726_v18, 0.0  ;;  %v2764_v19 = vsel %vm2380_vm9, %v10327_v21, %v2572_v0  ;;  %v4298_v13 = vmul.f32 0.125, %v3799_v29 }
 0x27f   : > { %v3820_v62 = vadd.f32 %v3819_v25, %v3818_v34  ;;  %v3838_v37 = vrot.slane %v3837_v28, 2  ;;  %v3556_v39 = vrot.slane %v3555_v59, 4  ;;  %v3821_v14 = vsel %vm2812_vm3, %v2764_v19, 0.0  ;;  %v9178_v25 = vpop.f32.mrb[124].mxu0 }
 0x280   : > { %v3805_v49 = vrot.slane %v3804_v55, 1  ;;  %v3822_v54 = vrot.slane %v3821_v14, 4  ;;  %v2724_v15 = vsel %vm2340_vm10, %v8765_v27, %v2532_v56  ;;  %vm2383_vm13 = vcmp.ge.f32.partialorder %v10328_v20, 0.0 }
 0x281   : > { %v4301_v57 = vmul.f32 0.125, %v3820_v62  ;;  %v3839_v16 = vadd.f32 %v3838_v37, %v3837_v28  ;;  %v3557_v24 = vadd.f32 %v3556_v39, %v3555_v59  ;;  %v3541_v30 = vsel %vm2812_vm3, %v2724_v15, 0.0 }
 0x282   : > { %v3806_v31 = vadd.f32 %v3805_v49, %v3804_v55  ;;  %v3823_v6 = vadd.f32 %v3822_v54, %v3821_v14  ;;  %v3542_v23 = vrot.slane %v3541_v30, 4  ;;  %v9175_v34 = vunpack.c.l.b16 %v4492_v11 }
 0x283   : > { %v3840_v47 = vrot.slane %v3839_v16, 1  ;;  %v3558_v12 = vrot.slane %v3557_v24, 2  ;;  %v2575_v21 = vmul.f32 0.01, %v10328_v20  ;;  %v4490_v29 = vpack.c.bf16 %v4298_v13, %v4298_v13 }
 0x284   : > { %10329 = vst [vmem:[#allocation26_spill] sm:$0xff] %v9175_v34  ;;  %v4299_v17 = vmul.f32 0.125, %v3806_v31  ;;  %v3824_v0 = vrot.slane %v3823_v6, 2  ;;  %v3543_v27 = vadd.f32 %v3542_v23, %v3541_v30  ;;  %v4493_v28 = vpack.c.bf16 %v4301_v57, %v4301_v57 }
 0x285   : > { %v3841_v18 = vadd.f32 %v3840_v47, %v3839_v16  ;;  %v3559_v56 = vadd.f32 %v3558_v12, %v3557_v24  ;;  %v2767_v55 = vsel %vm2383_vm13, %v10328_v20, %v2575_v21  ;;  %vm2343_vm14 = vcmp.ge.f32.partialorder %v8773_v5, 0.0 }
 0x286   : > { %v3825_v59 = vadd.f32 %v3824_v0, %v3823_v6  ;;  %v3544_v19 = vrot.slane %v3543_v27, 2  ;;  %v3842_v11 = vsel %vm2812_vm3, %v2767_v55, 0.0  ;;  %v2535_v14 = vmul.f32 0.01, %v8773_v5 }
 0x287   : > { %v4304_v62 = vmul.f32 0.125, %v3841_v18  ;;  %v3560_v37 = vrot.slane %v3559_v56, 1  ;;  %v3843_v39 = vrot.slane %v3842_v11, 4  ;;  %v9184_v13 = vunpack.c.l.b16 %v4490_v29 }
 0x288   : > { %v4491_v49 = vpack.c.bf16 %v4299_v17, %v4299_v17  ;;  %v3826_v54 = vrot.slane %v3825_v59, 1  ;;  %v3545_v15 = vadd.f32 %v3544_v19, %v3543_v27  ;;  %v2727_v24 = vsel %vm2343_vm14, %v8773_v5, %v2535_v14  ;;  %v9195_v5 = vpop.f32.mrb[21].mxu1 }
 0x289   : > { %10330 = vst [vmem:[#allocation12_spill] sm:$0xff] %v9184_v13  ;;  %v3561_v57 = vadd.f32 %v3560_v37, %v3559_v56  ;;  %v3844_v16 = vadd.f32 %v3843_v39, %v3842_v11  ;;  %vm2381_vm0 = vcmp.ge.f32.partialorder %v8782_v10, 0.0  ;;  %v3562_v6 = vsel %vm2812_vm3, %v2727_v24, 0.0  ;;  %v9205_v37 = vpop.f32.mrb[125].mxu0 }
 0x28a   : > { %v3827_v30 = vadd.f32 %v3826_v54, %v3825_v59  ;;  %v3546_v31 = vrot.slane %v3545_v15, 1  ;;  %v2573_v23 = vmul.f32 0.01, %v8782_v10  ;;  %v9190_v20 = vunpack.c.l.b16 %v4493_v28 }
 0x28b   : > { %v4496_v47 = vpack.c.bf16 %v4304_v62, %v4304_v62  ;;  %v3845_v12 = vrot.slane %v3844_v16, 2  ;;  %v3563_v21 = vrot.slane %v3562_v6, 4  ;;  %v9192_v29 = vmul.f32 0.125, %v3561_v57  ;;  %v7572_v62 = vld [vmem:[%s10178_s3 + $0x18] sm:$0xff]   ;;  %v9211_v57 = vpop.f32.mrb[126].mxu0 }
 0x28c   : > { %10331 = vst [vmem:[#allocation7_spill] sm:$0xff] %v9190_v20  ;;  %v4302_v17 = vmul.f32 0.125, %v3827_v30  ;;  %v3547_v0 = vadd.f32 %v3546_v31, %v3545_v15  ;;  %v2765_v27 = vsel %vm2381_vm0, %v8782_v10, %v2573_v23  ;;  %vm2341_vm2 = vcmp.ge.f32.partialorder %v8786_v61, 0.0  ;;  %v9207_v10 = vpop.f32.mrb[22].mxu1  ;;  %v9221_v31 = vpop.f32.mrb[127].mxu0 }
 0x28d   : > { %v3846_v18 = vadd.f32 %v3845_v12, %v3844_v16  ;;  %v3564_v56 = vadd.f32 %v3563_v21, %v3562_v6  ;;  %v3828_v55 = vsel %vm2812_vm3, %v2765_v27, 0.0  ;;  %v9199_v59 = vunpack.c.l.b16 %v4491_v49  ;;  %v9213_v49 = vpop.f32.mrb[23].mxu1 }
 0x28e   : > { %v4494_v28 = vpack.c.bf16 %v4302_v17, %v4302_v17  ;;  %v3829_v19 = vrot.slane %v3828_v55, 4  ;;  %v2533_v11 = vmul.f32 0.01, %v8786_v61  ;;  %v9209_v39 = vunpack.c.l.b16 %v4496_v47  ;;  %v9223_v6 = vpop.f32.mrb[24].mxu1 }
 0x28f   : > { %10332 = vst [vmem:[#allocation13_spill] sm:$0xff] %v9199_v59  ;;  %v4262_v14 = vmul.f32 0.125, %v3547_v0  ;;  %v3847_v54 = vrot.slane %v3846_v18, 1  ;;  %v3565_v15 = vrot.slane %v3564_v56, 2  ;;  %vm2386_vm6 = vcmp.ge.f32.partialorder %v8812_v63, 0.0  ;;  %v9227_v17 = vpop.f32.mrb[25].mxu1 }
 0x290   : > { %v3830_v24 = vadd.f32 %v3829_v19, %v3828_v55  ;;  %v2725_v30 = vsel %vm2341_vm2, %v8786_v61, %v2533_v11  ;;  %v2578_v21 = vmul.f32 0.01, %v8812_v63  ;;  %v9229_v0 = vunpack.c.l.b16 %v4494_v28  ;;  %v9232_v19 = vpop.f32.mrb[26].mxu1 }
 0x291   : > { %v3848_v23 = vadd.f32 %v3847_v54, %v3846_v18  ;;  %v3566_v47 = vadd.f32 %v3565_v15, %v3564_v56  ;;  %v3548_v12 = vsel %vm2812_vm3, %v2725_v30, 0.0  ;;  %v5228_v61 = vand.u32 %v7572_v62, %v7996_v9  ;;  %v9236_v18 = vpop.f32.mrb[27].mxu1 }
 0x292   : > { %v3831_v27 = vrot.slane %v3830_v24, 2  ;;  %v3549_v55 = vrot.slane %v3548_v12, 4  ;;  %v4454_v11 = vpack.c.bf16 %v4262_v14, %v4262_v14  ;;  %v2770_v20 = vsel %vm2386_vm6, %v8812_v63, %v2578_v21  ;;  %10333 = vst [vmem:[#allocation10_spill] sm:$0xff] %v9236_v18  ;;  %v9243_v14 = vpop.f32.mrb[28].mxu1 }
 0x293   : > { %v3567_v16 = vrot.slane %v3566_v47, 1  ;;  %vm2384_vm7 = vcmp.ge.f32.partialorder %v8834_v60, 0.0  ;;  %v3863_v15 = vsel %vm2812_vm3, %v2770_v20, 0.0  ;;  %7304 = vmatprep.subr.bf16.mxu1 %v5228_v61  ;;  %v2576_v28 = vmul.f32 0.01, %v8834_v60  ;;  %10334 = vst [vmem:[#allocation9_spill] sm:$0xff] %v9243_v14 }
 0x294   : > { %v3832_v56 = vadd.f32 %v3831_v27, %v3830_v24  ;;  %v3550_v54 = vadd.f32 %v3549_v55, %v3548_v12  ;;  %v9240_v30 = vmul.f32 0.125, %v3848_v23  ;;  %v3864_v34 = vrot.slane %v3863_v15, 4  ;;  %7305 = vmatpush3.bf16.msra.mxu1 %v5228_v61  ;;  %v9247_v12 = vpop.f32.mrb[128].mxu0 }
 0x295   : > { %v3568_v62 = vadd.f32 %v3567_v16, %v3566_v47  ;;  %vm2387_vm9 = vcmp.ge.f32.partialorder %v8837_v36, 0.0  ;;  %v2768_v59 = vsel %vm2384_vm7, %v8834_v60, %v2576_v28  ;;  %v2579_v24 = vmul.f32 0.01, %v8837_v36  ;;  %10335 = vst [vmem:[#allocation11_spill] sm:$0xff] %v9247_v12 }
 0x296   : > { %v3833_v63 = vrot.slane %v3832_v56, 1  ;;  %v3551_v21 = vrot.slane %v3550_v54, 2  ;;  %v5378_v20 = vunpack.c.l.b16 %v4454_v11  ;;  %v3865_v23 = vadd.f32 %v3864_v34, %v3863_v15 }
 0x297   : > { %v9249_v27 = vmul.f32 0.125, %v3568_v62  ;;  %v3849_v16 = vsel %vm2812_vm3, %v2768_v59, 0.0  ;;  %v2771_v13 = vsel %vm2387_vm9, %v8837_v36, %v2579_v24  ;;  %v4497_v14 = vpack.c.bf16 %v9240_v30, %v9240_v30 }
 0x298   : > { %v3834_v47 = vadd.f32 %v3833_v63, %v3832_v56  ;;  %v3552_v55 = vadd.f32 %v3551_v21, %v3550_v54  ;;  %v3850_v61 = vrot.slane %v3849_v16, 4  ;;  %v3866_v18 = vrot.slane %v3865_v23, 2 }
 0x299   : > { %v3870_v60 = vsel %vm2812_vm3, %v2771_v13, 0.0  ;;  %vm2385_vm10 = vcmp.ge.f32.partialorder %v8841_v2, 0.0  ;;  %v4457_v34 = vpack.c.bf16 %v9249_v27, %v9249_v27  ;;  %v2577_v56 = vmul.f32 0.01, %v8841_v2 }
 0x29a   : > { %v4303_v28 = vmul.f32 0.125, %v3834_v47  ;;  %v3553_v11 = vrot.slane %v3552_v55, 1  ;;  %v3851_v62 = vadd.f32 %v3850_v61, %v3849_v16  ;;  %v3871_v12 = vrot.slane %v3870_v60, 4  ;;  %v9266_v47 = vpop.f32.mrb[29].mxu1 }
 0x29b   : > { %v3867_v59 = vadd.f32 %v3866_v18, %v3865_v23  ;;  %vm2390_vm13 = vcmp.ge.f32.partialorder %v8846_v58, 0.0  ;;  %v2769_v13 = vsel %vm2385_vm10, %v8841_v2, %v2577_v56  ;;  %v2582_v21 = vmul.f32 0.01, %v8846_v58 }
 0x29c   : > { %v4495_v36 = vpack.c.bf16 %v4303_v28, %v4303_v28  ;;  %v3554_v54 = vadd.f32 %v3553_v11, %v3552_v55  ;;  %v3852_v15 = vrot.slane %v3851_v62, 2  ;;  %v3872_v30 = vadd.f32 %v3871_v12, %v3870_v60  ;;  %v9274_v60 = vpop.f32.mrb[129].mxu0 }
 0x29d   : > { %v3868_v63 = vrot.slane %v3867_v59, 1  ;;  %v5212_v24 = vsel %vm4607_vm1, %v9079_v44, %v9072_v46  ;;  %v3856_v55 = vsel %vm2812_vm3, %v2769_v13, 0.0  ;;  %v2774_v12 = vsel %vm2390_vm13, %v8846_v58, %v2582_v21 }
 0x29e   : > { %v5745_v16 = vunpack.c.l.b16 %v4495_v36  ;;  %v4263_v27 = vmul.f32 0.125, %v3554_v54  ;;  %v3853_v18 = vadd.f32 %v3852_v15, %v3851_v62  ;;  %v3873_v23 = vrot.slane %v3872_v30, 2 }
 0x29f   : > { %v3869_v61 = vadd.f32 %v3868_v63, %v3867_v59  ;;  %v5213_v2 = vsel %vm4609_vm4, %v9140_v22, %v5212_v24  ;;  %v3857_v56 = vrot.slane %v3856_v55, 4  ;;  %v3891_v36 = vsel %vm2812_vm3, %v2774_v12, 0.0 }
 0x2a0   : > { %v5768_v46 = vsel %vm4597_vm12, %v5745_v16, %v9229_v0  ;;  %v4455_v44 = vpack.c.bf16 %v4263_v27, %v4263_v27  ;;  %v3854_v28 = vrot.slane %v3853_v18, 1  ;;  %v3874_v11 = vadd.f32 %v3873_v23, %v3872_v30  ;;  %v9290_v27 = vpop.f32.mrb[30].mxu1 }
 0x2a1   : > { %v9280_v62 = vsel %vm4599_vm15, %v9209_v39, %v5768_v46  ;;  %v4308_v59 = vmul.f32 0.125, %v3869_v61  ;;  %v3892_v22 = vrot.slane %v3891_v36, 4  ;;  %v10337_v63 = vpack.c.bf16 %v9192_v29, %v9192_v29 }
 0x2a2   : > { %10336 = vst [vmem:[#allocation27_spill] sm:$0xff] %v9280_v62  ;;  %v5379_v58 = vunpack.c.l.b16 %v4455_v44  ;;  %v3855_v54 = vadd.f32 %v3854_v28, %v3853_v18  ;;  %v3875_v15 = vrot.slane %v3874_v11, 1  ;;  %v3858_v21 = vadd.f32 %v3857_v56, %v3856_v55  ;;  %v9300_v55 = vpop.f32.mrb[130].mxu0 }
 0x2a3   : > { %v5380_v13 = vunpack.c.l.b16 %v10337_v63  ;;  %v4500_v0 = vpack.c.bf16 %v4308_v59, %v4308_v59  ;;  %v9286_v24 = vpack.c.b16 %v5213_v2, %v5213_v2  ;;  %v3893_v16 = vadd.f32 %v3892_v22, %v3891_v36  ;;  %v10340_v63 = vld [vmem:[#allocation14_spill] sm:$0xff] }
 0x2a4   : > { %v5401_v30 = vsel %vm4597_vm12, %v5379_v58, %v5378_v20  ;;  %v4306_v39 = vmul.f32 0.125, %v3855_v54  ;;  %vm2346_vm14 = vcmp.ge.f32.partialorder %v8890_v50, 0.0  ;;  %v9292_v23 = vunpack.c.l.b16 %v4497_v14 }
 0x2a5   : > { %v9295_v18 = vsel %vm4599_vm15, %v5380_v13, %v5401_v30  ;;  %v3859_v61 = vrot.slane %v3858_v21, 2  ;;  %7307 = vmatmul.mubr.msk.bf16.vlgmr.msra.gmra.mrb[76].mxu1 %vm2812_vm3, %v9286_v24  ;;  %v2538_v29 = vmul.f32 0.01, %v8890_v50  ;;  %v9302_v20 = vunpack.c.l.b16 %v4457_v34  ;;  %v9318_v30 = vpop.f32.mrb[31].mxu1 }
 0x2a6   : > { %10338 = vst [vmem:[#allocation28_spill] sm:$0xff] %v9292_v23  ;;  %v3876_v12 = vadd.f32 %v3875_v15, %v3874_v11  ;;  %v3894_v2 = vrot.slane %v3893_v16, 2  ;;  %vm2388_vm0 = vcmp.ge.f32.partialorder %v8892_v51, 0.0  ;;  %7312 = vmatprep.mubr.msk.bf16.mxu1 %vm2812_vm3, %v9085_v53  ;;  %v9307_v14 = vunpack.c.l.b16 %v4500_v0 }
 0x2a7   : > { %v3860_v46 = vadd.f32 %v3859_v61, %v3858_v21  ;;  %v2730_v44 = vsel %vm2346_vm14, %v8890_v50, %v2538_v29  ;;  %v2580_v28 = vmul.f32 0.01, %v8892_v51  ;;  %v4498_v59 = vpack.c.bf16 %v4306_v39, %v4306_v39  ;;  %v10341_v61 = vld [vmem:[#allocation15_spill] sm:$0xff]  ;;  %v9323_v29 = vpop.f32.mrb[131].mxu0 }
 0x2a8   : > { %10339 = vst [vmem:[#allocation29_spill] sm:$0xff] %v9307_v14  ;;  %v3895_v56 = vadd.f32 %v3894_v2, %v3893_v16  ;;  %v3583_v36 = vsel %vm2812_vm3, %v2730_v44, 0.0  ;;  %vm2344_vm2 = vcmp.ge.f32.partialorder %v8896_v8, 0.0  ;;  %v2536_v54 = vmul.f32 0.01, %v8896_v8  ;;  %10342 = vst [vmem:[#allocation14_spill] sm:$0xff] %v9323_v29 }
 0x2a9   : > { %v3861_v34 = vrot.slane %v3860_v46, 1  ;;  %v3584_v11 = vrot.slane %v3583_v36, 4  ;;  %v2772_v58 = vsel %vm2388_vm0, %v8892_v51, %v2580_v28  ;;  %v4309_v53 = vmul.f32 0.125, %v3876_v12 }
 0x2aa   : > { %v3896_v15 = vrot.slane %v3895_v56, 1  ;;  %v3877_v22 = vsel %vm2812_vm3, %v2772_v58, 0.0  ;;  %vm2391_vm6 = vcmp.ge.f32.partialorder %v10340_v63, 0.0  ;;  %v2728_v21 = vsel %vm2344_vm2, %v8896_v8, %v2536_v54  ;;  %v10344_v54 = vld [vmem:[#allocation17_spill] sm:$0xff] }
 0x2ab   : > { %v3862_v50 = vadd.f32 %v3861_v34, %v3860_v46  ;;  %v3585_v13 = vadd.f32 %v3584_v11, %v3583_v36  ;;  %v3878_v0 = vrot.slane %v3877_v22, 4  ;;  %v3569_v16 = vsel %vm2812_vm3, %v2728_v21, 0.0 }
 0x2ac   : > { %v3897_v39 = vadd.f32 %v3896_v15, %v3895_v56  ;;  %v2583_v51 = vmul.f32 0.01, %v10340_v63  ;;  %vm2347_vm7 = vcmp.ge.f32.partialorder %v10341_v61, 0.0  ;;  %v3570_v28 = vrot.slane %v3569_v16, 4  ;;  %v9332_v15 = vpop.f32.mrb[32].mxu1 }
 0x2ad   : > { %v4307_v12 = vmul.f32 0.125, %v3862_v50  ;;  %v3586_v2 = vrot.slane %v3585_v13, 2  ;;  %v3879_v44 = vadd.f32 %v3878_v0, %v3877_v22  ;;  %v9325_v46 = vunpack.c.l.b16 %v4498_v59  ;;  %10345 = vst [vmem:[#allocation17_spill] sm:$0xff] %v9332_v15 }
 0x2ae   : > { %v4312_v36 = vmul.f32 0.125, %v3897_v39  ;;  %v2775_v8 = vsel %vm2391_vm6, %v10340_v63, %v2583_v51  ;;  %v2539_v56 = vmul.f32 0.01, %v10341_v61  ;;  %v3571_v58 = vadd.f32 %v3570_v28, %v3569_v16 }
 0x2af   : > { %10343 = vst [vmem:[#allocation15_spill] sm:$0xff] %v9325_v46  ;;  %v3587_v34 = vadd.f32 %v3586_v2, %v3585_v13  ;;  %v3880_v11 = vrot.slane %v3879_v44, 2  ;;  %vm2389_vm9 = vcmp.ge.f32.partialorder %v10344_v54, 0.0  ;;  %v4501_v50 = vpack.c.bf16 %v4309_v53, %v4309_v53 }
 0x2b0   : > { %v3898_v22 = vsel %vm2812_vm3, %v2775_v8, 0.0  ;;  %v2731_v59 = vsel %vm2347_vm7, %v10341_v61, %v2539_v56  ;;  %v2581_v0 = vmul.f32 0.01, %v10344_v54  ;;  %v4499_v21 = vpack.c.bf16 %v4307_v12, %v4307_v12 }
 0x2b1   : > { %v3588_v63 = vrot.slane %v3587_v34, 1  ;;  %v3881_v39 = vadd.f32 %v3880_v11, %v3879_v44  ;;  %v3572_v51 = vrot.slane %v3571_v58, 2  ;;  %v4504_v13 = vpack.c.bf16 %v4312_v36, %v4312_v36 }
 0x2b2   : > { %v3899_v2 = vrot.slane %v3898_v22, 4  ;;  %v3590_v16 = vsel %vm2812_vm3, %v2731_v59, 0.0  ;;  %v2773_v28 = vsel %vm2389_vm9, %v10344_v54, %v2581_v0  ;;  %vm2345_vm10 = vcmp.ge.f32.partialorder %v8944_v3, 0.0 }
 0x2b3   : > { %v3589_v14 = vadd.f32 %v3588_v63, %v3587_v34  ;;  %v3882_v53 = vrot.slane %v3881_v39, 1  ;;  %v3573_v46 = vadd.f32 %v3572_v51, %v3571_v58  ;;  %v3591_v8 = vrot.slane %v3590_v16, 4 }
 0x2b4   : > { %v3900_v23 = vadd.f32 %v3899_v2, %v3898_v22  ;;  %v3884_v62 = vsel %vm2812_vm3, %v2773_v28, 0.0  ;;  %v2537_v61 = vmul.f32 0.01, %v8944_v3  ;;  %v9344_v11 = vunpack.c.l.b16 %v4501_v50  ;;  %v10347_v22 = vld [vmem:[#allocation18_spill] sm:$0xff] }
 0x2b5   : > { %v4268_v12 = vmul.f32 0.125, %v3589_v14  ;;  %v3883_v44 = vadd.f32 %v3882_v53, %v3881_v39  ;;  %v3574_v56 = vrot.slane %v3573_v46, 1  ;;  %v3592_v36 = vadd.f32 %v3591_v8, %v3590_v16  ;;  %v9357_v53 = vpop.f32.mrb[33].mxu1 }
 0x2b6   : > { %10346 = vst [vmem:[#allocation30_spill] sm:$0xff] %v9344_v11  ;;  %v3901_v59 = vrot.slane %v3900_v23, 2  ;;  %v3885_v15 = vrot.slane %v3884_v62, 4  ;;  %v2729_v34 = vsel %vm2345_vm10, %v8944_v3, %v2537_v61  ;;  %vm2394_vm13 = vcmp.ge.f32.partialorder %v10347_v22, 0.0  ;;  %v7573_v3 = vld [vmem:[%s10180_s5 + $0x18] sm:$0xff]   ;;  %10349 = vst [vmem:[#allocation31_spill] sm:$0xff] %v9357_v53 }
 0x2b7   : > { %v4460_v54 = vpack.c.bf16 %v4268_v12, %v4268_v12  ;;  %v4310_v58 = vmul.f32 0.125, %v3883_v44  ;;  %v3593_v0 = vrot.slane %v3592_v36, 2  ;;  %v3576_v2 = vsel %vm2812_vm3, %v2729_v34, 0.0 }
 0x2b8   : > { %v3902_v63 = vadd.f32 %v3901_v59, %v3900_v23  ;;  %v3886_v51 = vadd.f32 %v3885_v15, %v3884_v62  ;;  %v2586_v14 = vmul.f32 0.01, %v10347_v22  ;;  %v9350_v39 = vunpack.c.l.b16 %v4499_v21  ;;  %v9360_v15 = vpop.f32.mrb[34].mxu1 }
 0x2b9   : > { %v9352_v16 = vunpack.c.l.b16 %v4504_v13  ;;  %v3575_v50 = vadd.f32 %v3574_v56, %v3573_v46  ;;  %v3594_v28 = vadd.f32 %v3593_v0, %v3592_v36  ;;  %v3577_v23 = vrot.slane %v3576_v2, 4  ;;  %10350 = vst [vmem:[#allocation32_spill] sm:$0xff] %v9360_v15  ;;  %v9365_v44 = vpop.f32.mrb[35].mxu1 }
 0x2ba   : > { %10348 = vst [vmem:[#allocation18_spill] sm:$0xff] %v9350_v39  ;;  %v3903_v8 = vrot.slane %v3902_v63, 1  ;;  %v3887_v61 = vrot.slane %v3886_v51, 2  ;;  %v2778_v62 = vsel %vm2394_vm13, %v10347_v22, %v2586_v14  ;;  %v9362_v12 = vunpack.c.l.b16 %v4460_v54  ;;  %10351 = vst [vmem:[#allocation33_spill] sm:$0xff] %v9365_v44  ;;  %v9367_v0 = vpop.f32.mrb[36].mxu1  ;;  %v10354_v14 = vld [vmem:[#allocation19_spill] sm:$0xff] }
 0x2bb   : > { %v4502_v21 = vpack.c.bf16 %v4310_v58, %v4310_v58  ;;  %v3595_v13 = vrot.slane %v3594_v28, 1  ;;  %v3919_v46 = vsel %vm2812_vm3, %v2778_v62, 0.0  ;;  %v3578_v59 = vadd.f32 %v3577_v23, %v3576_v2  ;;  %10352 = vst [vmem:[#allocation34_spill] sm:$0xff] %v9367_v0  ;;  %v10356_v0 = vld [vmem:[#allocation21_spill] sm:$0xff] }
 0x2bc   : > { %v3904_v56 = vadd.f32 %v3903_v8, %v3902_v63  ;;  %v3888_v36 = vadd.f32 %v3887_v61, %v3886_v51  ;;  %v3920_v34 = vrot.slane %v3919_v46, 4  ;;  %v4266_v11 = vmul.f32 0.125, %v3575_v50  ;;  %v10355_v51 = vld [vmem:[#allocation20_spill] sm:$0xff] }
 0x2bd   : > { %v3596_v39 = vadd.f32 %v3595_v13, %v3594_v28  ;;  %v9370_v22 = vand.u32 %v7573_v3, %v7996_v9  ;;  %vm2392_vm14 = vcmp.ge.f32.partialorder %v10354_v14, 0.0  ;;  %v3579_v15 = vrot.slane %v3578_v59, 2 }
 0x2be   : > { %v4313_v54 = vmul.f32 0.125, %v3904_v56  ;;  %v3889_v58 = vrot.slane %v3888_v36, 1  ;;  %v3921_v53 = vadd.f32 %v3920_v34, %v3919_v46  ;;  %v2584_v63 = vmul.f32 0.01, %v10354_v14 }
 0x2bf   : > { %10353 = vst [vmem:[#allocation35_spill] sm:$0xff] %v9370_v22  ;;  %v4269_v62 = vmul.f32 0.125, %v3596_v39  ;;  %7310 = vmatprep.subr.bf16.mxu1 %v9370_v22  ;;  %vm2395_vm0 = vcmp.ge.f32.partialorder %v10355_v51, 0.0  ;;  %v2587_v2 = vmul.f32 0.01, %v10355_v51  ;;  %v5752_v50 = vunpack.c.l.b16 %v4502_v21 }
 0x2c0   : > { %v3890_v28 = vadd.f32 %v3889_v58, %v3888_v36  ;;  %v3580_v8 = vadd.f32 %v3579_v15, %v3578_v59  ;;  %v3922_v3 = vrot.slane %v3921_v53, 2  ;;  %7311 = vmatpush3.bf16.msra.mxu1 %v9370_v22  ;;  %v4458_v61 = vpack.c.bf16 %v4266_v11, %v4266_v11 }
 0x2c1   : > { %v4505_v23 = vpack.c.bf16 %v4313_v54, %v4313_v54  ;;  %v2776_v39 = vsel %vm2392_vm14, %v10354_v14, %v2584_v63  ;;  %v2779_v13 = vsel %vm2395_vm0, %v10355_v51, %v2587_v2  ;;  %vm2393_vm2 = vcmp.ge.f32.partialorder %v10356_v0, 0.0 }
 0x2c2   : > { %v4311_v46 = vmul.f32 0.125, %v3890_v28  ;;  %v3581_v56 = vrot.slane %v3580_v8, 1  ;;  %v3923_v34 = vadd.f32 %v3922_v3, %v3921_v53  ;;  %v4461_v44 = vpack.c.bf16 %v4269_v62, %v4269_v62  ;;  %v10357_v53 = vld [vmem:[#allocation22_spill] sm:$0xff] }
 0x2c3   : > { %v3905_v21 = vsel %vm2812_vm3, %v2776_v39, 0.0  ;;  %v3926_v15 = vsel %vm2812_vm3, %v2779_v13, 0.0  ;;  %v2585_v36 = vmul.f32 0.01, %v10356_v0  ;;  %7313 = vmatmul.mubr.msk.bf16.vlgmr.msra.gmra.mrb[80].mxu1 %vm2812_vm3, %v9286_v24  ;;  %vm2350_vm6 = vcmp.ge.f32.partialorder %v10357_v53, 0.0 }
 0x2c4   : > { %v4503_v11 = vpack.c.bf16 %v4311_v46, %v4311_v46  ;;  %v3582_v59 = vadd.f32 %v3581_v56, %v3580_v8  ;;  %v3924_v14 = vrot.slane %v3923_v34, 1  ;;  %v3906_v54 = vrot.slane %v3905_v21, 4 }
 0x2c5   : > { %v3927_v58 = vrot.slane %v3926_v15, 4  ;;  %v2777_v63 = vsel %vm2393_vm2, %v10356_v0, %v2585_v36  ;;  %v2542_v62 = vmul.f32 0.01, %v10357_v53  ;;  %v9391_v51 = vunpack.c.l.b16 %v4458_v61 }
 0x2c6   : > { %v5753_v2 = vunpack.c.l.b16 %v4503_v11  ;;  %v4267_v28 = vmul.f32 0.125, %v3582_v59  ;;  %v3907_v3 = vadd.f32 %v3906_v54, %v3905_v21  ;;  %v9393_v39 = vunpack.c.l.b16 %v4505_v23 }
 0x2c7   : > { %v3928_v13 = vadd.f32 %v3927_v58, %v3926_v15  ;;  %v3912_v24 = vsel %vm2812_vm3, %v2777_v63, 0.0  ;;  %v2734_v8 = vsel %vm2350_vm6, %v10357_v53, %v2542_v62  ;;  %v9397_v46 = vunpack.c.l.b16 %v4461_v44  ;;  %v10360_v58 = vld [vmem:[#allocation23_spill] sm:$0xff] }
 0x2c8   : > { %10358 = vst [vmem:[#allocation19_spill] sm:$0xff] %v9393_v39  ;;  %v5775_v0 = vsel %vm4597_vm12, %v5753_v2, %v5752_v50  ;;  %v3925_v56 = vadd.f32 %v3924_v14, %v3923_v34  ;;  %v3908_v36 = vrot.slane %v3907_v3, 2  ;;  %v3913_v59 = vrot.slane %v3912_v24, 4  ;;  %v10361_v50 = vld [vmem:[#allocation24_spill] sm:$0xff]  ;;  %v9409_v2 = vpop.f32.mrb[132].mxu0 }
 0x2c9   : > { %v9402_v61 = vsel %vm4599_vm15, %v9352_v16, %v5775_v0  ;;  %v3929_v11 = vrot.slane %v3928_v13, 2  ;;  %v3611_v23 = vsel %vm2812_vm3, %v2734_v8, 0.0  ;;  %v4459_v21 = vpack.c.bf16 %v4267_v28, %v4267_v28  ;;  %10362 = vst [vmem:[#allocation21_spill] sm:$0xff] %v9409_v2  ;;  %v9411_v0 = vpop.f32.mrb[37].mxu1 }
 0x2ca   : > { %10359 = vst [vmem:[#allocation20_spill] sm:$0xff] %v9402_v61  ;;  %v3909_v15 = vadd.f32 %v3908_v36, %v3907_v3  ;;  %v3612_v54 = vrot.slane %v3611_v23, 4  ;;  %vm2348_vm7 = vcmp.ge.f32.partialorder %v10360_v58, 0.0  ;;  %v3914_v44 = vadd.f32 %v3913_v59, %v3912_v24  ;;  %10363 = vst [vmem:[#allocation22_spill] sm:$0xff] %v9411_v0  ;;  %v10364_v36 = vld [vmem:[#allocation25_spill] sm:$0xff]  ;;  %v9417_v24 = vpop.f32.mrb[38].mxu1 }
 0x2cb   : > { %v3930_v63 = vadd.f32 %v3929_v11, %v3928_v13  ;;  %v2540_v53 = vmul.f32 0.01, %v10360_v58  ;;  %vm2351_vm9 = vcmp.ge.f32.partialorder %v10361_v50, 0.0  ;;  %v4316_v34 = vmul.f32 0.125, %v3925_v56  ;;  %v9415_v13 = vpop.f32.mrb[133].mxu0  ;;  %10366 = vst [vmem:[#allocation24_spill] sm:$0xff] %v9417_v24 }
 0x2cc   : > { %v3910_v14 = vrot.slane %v3909_v15, 1  ;;  %v3613_v62 = vadd.f32 %v3612_v54, %v3611_v23  ;;  %v2543_v16 = vmul.f32 0.01, %v10361_v50  ;;  %v3915_v3 = vrot.slane %v3914_v44, 2  ;;  %10365 = vst [vmem:[#allocation23_spill] sm:$0xff] %v9415_v13  ;;  %v9423_v54 = vpop.f32.mrb[134].mxu0 }
 0x2cd   : > { %v3931_v28 = vrot.slane %v3930_v63, 1  ;;  %v2732_v8 = vsel %vm2348_vm7, %v10360_v58, %v2540_v53  ;;  %vm2349_vm10 = vcmp.ge.f32.partialorder %v10364_v36, 0.0  ;;  %v2541_v24 = vmul.f32 0.01, %v10364_v36 }
 0x2ce   : > { %v3911_v11 = vadd.f32 %v3910_v14, %v3909_v15  ;;  %v3614_v56 = vrot.slane %v3613_v62, 2  ;;  %v3597_v59 = vsel %vm2812_vm3, %v2732_v8, 0.0  ;;  %v2735_v23 = vsel %vm2351_vm9, %v10361_v50, %v2543_v16 }
 0x2cf   : > { %v3932_v22 = vadd.f32 %v3931_v28, %v3930_v63  ;;  %v3916_v39 = vadd.f32 %v3915_v3, %v3914_v44  ;;  %v3598_v61 = vrot.slane %v3597_v59, 4  ;;  %v3618_v58 = vsel %vm2812_vm3, %v2735_v23, 0.0  ;;  %v9432_v44 = vpop.f32.mrb[39].mxu1 }
 0x2d0   : > { %v4314_v53 = vmul.f32 0.125, %v3911_v11  ;;  %v3615_v0 = vadd.f32 %v3614_v56, %v3613_v62  ;;  %v3619_v13 = vrot.slane %v3618_v58, 4  ;;  %v4508_v15 = vpack.c.bf16 %v4316_v34, %v4316_v34 }
 0x2d1   : > { %v4317_v14 = vmul.f32 0.125, %v3932_v22  ;;  %v3917_v2 = vrot.slane %v3916_v39, 1  ;;  %v3599_v8 = vadd.f32 %v3598_v61, %v3597_v59  ;;  %v9427_v9 = vunpack.c.l.b16 %v4459_v21 }
 0x2d2   : > { %v3616_v29 = vrot.slane %v3615_v0, 1  ;;  %v3620_v50 = vadd.f32 %v3619_v13, %v3618_v58  ;;  %v2733_v63 = vsel %vm2349_vm10, %v10364_v36, %v2541_v24  ;;  %v4506_v16 = vpack.c.bf16 %v4314_v53, %v4314_v53 }
 0x2d3   : > { %v3600_v28 = vrot.slane %v3599_v8, 2  ;;  %v3604_v62 = vsel %vm2812_vm3, %v2733_v63, 0.0  ;;  %vm2354_vm13 = vcmp.ge.f32.partialorder %v9035_v33, 0.0  ;;  %v4509_v34 = vpack.c.bf16 %v4317_v14, %v4317_v14 }
 0x2d4   : > { %v3617_v22 = vadd.f32 %v3616_v29, %v3615_v0  ;;  %v3621_v3 = vrot.slane %v3620_v50, 2  ;;  %v3605_v61 = vrot.slane %v3604_v62, 4  ;;  %v9436_v21 = vunpack.c.l.b16 %v4508_v15 }
 0x2d5   : > { %v3918_v11 = vadd.f32 %v3917_v2, %v3916_v39  ;;  %v3601_v13 = vadd.f32 %v3600_v28, %v3599_v8  ;;  %v2546_v56 = vmul.f32 0.01, %v9035_v33  ;;  %vm2352_vm14 = vcmp.ge.f32.partialorder %v9040_v41, 0.0  ;;  %v9447_v2 = vpop.f32.mrb[135].mxu0 }
 0x2d6   : > { %10367 = vst [vmem:[#allocation25_spill] sm:$0xff] %v9436_v21  ;;  %v4272_v59 = vmul.f32 0.125, %v3617_v22  ;;  %v3622_v36 = vadd.f32 %v3621_v3, %v3620_v50  ;;  %v3606_v24 = vadd.f32 %v3605_v61, %v3604_v62  ;;  %v9440_v23 = vunpack.c.l.b16 %v4506_v16 }
 0x2d7   : > { %v3602_v58 = vrot.slane %v3601_v13, 1  ;;  %v2738_v53 = vsel %vm2354_vm13, %v9035_v33, %v2546_v56  ;;  %v2544_v29 = vmul.f32 0.01, %v9040_v41  ;;  %v9444_v0 = vunpack.c.l.b16 %v4509_v34  ;;  %v9454_v56 = vpop.f32.mrb[40].mxu1 }
 0x2d8   : > { %10368 = vst [vmem:[#allocation36_spill] sm:$0xff] %v9440_v23  ;;  %v3623_v15 = vrot.slane %v3622_v36, 1  ;;  %v3607_v14 = vrot.slane %v3606_v24, 2  ;;  %v3639_v39 = vsel %vm2812_vm3, %v2738_v53, 0.0  ;;  %v9449_v8 = vmul.f32 0.125, %v3918_v11 }
 0x2d9   : > { %10369 = vst [vmem:[#allocation37_spill] sm:$0xff] %v9444_v0  ;;  %v3603_v50 = vadd.f32 %v3602_v58, %v3601_v13  ;;  %v3640_v63 = vrot.slane %v3639_v39, 4  ;;  %v2736_v16 = vsel %vm2352_vm14, %v9040_v41, %v2544_v29  ;;  %v4464_v28 = vpack.c.bf16 %v4272_v59, %v4272_v59  ;;  %v9458_v13 = vpop.f32.mrb[41].mxu1 }
 0x2da   : > { %v3624_v62 = vadd.f32 %v3623_v15, %v3622_v36  ;;  %v3608_v22 = vadd.f32 %v3607_v14, %v3606_v24  ;;  %v3625_v33 = vsel %vm2812_vm3, %v2736_v16, 0.0  ;;  %vm2355_vm0 = vcmp.ge.f32.partialorder %v9047_v43, 0.0 }
 0x2db   : > { %v4270_v3 = vmul.f32 0.125, %v3603_v50  ;;  %v3641_v34 = vadd.f32 %v3640_v63, %v3639_v39  ;;  %v3626_v61 = vrot.slane %v3625_v33, 4  ;;  %v2547_v11 = vmul.f32 0.01, %v9047_v43 }
 0x2dc   : > { %v4273_v53 = vmul.f32 0.125, %v3624_v62  ;;  %v3609_v0 = vrot.slane %v3608_v22, 1  ;;  %vm2353_vm2 = vcmp.ge.f32.partialorder %v9066_v42, 0.0  ;;  %v2545_v24 = vmul.f32 0.01, %v9066_v42 }
 0x2dd   : > { %v4462_v41 = vpack.c.bf16 %v4270_v3, %v4270_v3  ;;  %v3642_v59 = vrot.slane %v3641_v34, 2  ;;  %v3627_v36 = vadd.f32 %v3626_v61, %v3625_v33  ;;  %v5388_v58 = vunpack.c.l.b16 %v4464_v28 }
 0x2de   : > { %v4465_v29 = vpack.c.bf16 %v4273_v53, %v4273_v53  ;;  %v3610_v15 = vadd.f32 %v3609_v0, %v3608_v22  ;;  %v2739_v14 = vsel %vm2355_vm0, %v9047_v43, %v2547_v11  ;;  %vm2358_vm6 = vcmp.ge.f32.partialorder %v9091_v48, 0.0  ;;  %v9469_v43 = vpop.f32.mrb[42].mxu1 }
 0x2df   : > { %v3643_v39 = vadd.f32 %v3642_v59, %v3641_v34  ;;  %v3628_v50 = vrot.slane %v3627_v36, 2  ;;  %v3646_v63 = vsel %vm2812_vm3, %v2739_v14, 0.0  ;;  %v5386_v16 = vunpack.c.l.b16 %v4462_v41  ;;  %10370 = vst [vmem:[#allocation38_spill] sm:$0xff] %v9469_v43  ;;  %v9472_v11 = vpop.f32.mrb[43].mxu1 }
 0x2e0   : > { %v4271_v62 = vmul.f32 0.125, %v3610_v15  ;;  %v3647_v21 = vrot.slane %v3646_v63, 4  ;;  %v2737_v33 = vsel %vm2353_vm2, %v9066_v42, %v2545_v24  ;;  %v2550_v0 = vmul.f32 0.01, %v9091_v48  ;;  %10371 = vst [vmem:[#allocation39_spill] sm:$0xff] %v9472_v11 }
 0x2e1   : > { %v3644_v3 = vrot.slane %v3643_v39, 1  ;;  %v3629_v61 = vadd.f32 %v3628_v50, %v3627_v36  ;;  %v3632_v28 = vsel %vm2812_vm3, %v2737_v33, 0.0  ;;  %vm2356_vm7 = vcmp.ge.f32.partialorder %v9097_v38, 0.0 }
 0x2e2   : > { %v4463_v22 = vpack.c.bf16 %v4271_v62, %v4271_v62  ;;  %v3648_v34 = vadd.f32 %v3647_v21, %v3646_v63  ;;  %v3633_v53 = vrot.slane %v3632_v28, 4  ;;  %v5389_v41 = vunpack.c.l.b16 %v4465_v29 }
 0x2e3   : > { %v3630_v59 = vrot.slane %v3629_v61, 1  ;;  %v2742_v42 = vsel %vm2358_vm6, %v9091_v48, %v2550_v0  ;;  %v2548_v36 = vmul.f32 0.01, %v9097_v38  ;;  %v3645_v62 = vadd.f32 %v3644_v3, %v3643_v39 }
 0x2e4   : > { %v5387_v24 = vunpack.c.l.b16 %v4463_v22  ;;  %v3649_v15 = vrot.slane %v3648_v34, 2  ;;  %v3634_v14 = vadd.f32 %v3633_v53, %v3632_v28  ;;  %v3667_v50 = vsel %vm2812_vm3, %v2742_v42, 0.0 }
 0x2e5   : > { %v3631_v21 = vadd.f32 %v3630_v59, %v3629_v61  ;;  %v3668_v63 = vrot.slane %v3667_v50, 4  ;;  %v2740_v33 = vsel %vm2356_vm7, %v9097_v38, %v2548_v36  ;;  %v4507_v48 = vpack.c.bf16 %v9449_v8, %v9449_v8  ;;  %v9488_v8 = vpop.f32.mrb[136].mxu0 }
 0x2e6   : > { %v5408_v23 = vsel %vm4597_vm12, %v5387_v24, %v5386_v16  ;;  %v3650_v29 = vadd.f32 %v3649_v15, %v3648_v34  ;;  %v3635_v11 = vrot.slane %v3634_v14, 2  ;;  %v3653_v43 = vsel %vm2812_vm3, %v2740_v33, 0.0 }
 0x2e7   : > { %v5409_v0 = vsel %vm4599_vm15, %v5388_v58, %v5408_v23  ;;  %v4274_v22 = vmul.f32 0.125, %v3631_v21  ;;  %v3669_v28 = vadd.f32 %v3668_v63, %v3667_v50  ;;  %v3654_v61 = vrot.slane %v3653_v43, 4 }
 0x2e8   : > { %v5410_v53 = vsel %vm4601_vm5, %v5389_v41, %v5409_v0  ;;  %v3651_v39 = vrot.slane %v3650_v29, 1  ;;  %v3636_v3 = vadd.f32 %v3635_v11, %v3634_v14  ;;  %v4276_v59 = vmul.f32 0.125, %v3645_v62  ;;  %v9492_v11 = vpop.f32.mrb[137].mxu0 }
 0x2e9   : > { %v4466_v38 = vpack.c.bf16 %v4274_v22, %v4274_v22  ;;  %v3670_v42 = vrot.slane %v3669_v28, 2  ;;  %vm2359_vm9 = vcmp.ge.f32.partialorder %v9102_v26, 0.0  ;;  %v3655_v36 = vadd.f32 %v3654_v61, %v3653_v43 }
 0x2ea   : > { %v3652_v16 = vadd.f32 %v3651_v39, %v3650_v29  ;;  %v3637_v34 = vrot.slane %v3636_v3, 1  ;;  %v2551_v24 = vmul.f32 0.01, %v9102_v26  ;;  %vm2357_vm10 = vcmp.ge.f32.partialorder %v9116_v32, 0.0  ;;  %v9500_v39 = vpop.f32.mrb[138].mxu0 }
 0x2eb   : > { %v5390_v23 = vunpack.c.l.b16 %v4466_v38  ;;  %v3671_v58 = vadd.f32 %v3670_v42, %v3669_v28  ;;  %v2549_v41 = vmul.f32 0.01, %v9116_v32  ;;  %v3656_v50 = vrot.slane %v3655_v36, 2 }
 0x2ec   : > { %v4277_v15 = vmul.f32 0.125, %v3652_v16  ;;  %v3638_v14 = vadd.f32 %v3637_v34, %v3636_v3  ;;  %v2743_v62 = vsel %vm2359_vm9, %v9102_v26, %v2551_v24  ;;  %v9498_v29 = vunpack.c.l.b16 %v4507_v48 }
 0x2ed   : > { %v5411_v21 = vsel %vm4603_vm8, %v5390_v23, %v5410_v53  ;;  %v3672_v43 = vrot.slane %v3671_v58, 1  ;;  %v3674_v63 = vsel %vm2812_vm3, %v2743_v62, 0.0  ;;  %v2741_v33 = vsel %vm2357_vm10, %v9116_v32, %v2549_v41 }
 0x2ee   : > { %v4275_v0 = vmul.f32 0.125, %v3638_v14  ;;  %v3657_v22 = vadd.f32 %v3656_v50, %v3655_v36  ;;  %v3675_v28 = vrot.slane %v3674_v63, 4  ;;  %v4468_v61 = vpack.c.bf16 %v4276_v59, %v4276_v59 }
 0x2ef   : > { %v3660_v3 = vsel %vm2812_vm3, %v2741_v33, 0.0  ;;  %vm2398_vm13 = vcmp.ge.f32.partialorder %v9127_v52, 0.0  ;;  %v2590_v26 = vmul.f32 0.01, %v9127_v52  ;;  %v3673_v38 = vadd.f32 %v3672_v43, %v3671_v58 }
 0x2f0   : > { %v4467_v53 = vpack.c.bf16 %v4275_v0, %v4275_v0  ;;  %v3658_v42 = vrot.slane %v3657_v22, 1  ;;  %v3676_v16 = vadd.f32 %v3675_v28, %v3674_v63  ;;  %v4469_v34 = vpack.c.bf16 %v4277_v15, %v4277_v15  ;;  %v9514_v15 = vpop.f32.mrb[139].mxu0 }
 0x2f1   : > { %v3661_v32 = vrot.slane %v3660_v3, 4  ;;  %v2782_v48 = vsel %vm2398_vm13, %v9127_v52, %v2590_v26  ;;  %v5396_v36 = vsel %vm4601_vm5, %v9146_v45, %v9123_v40  ;;  %v9510_v14 = vunpack.c.l.b16 %v4468_v61 }
 0x2f2   : > { %v5391_v24 = vunpack.c.l.b16 %v4467_v53  ;;  %v3659_v59 = vadd.f32 %v3658_v42, %v3657_v22  ;;  %v3677_v23 = vrot.slane %v3676_v16, 2  ;;  %v3947_v41 = vsel %vm2812_vm3, %v2782_v48, 0.0 }
 0x2f3   : > { %v3662_v50 = vadd.f32 %v3661_v32, %v3660_v3  ;;  %v3948_v62 = vrot.slane %v3947_v41, 4  ;;  %v5397_v58 = vsel %vm4603_vm8, %v9152_v1, %v5396_v36  ;;  %v4280_v43 = vmul.f32 0.125, %v3673_v38 }
 0x2f4   : > { %v9517_v52 = vsel %vm4605_vm11, %v5391_v24, %v5411_v21  ;;  %v3678_v63 = vadd.f32 %v3677_v23, %v3676_v16  ;;  %v5398_v40 = vsel %vm4605_vm11, %v9165_v7, %v5397_v58  ;;  %v9521_v45 = vunpack.c.l.b16 %v4469_v34 }
 0x2f5   : > { %v3663_v33 = vrot.slane %v3662_v50, 2  ;;  %v3949_v0 = vadd.f32 %v3948_v62, %v3947_v41  ;;  %v5399_v22 = vsel %vm4607_vm1, %v9150_v35, %v5398_v40  ;;  %v4278_v28 = vmul.f32 0.125, %v3659_v59 }
 0x2f6   : > { %v3679_v61 = vrot.slane %v3678_v63, 1  ;;  %v5400_v1 = vsel %vm4609_vm4, %v9154_v4, %v5399_v22  ;;  %v5403_v21 = vsel %vm4601_vm5, %v9302_v20, %v9295_v18  ;;  %vm2362_vm14 = vcmp.ge.f32.partialorder %v9178_v25, 0.0 }
 0x2f7   : > { %v3664_v3 = vadd.f32 %v3663_v33, %v3662_v50  ;;  %v3950_v26 = vrot.slane %v3949_v0, 2  ;;  %v5404_v7 = vsel %vm4603_vm8, %v9391_v51, %v5403_v21  ;;  %v4472_v53 = vpack.c.bf16 %v4280_v43, %v4280_v43 }
 0x2f8   : > { %v3680_v38 = vadd.f32 %v3679_v61, %v3678_v63  ;;  %v5405_v35 = vsel %vm4605_vm11, %v9427_v9, %v5404_v7  ;;  %v2554_v42 = vmul.f32 0.01, %v9178_v25  ;;  %vm2396_vm0 = vcmp.ge.f32.partialorder %v9195_v5, 0.0 }
 0x2f9   : > { %v3665_v16 = vrot.slane %v3664_v3, 1  ;;  %v3951_v4 = vadd.f32 %v3950_v26, %v3949_v0  ;;  %v5406_v34 = vsel %vm4607_vm1, %v9362_v12, %v5405_v35  ;;  %v4470_v18 = vpack.c.bf16 %v4278_v28, %v4278_v28 }
 0x2fa   : > { %v5407_v20 = vsel %vm4609_vm4, %v9397_v46, %v5406_v34  ;;  %v2746_v51 = vsel %vm2362_vm14, %v9178_v25, %v2554_v42  ;;  %v2588_v32 = vmul.f32 0.01, %v9195_v5  ;;  %v4281_v59 = vmul.f32 0.125, %v3680_v38 }
 0x2fb   : > { %v3666_v48 = vadd.f32 %v3665_v16, %v3664_v3  ;;  %v3952_v36 = vrot.slane %v3951_v4, 1  ;;  %v9543_v9 = vpack.c.b16 %v5407_v20, %v5400_v1  ;;  %v3695_v24 = vsel %vm2812_vm3, %v2746_v51, 0.0 }
 0x2fc   : > { %v3696_v23 = vrot.slane %v3695_v24, 4  ;;  %v2780_v12 = vsel %vm2396_vm0, %v9195_v5, %v2588_v32  ;;  %vm2360_vm2 = vcmp.ge.f32.partialorder %v9205_v37, 0.0  ;;  %v5511_v41 = vunpack.c.l.b16 %v4472_v53 }
 0x2fd   : > { %10372 = vst [vmem:[#allocation40_spill] sm:$0xff] %v9543_v9  ;;  %v4279_v50 = vmul.f32 0.125, %v3666_v48  ;;  %7318 = vmatprep.mubr.msk.bf16.mxu1 %vm2812_vm3, %v9543_v9  ;;  %v3933_v25 = vsel %vm2812_vm3, %v2780_v12, 0.0  ;;  %v2552_v46 = vmul.f32 0.01, %v9205_v37  ;;  %v5509_v62 = vunpack.c.l.b16 %v4470_v18 }
 0x2fe   : > { %v3697_v58 = vadd.f32 %v3696_v23, %v3695_v24  ;;  %v3934_v43 = vrot.slane %v3933_v25, 4  ;;  %vm2399_vm6 = vcmp.ge.f32.partialorder %v9207_v10, 0.0  ;;  %v3953_v40 = vadd.f32 %v3952_v36, %v3951_v4 }
 0x2ff   : > { %v4471_v63 = vpack.c.bf16 %v4279_v50, %v4279_v50  ;;  %v2744_v5 = vsel %vm2360_vm2, %v9205_v37, %v2552_v46  ;;  %v2591_v33 = vmul.f32 0.01, %v9207_v10  ;;  %v4473_v0 = vpack.c.bf16 %v4281_v59, %v4281_v59 }
 0x300   : > { %v3698_v22 = vrot.slane %v3697_v58, 2  ;;  %v3935_v28 = vadd.f32 %v3934_v43, %v3933_v25  ;;  %v3681_v61 = vsel %vm2812_vm3, %v2744_v5, 0.0  ;;  %vm2363_vm7 = vcmp.ge.f32.partialorder %v9211_v57, 0.0 }
 0x301   : > { %v5510_v1 = vunpack.c.l.b16 %v4471_v63  ;;  %v3682_v21 = vrot.slane %v3681_v61, 4  ;;  %v2783_v3 = vsel %vm2399_vm6, %v9207_v10, %v2591_v33  ;;  %v2555_v38 = vmul.f32 0.01, %v9211_v57 }
 0x302   : > { %v3699_v26 = vadd.f32 %v3698_v22, %v3697_v58  ;;  %v3936_v7 = vrot.slane %v3935_v28, 2  ;;  %v3954_v53 = vsel %vm2812_vm3, %v2783_v3, 0.0  ;;  %v4320_v35 = vmul.f32 0.125, %v3953_v40 }
 0x303   : > { %v5533_v37 = vsel %vm4597_vm12, %v5510_v1, %v5509_v62  ;;  %v3683_v42 = vadd.f32 %v3682_v21, %v3681_v61  ;;  %v3955_v16 = vrot.slane %v3954_v53, 4  ;;  %v2747_v10 = vsel %vm2363_vm7, %v9211_v57, %v2555_v38  ;;  %v9571_v62 = vpop.f32.mrb[44].mxu1 }
 0x304   : > { %v9562_v4 = vsel %vm4599_vm15, %v5511_v41, %v5533_v37  ;;  %v3700_v34 = vrot.slane %v3699_v26, 1  ;;  %v3937_v18 = vadd.f32 %v3936_v7, %v3935_v28  ;;  %v3702_v32 = vsel %vm2812_vm3, %v2747_v10, 0.0 }
 0x305   : > { %v3684_v20 = vrot.slane %v3683_v42, 2  ;;  %v3956_v51 = vadd.f32 %v3955_v16, %v3954_v53  ;;  %vm2397_vm9 = vcmp.ge.f32.partialorder %v9213_v49, 0.0  ;;  %v3703_v24 = vrot.slane %v3702_v32, 4 }
 0x306   : > { %v3701_v48 = vadd.f32 %v3700_v34, %v3699_v26  ;;  %v3938_v36 = vrot.slane %v3937_v18, 1  ;;  %v2589_v59 = vmul.f32 0.01, %v9213_v49  ;;  %vm2361_vm10 = vcmp.ge.f32.partialorder %v9221_v31, 0.0  ;;  %v9582_v34 = vpop.f32.mrb[45].mxu1 }
 0x307   : > { %v3685_v23 = vadd.f32 %v3684_v20, %v3683_v42  ;;  %v3957_v12 = vrot.slane %v3956_v51, 2  ;;  %v2553_v41 = vmul.f32 0.01, %v9221_v31  ;;  %v3704_v57 = vadd.f32 %v3703_v24, %v3702_v32 }
 0x308   : > { %v4284_v50 = vmul.f32 0.125, %v3701_v48  ;;  %v3939_v25 = vadd.f32 %v3938_v36, %v3937_v18  ;;  %v2781_v46 = vsel %vm2397_vm9, %v9213_v49, %v2589_v59  ;;  %v4512_v5 = vpack.c.bf16 %v4320_v35, %v4320_v35 }
 0x309   : > { %v3686_v58 = vrot.slane %v3685_v23, 1  ;;  %v3958_v43 = vadd.f32 %v3957_v12, %v3956_v51  ;;  %v3940_v63 = vsel %vm2812_vm3, %v2781_v46, 0.0  ;;  %v2745_v40 = vsel %vm2361_vm10, %v9221_v31, %v2553_v41 }
 0x30a   : > { %v4318_v33 = vmul.f32 0.125, %v3939_v25  ;;  %v3705_v22 = vrot.slane %v3704_v57, 2  ;;  %v3941_v28 = vrot.slane %v3940_v63, 4  ;;  %v9575_v61 = vunpack.c.l.b16 %v4473_v0 }
 0x30b   : > { %v3687_v1 = vadd.f32 %v3686_v58, %v3685_v23  ;;  %v3959_v21 = vrot.slane %v3958_v43, 1  ;;  %v3688_v3 = vsel %vm2812_vm3, %v2745_v40, 0.0  ;;  %v4476_v26 = vpack.c.bf16 %v4284_v50, %v4284_v50 }
 0x30c   : > { %v3706_v49 = vadd.f32 %v3705_v22, %v3704_v57  ;;  %v3942_v7 = vadd.f32 %v3941_v28, %v3940_v63  ;;  %vm2402_vm13 = vcmp.ge.f32.partialorder %v9223_v6, 0.0  ;;  %v4510_v53 = vpack.c.bf16 %v4318_v33, %v4318_v33  ;;  %v10373_v28 = vld [vmem:[#allocation10_spill] sm:$0xff] }
 0x30d   : > { %v3960_v38 = vadd.f32 %v3959_v21, %v3958_v43  ;;  %v3689_v37 = vrot.slane %v3688_v3, 4  ;;  %v2594_v31 = vmul.f32 0.01, %v9223_v6  ;;  %v9580_v35 = vunpack.c.l.b16 %v4512_v5 }
 0x30e   : > { %v4282_v42 = vmul.f32 0.125, %v3687_v1  ;;  %v3707_v16 = vrot.slane %v3706_v49, 1  ;;  %v3943_v0 = vrot.slane %v3942_v7, 2  ;;  %vm2400_vm14 = vcmp.ge.f32.partialorder %v9227_v17, 0.0 }
 0x30f   : > { %v4321_v18 = vmul.f32 0.125, %v3960_v38  ;;  %v3690_v10 = vadd.f32 %v3689_v37, %v3688_v3  ;;  %v2786_v20 = vsel %vm2402_vm13, %v9223_v6, %v2594_v31  ;;  %v2592_v36 = vmul.f32 0.01, %v9227_v17 }
 0x310   : > { %v3708_v51 = vadd.f32 %v3707_v16, %v3706_v49  ;;  %v3944_v32 = vadd.f32 %v3943_v0, %v3942_v7  ;;  %v3975_v48 = vsel %vm2812_vm3, %v2786_v20, 0.0  ;;  %v9588_v24 = vunpack.c.l.b16 %v4476_v26  ;;  %v9597_v49 = vpop.f32.mrb[46].mxu1 }
 0x311   : > { %v5760_v59 = vunpack.c.l.b16 %v4510_v53  ;;  %v3691_v23 = vrot.slane %v3690_v10, 2  ;;  %v3976_v12 = vrot.slane %v3975_v48, 4  ;;  %v4474_v41 = vpack.c.bf16 %v4282_v42, %v4282_v42  ;;  %v9601_v31 = vpop.f32.mrb[47].mxu1 }
 0x312   : > { %v4513_v50 = vpack.c.bf16 %v4321_v18, %v4321_v18  ;;  %v3945_v25 = vrot.slane %v3944_v32, 1  ;;  %v2784_v57 = vsel %vm2400_vm14, %v9227_v17, %v2592_v36  ;;  %vm2403_vm0 = vcmp.ge.f32.partialorder %v9232_v19, 0.0 }
 0x313   : > { %v3692_v46 = vadd.f32 %v3691_v23, %v3690_v10  ;;  %v3977_v6 = vadd.f32 %v3976_v12, %v3975_v48  ;;  %v3961_v58 = vsel %vm2812_vm3, %v2784_v57, 0.0  ;;  %v4285_v43 = vmul.f32 0.125, %v3708_v51 }
 0x314   : > { %v3946_v63 = vadd.f32 %v3945_v25, %v3944_v32  ;;  %v3962_v40 = vrot.slane %v3961_v58, 4  ;;  %v2595_v5 = vmul.f32 0.01, %v9232_v19  ;;  %vm2401_vm2 = vcmp.ge.f32.partialorder %v10373_v28, 0.0  ;;  %v10374_v32 = vld [vmem:[#allocation9_spill] sm:$0xff] }
 0x315   : > { %v3693_v33 = vrot.slane %v3692_v46, 1  ;;  %v3978_v22 = vrot.slane %v3977_v6, 2  ;;  %v2593_v1 = vmul.f32 0.01, %v10373_v28  ;;  %v5763_v21 = vunpack.c.l.b16 %v4513_v50 }
 0x316   : > { %v4319_v3 = vmul.f32 0.125, %v3946_v63  ;;  %v3963_v17 = vadd.f32 %v3962_v40, %v3961_v58  ;;  %v2787_v26 = vsel %vm2403_vm0, %v9232_v19, %v2595_v5  ;;  %vm2406_vm6 = vcmp.ge.f32.partialorder %v10374_v32, 0.0  ;;  %v9605_v19 = vpop.f32.mrb[48].mxu1 }
 0x317   : > { %v3694_v7 = vadd.f32 %v3693_v33, %v3692_v46  ;;  %v3979_v53 = vadd.f32 %v3978_v22, %v3977_v6  ;;  %v3982_v38 = vsel %vm2812_vm3, %v2787_v26, 0.0  ;;  %v2785_v37 = vsel %vm2401_vm2, %v10373_v28, %v2593_v1  ;;  %v9608_v50 = vpop.f32.mrb[49].mxu1 }
 0x318   : > { %v4511_v42 = vpack.c.bf16 %v4319_v3, %v4319_v3  ;;  %v3964_v16 = vrot.slane %v3963_v17, 2  ;;  %v3983_v0 = vrot.slane %v3982_v38, 4  ;;  %v3968_v18 = vsel %vm2812_vm3, %v2785_v37, 0.0  ;;  %v9612_v58 = vpop.f32.mrb[50].mxu1 }
 0x319   : > { %v4283_v10 = vmul.f32 0.125, %v3694_v7  ;;  %v3980_v20 = vrot.slane %v3979_v53, 1  ;;  %v3969_v51 = vrot.slane %v3968_v18, 4  ;;  %v2598_v12 = vmul.f32 0.01, %v10374_v32  ;;  %v9616_v22 = vpop.f32.mrb[51].mxu1 }
 0x31a   : > { %v5761_v48 = vunpack.c.l.b16 %v4511_v42  ;;  %v3965_v36 = vadd.f32 %v3964_v16, %v3963_v17  ;;  %v3984_v23 = vadd.f32 %v3983_v0, %v3982_v38  ;;  %v9610_v25 = vunpack.c.l.b16 %v4474_v41  ;;  %v10375_v41 = vld [vmem:[#allocation11_spill] sm:$0xff] }
 0x31b   : > { %v4477_v57 = vpack.c.bf16 %v4285_v43, %v4285_v43  ;;  %v4475_v46 = vpack.c.bf16 %v4283_v10, %v4283_v10  ;;  %v3970_v6 = vadd.f32 %v3969_v51, %v3968_v18  ;;  %v2790_v33 = vsel %vm2406_vm6, %v10374_v32, %v2598_v12 }
 0x31c   : > { %v5782_v63 = vsel %vm4597_vm12, %v5761_v48, %v5760_v59  ;;  %v3966_v40 = vrot.slane %v3965_v36, 1  ;;  %v3985_v5 = vrot.slane %v3984_v23, 2  ;;  %v3981_v1 = vadd.f32 %v3980_v20, %v3979_v53 }
 0x31d   : > { %v5783_v28 = vsel %vm4599_vm15, %v9580_v35, %v5782_v63  ;;  %v3971_v3 = vrot.slane %v3970_v6, 2  ;;  %vm2366_vm7 = vcmp.ge.f32.partialorder %v10375_v41, 0.0  ;;  %v4003_v7 = vsel %vm2812_vm3, %v2790_v33, 0.0 }
 0x31e   : > { %v3967_v43 = vadd.f32 %v3966_v40, %v3965_v36  ;;  %v5784_v17 = vsel %vm4601_vm5, %v5763_v21, %v5783_v28  ;;  %v3986_v26 = vadd.f32 %v3985_v5, %v3984_v23  ;;  %v9623_v59 = vunpack.c.l.b16 %v4477_v57 }
 0x31f   : > { %v3972_v38 = vadd.f32 %v3971_v3, %v3970_v6  ;;  %v4004_v37 = vrot.slane %v4003_v7, 4  ;;  %v2558_v42 = vmul.f32 0.01, %v10375_v41  ;;  %vm2404_vm9 = vcmp.ge.f32.partialorder %v9266_v47, 0.0 }
 0x320   : > { %v4322_v16 = vmul.f32 0.125, %v3967_v43  ;;  %v3987_v0 = vrot.slane %v3986_v26, 1  ;;  %v2596_v35 = vmul.f32 0.01, %v9266_v47  ;;  %v9628_v53 = vunpack.c.l.b16 %v4475_v46 }
 0x321   : > { %v3973_v18 = vrot.slane %v3972_v38, 1  ;;  %v4005_v10 = vadd.f32 %v4004_v37, %v4003_v7  ;;  %v2750_v21 = vsel %vm2366_vm7, %v10375_v41, %v2558_v42  ;;  %v4324_v20 = vmul.f32 0.125, %v3981_v1 }
 0x322   : > { %v4514_v51 = vpack.c.bf16 %v4322_v16, %v4322_v16  ;;  %v3723_v32 = vsel %vm2812_vm3, %v2750_v21, 0.0  ;;  %v2788_v48 = vsel %vm2404_vm9, %v9266_v47, %v2596_v35  ;;  %v3988_v46 = vadd.f32 %v3987_v0, %v3986_v26 }
 0x323   : > { %v3974_v36 = vadd.f32 %v3973_v18, %v3972_v38  ;;  %v4006_v23 = vrot.slane %v4005_v10, 2  ;;  %v3724_v12 = vrot.slane %v3723_v32, 4  ;;  %v3989_v57 = vsel %vm2812_vm3, %v2788_v48, 0.0 }
 0x324   : > { %v5764_v6 = vunpack.c.l.b16 %v4514_v51  ;;  %v3990_v63 = vrot.slane %v3989_v57, 4  ;;  %vm2364_vm10 = vcmp.ge.f32.partialorder %v9274_v60, 0.0  ;;  %v2556_v28 = vmul.f32 0.01, %v9274_v60 }
 0x325   : > { %v4323_v40 = vmul.f32 0.125, %v3974_v36  ;;  %v4007_v5 = vadd.f32 %v4006_v23, %v4005_v10  ;;  %v3725_v33 = vadd.f32 %v3724_v12, %v3723_v32  ;;  %v4516_v1 = vpack.c.bf16 %v4324_v20, %v4324_v20 }
 0x326   : > { %v5785_v3 = vsel %vm4603_vm8, %v5764_v6, %v5784_v17  ;;  %v3991_v41 = vadd.f32 %v3990_v63, %v3989_v57  ;;  %vm2407_vm13 = vcmp.ge.f32.partialorder %v9290_v27, 0.0  ;;  %v2748_v38 = vsel %vm2364_vm10, %v9274_v60, %v2556_v28  ;;  %v9651_v6 = vpop.f32.mrb[52].mxu1 }
 0x327   : > { %v4515_v47 = vpack.c.bf16 %v4323_v40, %v4323_v40  ;;  %v4008_v43 = vrot.slane %v4007_v5, 1  ;;  %v3726_v7 = vrot.slane %v3725_v33, 2  ;;  %v4325_v26 = vmul.f32 0.125, %v3988_v46  ;;  %v9654_v40 = vpop.f32.mrb[53].mxu1 }
 0x328   : > { %v3992_v37 = vrot.slane %v3991_v41, 2  ;;  %v3709_v42 = vsel %vm2812_vm3, %v2748_v38, 0.0  ;;  %v2599_v16 = vmul.f32 0.01, %v9290_v27  ;;  %vm2367_vm14 = vcmp.ge.f32.partialorder %v9300_v55, 0.0 }
 0x329   : > { %v5765_v0 = vunpack.c.l.b16 %v4515_v47  ;;  %v4009_v35 = vadd.f32 %v4008_v43, %v4007_v5  ;;  %v3727_v18 = vadd.f32 %v3726_v7, %v3725_v33  ;;  %v3710_v10 = vrot.slane %v3709_v42, 4  ;;  %v10376_v7 = vld [vmem:[#allocation14_spill] sm:$0xff] }
 0x32a   : > { %v3993_v21 = vadd.f32 %v3992_v37, %v3991_v41  ;;  %v2791_v17 = vsel %vm2407_vm13, %v9290_v27, %v2599_v16  ;;  %v2559_v20 = vmul.f32 0.01, %v9300_v55  ;;  %v4517_v36 = vpack.c.bf16 %v4325_v26, %v4325_v26  ;;  %v7273_v41 = vpop.f32.mrb[54].mxu1 }
 0x32b   : > { %v9647_v51 = vsel %vm4605_vm11, %v5765_v0, %v5785_v3  ;;  %v4328_v60 = vmul.f32 0.125, %v4009_v35  ;;  %v3728_v32 = vrot.slane %v3727_v18, 1  ;;  %v3711_v48 = vadd.f32 %v3710_v10, %v3709_v42 }
 0x32c   : > { %v3994_v23 = vrot.slane %v3993_v21, 1  ;;  %v4010_v12 = vsel %vm2812_vm3, %v2791_v17, 0.0  ;;  %v2751_v57 = vsel %vm2367_vm14, %v9300_v55, %v2559_v20  ;;  %vm2405_vm0 = vcmp.ge.f32.partialorder %v9318_v30, 0.0  ;;  %v7574_v20 = vld [vmem:[%s10178_s3 + $0x20] sm:$0xff]  }
 0x32d   : > { %v3729_v46 = vadd.f32 %v3728_v32, %v3727_v18  ;;  %v3712_v27 = vrot.slane %v3711_v48, 2  ;;  %v4011_v63 = vrot.slane %v4010_v12, 4  ;;  %v9656_v5 = vunpack.c.l.b16 %v4516_v1 }
 0x32e   : > { %v4520_v33 = vpack.c.bf16 %v4328_v60, %v4328_v60  ;;  %v3730_v28 = vsel %vm2812_vm3, %v2751_v57, 0.0  ;;  %v2597_v3 = vmul.f32 0.01, %v9318_v30  ;;  %v3995_v47 = vadd.f32 %v3994_v23, %v3993_v21 }
 0x32f   : > { %v3713_v43 = vadd.f32 %v3712_v27, %v3711_v48  ;;  %v4012_v55 = vadd.f32 %v4011_v63, %v4010_v12  ;;  %vm2365_vm2 = vcmp.ge.f32.partialorder %v10376_v7, 0.0  ;;  %v4288_v38 = vmul.f32 0.125, %v3729_v46  ;;  %v9673_v46 = vpop.f32.mrb[55].mxu1 }
 0x330   : > { %v3731_v26 = vrot.slane %v3730_v28, 4  ;;  %v2789_v37 = vsel %vm2405_vm0, %v9318_v30, %v2597_v3  ;;  %v2557_v42 = vmul.f32 0.01, %v10376_v7  ;;  %v9663_v16 = vunpack.c.l.b16 %v4517_v36  ;;  %10377 = vst [vmem:[#allocation10_spill] sm:$0xff] %v9673_v46  ;;  %v9677_v3 = vpop.f32.mrb[56].mxu1 }
 0x331   : > { %v3714_v1 = vrot.slane %v3713_v43, 1  ;;  %v4013_v0 = vrot.slane %v4012_v55, 2  ;;  %v3996_v35 = vsel %vm2812_vm3, %v2789_v37, 0.0  ;;  %v9666_v18 = vunpack.c.l.b16 %v4520_v33  ;;  %v10378_v33 = vld [vmem:[#allocation17_spill] sm:$0xff] }
 0x332   : > { %v3732_v10 = vadd.f32 %v3731_v26, %v3730_v28  ;;  %v3997_v21 = vrot.slane %v3996_v35, 4  ;;  %v2749_v17 = vsel %vm2365_vm2, %v10376_v7, %v2557_v42  ;;  %v4326_v60 = vmul.f32 0.125, %v3995_v47  ;;  %v9680_v26 = vpop.f32.mrb[57].mxu1 }
 0x333   : > { %v3715_v30 = vadd.f32 %v3714_v1, %v3713_v43  ;;  %v4014_v32 = vadd.f32 %v4013_v0, %v4012_v55  ;;  %v3716_v48 = vsel %vm2812_vm3, %v2749_v17, 0.0  ;;  %v4480_v36 = vpack.c.bf16 %v4288_v38, %v4288_v38  ;;  %v10379_v55 = vld [vmem:[#allocation5_spill] sm:$0xff]  ;;  %10380 = vst [vmem:[#allocation9_spill] sm:$0xff] %v9680_v26  ;;  %v10381_v1 = vld [vmem:[#allocation31_spill] sm:$0xff]  ;;  %v7279_v0 = vpop.f32.mrb[58].mxu1 }
 0x334   : > { %v3733_v23 = vrot.slane %v3732_v10, 2  ;;  %v3998_v12 = vadd.f32 %v3997_v21, %v3996_v35  ;;  %v3717_v57 = vrot.slane %v3716_v48, 4  ;;  %vm2410_vm6 = vcmp.ge.f32.partialorder %v10378_v33, 0.0  ;;  %v9694_v46 = vpop.f32.mrb[59].mxu1 }
 0x335   : > { %v4286_v27 = vmul.f32 0.125, %v3715_v30  ;;  %v4015_v63 = vrot.slane %v4014_v32, 1  ;;  %v2602_v28 = vmul.f32 0.01, %v10378_v33  ;;  %v5429_v7 = vand.u32 %v7574_v20, %v10379_v55  ;;  %10383 = vst [vmem:[#allocation11_spill] sm:$0xff] %v9694_v46 }
 0x336   : > { %v3734_v41 = vadd.f32 %v3733_v23, %v3732_v10  ;;  %v3999_v47 = vrot.slane %v3998_v12, 2  ;;  %v3718_v43 = vadd.f32 %v3717_v57, %v3716_v48  ;;  %v4518_v38 = vpack.c.bf16 %v4326_v60, %v4326_v60 }
 0x337   : > { %v4016_v37 = vadd.f32 %v4015_v63, %v4014_v32  ;;  %v2794_v42 = vsel %vm2410_vm6, %v10378_v33, %v2602_v28  ;;  %vm2408_vm7 = vcmp.ge.f32.partialorder %v10381_v1, 0.0  ;;  %7316 = vmatprep.subr.bf16.mxu1 %v5429_v7  ;;  %v9685_v10 = vunpack.c.l.b16 %v4480_v36  ;;  %v10382_v63 = vld [vmem:[#allocation32_spill] sm:$0xff] }
 0x338   : > { %v3735_v35 = vrot.slane %v3734_v41, 1  ;;  %v4000_v21 = vadd.f32 %v3999_v47, %v3998_v12  ;;  %v3719_v17 = vrot.slane %v3718_v43, 2  ;;  %v4031_v30 = vsel %vm2812_vm3, %v2794_v42, 0.0  ;;  %7317 = vmatpush3.bf16.msra.mxu1 %v5429_v7 }
 0x339   : > { %v4478_v48 = vpack.c.bf16 %v4286_v27, %v4286_v27  ;;  %v4032_v23 = vrot.slane %v4031_v30, 4  ;;  %v2600_v20 = vmul.f32 0.01, %v10381_v1  ;;  %v4329_v60 = vmul.f32 0.125, %v4016_v37 }
 0x33a   : > { %v4001_v32 = vrot.slane %v4000_v21, 1  ;;  %v3720_v57 = vadd.f32 %v3719_v17, %v3718_v43  ;;  %vm2411_vm9 = vcmp.ge.f32.partialorder %v10382_v63, 0.0  ;;  %v5934_v33 = vunpack.c.l.b16 %v4518_v38  ;;  %v9697_v38 = vpop.f32.mrb[60].mxu1 }
 0x33b   : > { %v4033_v28 = vadd.f32 %v4032_v23, %v4031_v30  ;;  %v2792_v12 = vsel %vm2408_vm7, %v10381_v1, %v2600_v20  ;;  %v2603_v47 = vmul.f32 0.01, %v10382_v63  ;;  %v3736_v36 = vadd.f32 %v3735_v35, %v3734_v41  ;;  %10384 = vst [vmem:[#allocation14_spill] sm:$0xff] %v9697_v38  ;;  %v9700_v20 = vpop.f32.mrb[61].mxu1 }
 0x33c   : > { %v4002_v42 = vadd.f32 %v4001_v32, %v4000_v21  ;;  %v3721_v27 = vrot.slane %v3720_v57, 1  ;;  %v4017_v0 = vsel %vm2812_vm3, %v2792_v12, 0.0  ;;  %v5517_v7 = vunpack.c.l.b16 %v4478_v48  ;;  %10385 = vst [vmem:[#allocation17_spill] sm:$0xff] %v9700_v20  ;;  %v10386_v32 = vld [vmem:[#allocation33_spill] sm:$0xff]  ;;  %v7285_v12 = vpop.f32.mrb[62].mxu1 }
 0x33d   : > { %v4034_v37 = vrot.slane %v4033_v28, 2  ;;  %v4018_v43 = vrot.slane %v4017_v0, 4  ;;  %v2795_v17 = vsel %vm2411_vm9, %v10382_v63, %v2603_v47  ;;  %v4521_v30 = vpack.c.bf16 %v4329_v60, %v4329_v60 }
 0x33e   : > { %v4327_v23 = vmul.f32 0.125, %v4002_v42  ;;  %v3722_v9 = vadd.f32 %v3721_v27, %v3720_v57  ;;  %v4038_v1 = vsel %vm2812_vm3, %v2795_v17, 0.0  ;;  %vm2409_vm10 = vcmp.ge.f32.partialorder %v10386_v32, 0.0  ;;  %v10387_v42 = vld [vmem:[#allocation34_spill] sm:$0xff] }
 0x33f   : > { %v4035_v41 = vadd.f32 %v4034_v37, %v4033_v28  ;;  %v4019_v35 = vadd.f32 %v4018_v43, %v4017_v0  ;;  %v4039_v21 = vrot.slane %v4038_v1, 4  ;;  %v4289_v48 = vmul.f32 0.125, %v3736_v36 }
 0x340   : > { %v4519_v46 = vpack.c.bf16 %v4327_v23, %v4327_v23  ;;  %v4287_v26 = vmul.f32 0.125, %v3722_v9  ;;  %v2601_v63 = vmul.f32 0.01, %v10386_v32  ;;  %vm2414_vm13 = vcmp.ge.f32.partialorder %v10387_v42, 0.0 }
 0x341   : > { %v4036_v47 = vrot.slane %v4035_v41, 1  ;;  %v4020_v38 = vrot.slane %v4019_v35, 2  ;;  %v4040_v60 = vadd.f32 %v4039_v21, %v4038_v1  ;;  %v2606_v28 = vmul.f32 0.01, %v10387_v42  ;;  %v9710_v1 = vpop.f32.mrb[63].mxu1 }
 0x342   : > { %v5935_v57 = vunpack.c.l.b16 %v4519_v46  ;;  %v4479_v27 = vpack.c.bf16 %v4287_v26, %v4287_v26  ;;  %v2793_v17 = vsel %vm2409_vm10, %v10386_v32, %v2601_v63  ;;  %10388 = vst [vmem:[#allocation5_spill] sm:$0xff] %v9710_v1  ;;  %v5413_v63 = vsel %vm4607_vm1, %v9510_v14, %v9517_v52  ;;  %v10391_v52 = vld [vmem:[#allocation21_spill] sm:$0xff] }
 0x343   : > { %v4037_v0 = vadd.f32 %v4036_v47, %v4035_v41  ;;  %v4021_v37 = vadd.f32 %v4020_v38, %v4019_v35  ;;  %v4041_v43 = vrot.slane %v4040_v60, 2  ;;  %v4024_v36 = vsel %vm2812_vm3, %v2793_v17, 0.0  ;;  %v9716_v41 = vpop.f32.mrb[64].mxu1 }
 0x344   : > { %v5958_v9 = vsel %vm4597_vm12, %v5935_v57, %v5934_v33  ;;  %v5518_v23 = vunpack.c.l.b16 %v4479_v27  ;;  %v4025_v12 = vrot.slane %v4024_v36, 4  ;;  %v2798_v20 = vsel %vm2414_vm13, %v10387_v42, %v2606_v28  ;;  %v9723_v47 = vpop.f32.mrb[65].mxu1 }
 0x345   : > { %v9714_v46 = vsel %vm4599_vm15, %v9666_v18, %v5958_v9  ;;  %v4332_v26 = vmul.f32 0.125, %v4037_v0  ;;  %v4022_v21 = vrot.slane %v4021_v37, 1  ;;  %v4042_v32 = vadd.f32 %v4041_v43, %v4040_v60  ;;  %10389 = vst [vmem:[#allocation31_spill] sm:$0xff] %v9723_v47  ;;  %v7291_v27 = vpop.f32.mrb[66].mxu1  ;;  %v10392_v9 = vld [vmem:[#allocation22_spill] sm:$0xff] }
 0x346   : > { %v5540_v38 = vsel %vm4597_vm12, %v5518_v23, %v5517_v7  ;;  %v4026_v35 = vadd.f32 %v4025_v12, %v4024_v36  ;;  %v4059_v33 = vsel %vm2812_vm3, %v2798_v20, 0.0  ;;  %v9725_v42 = vunpack.c.l.b16 %v4521_v30  ;;  %v9742_v12 = vpop.f32.mrb[67].mxu1 }
 0x347   : > { %v9729_v18 = vsel %vm4599_vm15, %v9685_v10, %v5540_v38  ;;  %v4023_v60 = vadd.f32 %v4022_v21, %v4021_v37  ;;  %v4043_v57 = vrot.slane %v4042_v32, 1  ;;  %v4481_v17 = vpack.c.bf16 %v4289_v48, %v4289_v48  ;;  %10394 = vst [vmem:[#allocation33_spill] sm:$0xff] %v9742_v12 }
 0x348   : > { %v4027_v7 = vrot.slane %v4026_v35, 2  ;;  %v4060_v28 = vrot.slane %v4059_v33, 4  ;;  %v5414_v20 = vsel %vm4609_vm4, %v9521_v45, %v5413_v63  ;;  %v4524_v0 = vpack.c.bf16 %v4332_v26, %v4332_v26  ;;  %v10393_v45 = vld [vmem:[#allocation23_spill] sm:$0xff] }
 0x349   : > { %v4330_v43 = vmul.f32 0.125, %v4023_v60  ;;  %v9733_v14 = vpack.c.b16 %v5414_v20, %v5414_v20  ;;  %vm2370_vm14 = vcmp.ge.f32.partialorder %v10391_v52, 0.0  ;;  %v2562_v10 = vmul.f32 0.01, %v10391_v52 }
 0x34a   : > { %v4028_v30 = vadd.f32 %v4027_v7, %v4026_v35  ;;  %v4061_v36 = vadd.f32 %v4060_v28, %v4059_v33  ;;  %vm2412_vm0 = vcmp.ge.f32.partialorder %v10392_v9, 0.0  ;;  %v4044_v23 = vadd.f32 %v4043_v57, %v4042_v32  ;;  %v9746_v33 = vpop.f32.mrb[68].mxu1 }
 0x34b   : > { %10390 = vst [vmem:[#allocation32_spill] sm:$0xff] %v9733_v14  ;;  %v4522_v37 = vpack.c.bf16 %v4330_v43, %v4330_v43  ;;  %7319 = vmatmul.mubr.msk.bf16.vlgmr.msra.gmra.mrb[84].mxu1 %vm2812_vm3, %v9733_v14  ;;  %v2604_v48 = vmul.f32 0.01, %v10392_v9  ;;  %vm2368_vm2 = vcmp.ge.f32.partialorder %v10393_v45, 0.0  ;;  %v2754_v38 = vsel %vm2370_vm14, %v10391_v52, %v2562_v10  ;;  %10395 = vst [vmem:[#allocation34_spill] sm:$0xff] %v9746_v33  ;;  %v9754_v27 = vpop.f32.mrb[69].mxu1 }
 0x34c   : > { %v4029_v26 = vrot.slane %v4028_v30, 1  ;;  %v4062_v21 = vrot.slane %v4061_v36, 2  ;;  %v2560_v35 = vmul.f32 0.01, %v10393_v45  ;;  %v9748_v63 = vunpack.c.l.b16 %v4481_v17  ;;  %10396 = vst [vmem:[#allocation21_spill] sm:$0xff] %v9754_v27  ;;  %v7297_v52 = vpop.f32.mrb[70].mxu1 }
 0x34d   : > { %v9750_v32 = vunpack.c.l.b16 %v4524_v0  ;;  %v3751_v60 = vsel %vm2812_vm3, %v2754_v38, 0.0  ;;  %v2796_v57 = vsel %vm2412_vm0, %v10392_v9, %v2604_v48  ;;  %v9757_v10 = vunpack.c.l.b16 %v4522_v37  ;;  %v9762_v0 = vpop.f32.mrb[71].mxu1 }
 0x34e   : > { %v4030_v7 = vadd.f32 %v4029_v26, %v4028_v30  ;;  %v4063_v28 = vadd.f32 %v4062_v21, %v4061_v36  ;;  %v3752_v20 = vrot.slane %v3751_v60, 4  ;;  %v4045_v43 = vsel %vm2812_vm3, %v2796_v57, 0.0  ;;  %10397 = vst [vmem:[#allocation22_spill] sm:$0xff] %v9762_v0  ;;  %v10398_v30 = vld [vmem:[#allocation24_spill] sm:$0xff]  ;;  %v9766_v36 = vpop.f32.mrb[72].mxu1 }
 0x34f   : > { %v4333_v14 = vmul.f32 0.125, %v4044_v23  ;;  %v4046_v33 = vrot.slane %v4045_v43, 4  ;;  %v2752_v17 = vsel %vm2368_vm2, %v10393_v45, %v2560_v35  ;;  %vm2415_vm6 = vcmp.ge.f32.partialorder %v10398_v30, 0.0  ;;  %10399 = vst [vmem:[#allocation23_spill] sm:$0xff] %v9766_v36  ;;  %v9769_v57 = vpop.f32.mrb[73].mxu1 }
 0x350   : > { %v4064_v38 = vrot.slane %v4063_v28, 1  ;;  %v3753_v9 = vadd.f32 %v3752_v20, %v3751_v60  ;;  %v3737_v48 = vsel %vm2812_vm3, %v2752_v17, 0.0  ;;  %v4331_v26 = vmul.f32 0.125, %v4030_v7  ;;  %10400 = vst [vmem:[#allocation24_spill] sm:$0xff] %v9769_v57  ;;  %v7303_v35 = vpop.f32.mrb[74].mxu1 }
 0x351   : > { %v4047_v21 = vadd.f32 %v4046_v33, %v4045_v43  ;;  %v3738_v37 = vrot.slane %v3737_v48, 4  ;;  %v2607_v23 = vmul.f32 0.01, %v10398_v30  ;;  %vm2371_vm7 = vcmp.ge.f32.partialorder %v9423_v54, 0.0  ;;  %v9774_v36 = vpop.f32.mrb[75].mxu1 }
 0x352   : > { %v4065_v52 = vadd.f32 %v4064_v38, %v4063_v28  ;;  %v3754_v27 = vrot.slane %v3753_v9, 2  ;;  %v2563_v45 = vmul.f32 0.01, %v9423_v54  ;;  %v4525_v60 = vpack.c.bf16 %v4333_v14, %v4333_v14  ;;  %10401 = vst [vmem:[#allocation41_spill] sm:$0xff] %v9774_v36 }
 0x353   : > { %v4048_v20 = vrot.slane %v4047_v21, 2  ;;  %v3739_v17 = vadd.f32 %v3738_v37, %v3737_v48  ;;  %v2799_v0 = vsel %vm2415_vm6, %v10398_v30, %v2607_v23  ;;  %vm2413_vm9 = vcmp.ge.f32.partialorder %v9432_v44, 0.0 }
 0x354   : > { %v4336_v33 = vmul.f32 0.125, %v4065_v52  ;;  %v3755_v7 = vadd.f32 %v3754_v27, %v3753_v9  ;;  %v4066_v43 = vsel %vm2812_vm3, %v2799_v0, 0.0  ;;  %v2755_v12 = vsel %vm2371_vm7, %v9423_v54, %v2563_v45 }
 0x355   : > { %v4049_v28 = vadd.f32 %v4048_v20, %v4047_v21  ;;  %v3740_v38 = vrot.slane %v3739_v17, 2  ;;  %v4067_v57 = vrot.slane %v4066_v43, 4  ;;  %v4523_v1 = vpack.c.bf16 %v4331_v26, %v4331_v26 }
 0x356   : > { %v3756_v35 = vrot.slane %v3755_v7, 1  ;;  %v3758_v14 = vsel %vm2812_vm3, %v2755_v12, 0.0  ;;  %v2605_v48 = vmul.f32 0.01, %v9432_v44  ;;  %v4528_v27 = vpack.c.bf16 %v4336_v33, %v4336_v33 }
 0x357   : > { %v4050_v30 = vrot.slane %v4049_v28, 1  ;;  %v3741_v37 = vadd.f32 %v3740_v38, %v3739_v17  ;;  %v4068_v23 = vadd.f32 %v4067_v57, %v4066_v43  ;;  %v3759_v52 = vrot.slane %v3758_v14, 4 }
 0x358   : > { %v3757_v9 = vadd.f32 %v3756_v35, %v3755_v7  ;;  %v2797_v0 = vsel %vm2413_vm9, %v9432_v44, %v2605_v48  ;;  %vm2369_vm10 = vcmp.ge.f32.partialorder %v9447_v2, 0.0  ;;  %v2561_v12 = vmul.f32 0.01, %v9447_v2 }
 0x359   : > { %v4051_v21 = vadd.f32 %v4050_v30, %v4049_v28  ;;  %v3742_v20 = vrot.slane %v3741_v37, 1  ;;  %v4069_v36 = vrot.slane %v4068_v23, 2  ;;  %v3760_v54 = vadd.f32 %v3759_v52, %v3758_v14 }
 0x35a   : > { %v4292_v26 = vmul.f32 0.125, %v3757_v9  ;;  %v4052_v45 = vsel %vm2812_vm3, %v2797_v0, 0.0  ;;  %vm2418_vm13 = vcmp.ge.f32.partialorder %v9454_v56, 0.0  ;;  %v9786_v7 = vunpack.c.l.b16 %v4525_v60 }
 0x35b   : > { %v4334_v17 = vmul.f32 0.125, %v4051_v21  ;;  %v3743_v57 = vadd.f32 %v3742_v20, %v3741_v37  ;;  %v4070_v43 = vadd.f32 %v4069_v36, %v4068_v23  ;;  %v3761_v33 = vrot.slane %v3760_v54, 2 }
 0x35c   : > { %10402 = vst [vmem:[#allocation42_spill] sm:$0xff] %v9786_v7  ;;  %v4053_v44 = vrot.slane %v4052_v45, 4  ;;  %v2753_v38 = vsel %vm2369_vm10, %v9447_v2, %v2561_v12  ;;  %v2610_v28 = vmul.f32 0.01, %v9454_v56  ;;  %v4484_v35 = vpack.c.bf16 %v4292_v26, %v4292_v26 }
 0x35d   : > { %v4290_v14 = vmul.f32 0.125, %v3743_v57  ;;  %v4071_v48 = vrot.slane %v4070_v43, 1  ;;  %v3762_v30 = vadd.f32 %v3761_v33, %v3760_v54  ;;  %v4526_v52 = vpack.c.bf16 %v4334_v17, %v4334_v17 }
 0x35e   : > { %v4054_v9 = vadd.f32 %v4053_v44, %v4052_v45  ;;  %v3744_v0 = vsel %vm2812_vm3, %v2753_v38, 0.0  ;;  %v2802_v36 = vsel %vm2418_vm13, %v9454_v56, %v2610_v28  ;;  %v9794_v37 = vunpack.c.l.b16 %v4523_v1 }
 0x35f   : > { %v9796_v60 = vunpack.c.l.b16 %v4528_v27  ;;  %v4072_v23 = vadd.f32 %v4071_v48, %v4070_v43  ;;  %v3763_v2 = vrot.slane %v3762_v30, 1  ;;  %v4482_v21 = vpack.c.bf16 %v4290_v14, %v4290_v14  ;;  %v10403_v43 = vld [vmem:[#allocation38_spill] sm:$0xff] }
 0x360   : > { %v4055_v20 = vrot.slane %v4054_v9, 2  ;;  %v3745_v26 = vrot.slane %v3744_v0, 4  ;;  %v4087_v12 = vsel %vm2812_vm3, %v2802_v36, 0.0  ;;  %v9799_v54 = vunpack.c.l.b16 %v4484_v35 }
 0x361   : > { %v4337_v45 = vmul.f32 0.125, %v4072_v23  ;;  %v4088_v17 = vrot.slane %v4087_v12, 4  ;;  %vm2416_vm14 = vcmp.ge.f32.partialorder %v9458_v13, 0.0  ;;  %v5942_v57 = vunpack.c.l.b16 %v4526_v52 }
 0x362   : > { %v4056_v33 = vadd.f32 %v4055_v20, %v4054_v9  ;;  %v3746_v56 = vadd.f32 %v3745_v26, %v3744_v0  ;;  %v2608_v1 = vmul.f32 0.01, %v9458_v13  ;;  %v3764_v27 = vadd.f32 %v3763_v2, %v3762_v30  ;;  %v10404_v9 = vld [vmem:[#allocation39_spill] sm:$0xff] }
 0x363   : > { %v4089_v44 = vadd.f32 %v4088_v17, %v4087_v12  ;;  %vm2419_vm0 = vcmp.ge.f32.partialorder %v10403_v43, 0.0  ;;  %v2611_v38 = vmul.f32 0.01, %v10403_v43  ;;  %v9805_v28 = vunpack.c.l.b16 %v4482_v21 }
 0x364   : > { %v4057_v14 = vrot.slane %v4056_v33, 1  ;;  %v3747_v35 = vrot.slane %v3746_v56, 2  ;;  %v2800_v48 = vsel %vm2416_vm14, %v9458_v13, %v2608_v1  ;;  %v4529_v36 = vpack.c.bf16 %v4337_v45, %v4337_v45 }
 0x365   : > { %v4090_v23 = vrot.slane %v4089_v44, 2  ;;  %v4073_v52 = vsel %vm2812_vm3, %v2800_v48, 0.0  ;;  %vm2417_vm2 = vcmp.ge.f32.partialorder %v10404_v9, 0.0  ;;  %v2803_v2 = vsel %vm2419_vm0, %v10403_v43, %v2611_v38 }
 0x366   : > { %v4058_v0 = vadd.f32 %v4057_v14, %v4056_v33  ;;  %v3748_v20 = vadd.f32 %v3747_v35, %v3746_v56  ;;  %v4074_v30 = vrot.slane %v4073_v52, 4  ;;  %v4293_v26 = vmul.f32 0.125, %v3764_v27 }
 0x367   : > { %v4091_v12 = vadd.f32 %v4090_v23, %v4089_v44  ;;  %v4094_v21 = vsel %vm2812_vm3, %v2803_v2, 0.0  ;;  %v2609_v17 = vmul.f32 0.01, %v10404_v9  ;;  %vm2374_vm6 = vcmp.ge.f32.partialorder %v9488_v8, 0.0 }
 0x368   : > { %v4335_v7 = vmul.f32 0.125, %v4058_v0  ;;  %v3749_v47 = vrot.slane %v3748_v20, 1  ;;  %v4075_v13 = vadd.f32 %v4074_v30, %v4073_v52  ;;  %v4095_v45 = vrot.slane %v4094_v21, 4 }
 0x369   : > { %v4092_v1 = vrot.slane %v4091_v12, 1  ;;  %v2801_v48 = vsel %vm2417_vm2, %v10404_v9, %v2609_v17  ;;  %v2566_v33 = vmul.f32 0.01, %v9488_v8  ;;  %vm2372_vm7 = vcmp.ge.f32.partialorder %v9492_v11, 0.0 }
 0x36a   : > { %v4527_v56 = vpack.c.bf16 %v4335_v7, %v4335_v7  ;;  %v3750_v14 = vadd.f32 %v3749_v47, %v3748_v20  ;;  %v4076_v43 = vrot.slane %v4075_v13, 2  ;;  %v4096_v27 = vadd.f32 %v4095_v45, %v4094_v21 }
 0x36b   : > { %v4093_v44 = vadd.f32 %v4092_v1, %v4091_v12  ;;  %v4080_v38 = vsel %vm2812_vm3, %v2801_v48, 0.0  ;;  %v2758_v35 = vsel %vm2374_vm6, %v9488_v8, %v2566_v33  ;;  %v2564_v7 = vmul.f32 0.01, %v9492_v11 }
 0x36c   : > { %v5943_v23 = vunpack.c.l.b16 %v4527_v56  ;;  %v4291_v52 = vmul.f32 0.125, %v3750_v14  ;;  %v4077_v0 = vadd.f32 %v4076_v43, %v4075_v13  ;;  %v4097_v30 = vrot.slane %v4096_v27, 2 }
 0x36d   : > { %v4340_v9 = vmul.f32 0.125, %v4093_v44  ;;  %v4081_v2 = vrot.slane %v4080_v38, 4  ;;  %v3779_v17 = vsel %vm2812_vm3, %v2758_v35, 0.0  ;;  %v4485_v47 = vpack.c.bf16 %v4293_v26, %v4293_v26 }
 0x36e   : > { %v5965_v20 = vsel %vm4597_vm12, %v5943_v23, %v5942_v57  ;;  %v4078_v12 = vrot.slane %v4077_v0, 1  ;;  %v4098_v21 = vadd.f32 %v4097_v30, %v4096_v27  ;;  %v4483_v45 = vpack.c.bf16 %v4291_v52, %v4291_v52 }
 0x36f   : > { %v9824_v8 = vsel %vm4599_vm15, %v9796_v60, %v5965_v20  ;;  %v4082_v1 = vadd.f32 %v4081_v2, %v4080_v38  ;;  %v3780_v48 = vrot.slane %v3779_v17, 4  ;;  %v9826_v13 = vunpack.c.l.b16 %v4529_v36 }
 0x370   : > { %v4079_v33 = vadd.f32 %v4078_v12, %v4077_v0  ;;  %v4099_v56 = vrot.slane %v4098_v21, 1  ;;  %v2756_v14 = vsel %vm2372_vm7, %v9492_v11, %v2564_v7  ;;  %v4532_v26 = vpack.c.bf16 %v4340_v9, %v4340_v9 }
 0x371   : > { %v4083_v43 = vrot.slane %v4082_v1, 2  ;;  %v3781_v57 = vadd.f32 %v3780_v48, %v3779_v17  ;;  %v3765_v27 = vsel %vm2812_vm3, %v2756_v14, 0.0  ;;  %v9832_v44 = vunpack.c.l.b16 %v4485_v47 }
 0x372   : > { %v4338_v60 = vmul.f32 0.125, %v4079_v33  ;;  %v3766_v35 = vrot.slane %v3765_v27, 4  ;;  %vm2375_vm9 = vcmp.ge.f32.partialorder %v9500_v39, 0.0  ;;  %v5522_v38 = vunpack.c.l.b16 %v4483_v45 }
 0x373   : > { %v4084_v36 = vadd.f32 %v4083_v43, %v4082_v1  ;;  %v3782_v23 = vrot.slane %v3781_v57, 2  ;;  %v2567_v52 = vmul.f32 0.01, %v9500_v39  ;;  %v4100_v0 = vadd.f32 %v4099_v56, %v4098_v21 }
 0x374   : > { %v3767_v30 = vadd.f32 %v3766_v35, %v3765_v27  ;;  %vm2373_vm10 = vcmp.ge.f32.partialorder %v9514_v15, 0.0  ;;  %v2565_v11 = vmul.f32 0.01, %v9514_v15  ;;  %v9838_v9 = vunpack.c.l.b16 %v4532_v26 }
 0x375   : > { %v4085_v2 = vrot.slane %v4084_v36, 1  ;;  %v3783_v17 = vadd.f32 %v3782_v23, %v3781_v57  ;;  %v2759_v7 = vsel %vm2375_vm9, %v9500_v39, %v2567_v52  ;;  %v4530_v47 = vpack.c.bf16 %v4338_v60, %v4338_v60 }
 0x376   : > { %v3768_v20 = vrot.slane %v3767_v30, 2  ;;  %v3786_v12 = vsel %vm2812_vm3, %v2759_v7, 0.0  ;;  %vm2422_vm13 = vcmp.ge.f32.partialorder %v9571_v62, 0.0  ;;  %v2757_v48 = vsel %vm2373_vm10, %v9514_v15, %v2565_v11 }
 0x377   : > { %v4086_v45 = vadd.f32 %v4085_v2, %v4084_v36  ;;  %v3784_v1 = vrot.slane %v3783_v17, 1  ;;  %v3787_v21 = vrot.slane %v3786_v12, 4  ;;  %v9844_v33 = vmul.f32 0.125, %v4100_v0 }
 0x378   : > { %v3769_v56 = vadd.f32 %v3768_v20, %v3767_v30  ;;  %v3772_v14 = vsel %vm2812_vm3, %v2757_v48, 0.0  ;;  %v2614_v26 = vmul.f32 0.01, %v9571_v62  ;;  %v9848_v43 = vpop.f32.mrb[76].mxu1  ;;  %v5535_v23 = vsel %vm4601_vm5, %v9575_v61, %v9562_v4 }
 0x379   : > { %v9850_v39 = vmul.f32 0.125, %v4086_v45  ;;  %v3785_v57 = vadd.f32 %v3784_v1, %v3783_v17  ;;  %v3788_v27 = vadd.f32 %v3787_v21, %v3786_v12  ;;  %v3773_v60 = vrot.slane %v3772_v14, 4  ;;  %v9852_v35 = vpop.f32.mrb[77].mxu1 }
 0x37a   : > { %v3770_v36 = vrot.slane %v3769_v56, 1  ;;  %v2806_v15 = vsel %vm2422_vm13, %v9571_v62, %v2614_v26  ;;  %v5542_v52 = vsel %vm4601_vm5, %v9748_v63, %v9729_v18  ;;  %v7309_v0 = vpop.f32.mrb[78].mxu1  ;;  %v9863_v30 = vunpack.c.l.b16 %v4530_v47 }
 0x37b   : > { %v4296_v11 = vmul.f32 0.125, %v3785_v57  ;;  %v3789_v2 = vrot.slane %v3788_v27, 2  ;;  %v3774_v17 = vadd.f32 %v3773_v60, %v3772_v14  ;;  %v9865_v7 = vpop.f32.mrb[79].mxu1  ;;  %v4115_v12 = vsel %vm2812_vm3, %v2806_v15, 0.0 }
 0x37c   : > { %v3771_v20 = vadd.f32 %v3770_v36, %v3769_v56  ;;  %v5536_v62 = vsel %vm4603_vm8, %v9610_v25, %v5535_v23  ;;  %v5543_v4 = vsel %vm4603_vm8, %v9805_v28, %v5542_v52  ;;  %v4531_v61 = vpack.c.bf16 %v9850_v39, %v9850_v39  ;;  %v7576_v39 = vld [vmem:[%s10178_s3 + $0x30] sm:$0xff]  }
 0x37d   : > { %v4488_v18 = vpack.c.bf16 %v4296_v11, %v4296_v11  ;;  %v3790_v63 = vadd.f32 %v3789_v2, %v3788_v27  ;;  %v3775_v47 = vrot.slane %v3774_v17, 2  ;;  %v4116_v1 = vrot.slane %v4115_v12, 4 }
 0x37e   : > { %v4294_v45 = vmul.f32 0.125, %v3771_v20  ;;  %v5537_v21 = vsel %vm4605_vm11, %v9628_v53, %v5536_v62  ;;  %v5544_v48 = vsel %vm4605_vm11, %v5522_v38, %v5543_v4  ;;  %vm2420_vm14 = vcmp.ge.f32.partialorder %v9582_v34, 0.0  ;;  %v7575_v4 = vld [vmem:[%s10178_s3 + $0x28] sm:$0xff]  }
 0x37f   : > { %v5527_v56 = vunpack.c.l.b16 %v4488_v18  ;;  %v3791_v14 = vrot.slane %v3790_v63, 1  ;;  %v3776_v26 = vadd.f32 %v3775_v47, %v3774_v17  ;;  %v5538_v25 = vsel %vm4607_vm1, %v9588_v24, %v5537_v21 }
 0x380   : > { %v4486_v28 = vpack.c.bf16 %v4294_v45, %v4294_v45  ;;  %v4117_v57 = vadd.f32 %v4116_v1, %v4115_v12  ;;  %v5539_v60 = vsel %vm4609_vm4, %v9623_v59, %v5538_v25  ;;  %v5545_v27 = vsel %vm4607_vm1, %v9799_v54, %v5544_v48 }
 0x381   : > { %v3792_v36 = vadd.f32 %v3791_v14, %v3790_v63  ;;  %v3777_v15 = vrot.slane %v3776_v26, 1  ;;  %v5546_v53 = vsel %vm4609_vm4, %v9832_v44, %v5545_v27  ;;  %v2612_v24 = vmul.f32 0.01, %v9582_v34 }
 0x382   : > { %v5525_v38 = vunpack.c.l.b16 %v4486_v28  ;;  %v4118_v23 = vrot.slane %v4117_v57, 2  ;;  %v9886_v52 = vpack.c.b16 %v5546_v53, %v5539_v60  ;;  %vm2423_vm0 = vcmp.ge.f32.partialorder %v9597_v49, 0.0 }
 0x383   : > { %v4297_v0 = vmul.f32 0.125, %v3792_v36  ;;  %v3778_v11 = vadd.f32 %v3777_v15, %v3776_v26  ;;  %v2615_v59 = vmul.f32 0.01, %v9597_v49  ;;  %v2804_v44 = vsel %vm2420_vm14, %v9582_v34, %v2612_v24 }
 0x384   : > { %v4119_v54 = vadd.f32 %v4118_v23, %v4117_v57  ;;  %7324 = vmatprep.mubr.msk.bf16.mxu1 %vm2812_vm3, %v9886_v52  ;;  %vm2421_vm2 = vcmp.ge.f32.partialorder %v9601_v31, 0.0  ;;  %v2613_v2 = vmul.f32 0.01, %v9601_v31  ;;  %v4101_v12 = vsel %vm2812_vm3, %v2804_v44, 0.0 }
 0x385   : > { %v4489_v17 = vpack.c.bf16 %v4297_v0, %v4297_v0  ;;  %v4295_v20 = vmul.f32 0.125, %v3778_v11  ;;  %v2807_v62 = vsel %vm2423_vm0, %v9597_v49, %v2615_v59  ;;  %v4102_v63 = vrot.slane %v4101_v12, 4 }
 0x386   : > { %v4120_v18 = vrot.slane %v4119_v54, 1  ;;  %v4122_v47 = vsel %vm2812_vm3, %v2807_v62, 0.0  ;;  %v2805_v34 = vsel %vm2421_vm2, %v9601_v31, %v2613_v2  ;;  %vm2426_vm6 = vcmp.ge.f32.partialorder %v9605_v19, 0.0 }
 0x387   : > { %v5528_v45 = vunpack.c.l.b16 %v4489_v17  ;;  %v4487_v1 = vpack.c.bf16 %v4295_v20, %v4295_v20  ;;  %v4123_v21 = vrot.slane %v4122_v47, 4  ;;  %v4108_v48 = vsel %vm2812_vm3, %v2805_v34, 0.0 }
 0x388   : > { %v4121_v14 = vadd.f32 %v4120_v18, %v4119_v54  ;;  %v4103_v26 = vadd.f32 %v4102_v63, %v4101_v12  ;;  %v4109_v25 = vrot.slane %v4108_v48, 4  ;;  %v2618_v57 = vmul.f32 0.01, %v9605_v19 }
 0x389   : > { %v5526_v49 = vunpack.c.l.b16 %v4487_v1  ;;  %v4124_v28 = vadd.f32 %v4123_v21, %v4122_v47  ;;  %v5568_v60 = vand.u32 %v7575_v4, %v10379_v55  ;;  %vm2424_vm7 = vcmp.ge.f32.partialorder %v9608_v50, 0.0 }
 0x38a   : > { %v4344_v27 = vmul.f32 0.125, %v4121_v14  ;;  %v4104_v36 = vrot.slane %v4103_v26, 2  ;;  %v4110_v15 = vadd.f32 %v4109_v25, %v4108_v48  ;;  %v2810_v23 = vsel %vm2426_vm6, %v9605_v19, %v2618_v57 }
 0x38b   : > { %v5547_v31 = vsel %vm4597_vm12, %v5526_v49, %v5525_v38  ;;  %v4125_v53 = vrot.slane %v4124_v28, 2  ;;  %7322 = vmatprep.subr.bf16.mxu1 %v5568_v60  ;;  %v2616_v24 = vmul.f32 0.01, %v9608_v50  ;;  %v4143_v17 = vsel %vm2812_vm3, %v2810_v23, 0.0  ;;  %v10405_v38 = vld [vmem:[#allocation8_spill] sm:$0xff] }
 0x38c   : > { %v5548_v0 = vsel %vm4599_vm15, %v5527_v56, %v5547_v31  ;;  %v4536_v11 = vpack.c.bf16 %v4344_v27, %v4344_v27  ;;  %v4105_v59 = vadd.f32 %v4104_v36, %v4103_v26  ;;  %v4111_v54 = vrot.slane %v4110_v15, 2  ;;  %7323 = vmatpush3.bf16.msra.mxu1 %v5568_v60  ;;  %v10406_v27 = vld [vmem:[#allocation12_spill] sm:$0xff] }
 0x38d   : > { %v5549_v44 = vsel %vm4601_vm5, %v5528_v45, %v5548_v0  ;;  %v4126_v2 = vadd.f32 %v4125_v53, %v4124_v28  ;;  %v2808_v20 = vsel %vm2424_vm7, %v9608_v50, %v2616_v24  ;;  %7328 = vmatprep.subr.bf16.mxu1 %v10405_v38  ;;  %v4144_v4 = vrot.slane %v4143_v17, 4 }
 0x38e   : > { %v5952_v12 = vunpack.c.l.b16 %v4536_v11  ;;  %v4106_v19 = vrot.slane %v4105_v59, 1  ;;  %v4112_v62 = vadd.f32 %v4111_v54, %v4110_v15  ;;  %v4129_v56 = vsel %vm2812_vm3, %v2808_v20, 0.0  ;;  %v10407_v11 = vld [vmem:[#allocation13_spill] sm:$0xff] }
 0x38f   : > { %v4127_v18 = vrot.slane %v4126_v2, 1  ;;  %vm2427_vm9 = vcmp.ge.f32.partialorder %v9612_v58, 0.0  ;;  %v2619_v63 = vmul.f32 0.01, %v9612_v58  ;;  %v4145_v45 = vadd.f32 %v4144_v4, %v4143_v17  ;;  %v10408_v4 = vld [vmem:[#allocation26_spill] sm:$0xff] }
 0x390   : > { %v4107_v47 = vadd.f32 %v4106_v19, %v4105_v59  ;;  %v4113_v34 = vrot.slane %v4112_v62, 1  ;;  %v4130_v1 = vrot.slane %v4129_v56, 4  ;;  %vm2425_vm10 = vcmp.ge.f32.partialorder %v9616_v22, 0.0 }
 0x391   : > { %v4128_v21 = vadd.f32 %v4127_v18, %v4126_v2  ;;  %v2811_v50 = vsel %vm2427_vm9, %v9612_v58, %v2619_v63  ;;  %v2617_v48 = vmul.f32 0.01, %v9616_v22  ;;  %v4146_v25 = vrot.slane %v4145_v45, 2 }
 0x392   : > { %v4342_v14 = vmul.f32 0.125, %v4107_v47  ;;  %v4114_v26 = vadd.f32 %v4113_v34, %v4112_v62  ;;  %v4131_v49 = vadd.f32 %v4130_v1, %v4129_v56  ;;  %v4150_v57 = vsel %vm2812_vm3, %v2811_v50, 0.0 }
 0x393   : > { %v4345_v28 = vmul.f32 0.125, %v4128_v21  ;;  %v2809_v60 = vsel %vm2425_vm10, %v9616_v22, %v2617_v48  ;;  %v5550_v36 = vsel %vm4603_vm8, %v10406_v27, %v5549_v44  ;;  %v4147_v53 = vadd.f32 %v4146_v25, %v4145_v45  ;;  %v10409_v45 = vld [vmem:[#allocation7_spill] sm:$0xff]  ;;  %v10411_v27 = vld [vmem:[#allocation28_spill] sm:$0xff] }
 0x394   : > { %v4534_v15 = vpack.c.bf16 %v4342_v14, %v4342_v14  ;;  %v4343_v31 = vmul.f32 0.125, %v4114_v26  ;;  %v4132_v58 = vrot.slane %v4131_v49, 2  ;;  %v4151_v24 = vrot.slane %v4150_v57, 4 }
 0x395   : > { %v4537_v23 = vpack.c.bf16 %v4345_v28, %v4345_v28  ;;  %v4136_v0 = vsel %vm2812_vm3, %v2809_v60, 0.0  ;;  %v5551_v59 = vsel %vm4605_vm11, %v10407_v11, %v5550_v36  ;;  %v4148_v17 = vrot.slane %v4147_v53, 1  ;;  %v10410_v60 = vld [vmem:[#allocation27_spill] sm:$0xff] }
 0x396   : > { %v5950_v54 = vunpack.c.l.b16 %v4534_v15  ;;  %v4535_v2 = vpack.c.bf16 %v4343_v31, %v4343_v31  ;;  %v4133_v20 = vadd.f32 %v4132_v58, %v4131_v49  ;;  %v9929_v19 = vpop.f32.mrb[80].mxu1  ;;  %v4152_v62 = vadd.f32 %v4151_v24, %v4150_v57 }
 0x397   : > { %v5953_v22 = vunpack.c.l.b16 %v4537_v23  ;;  %v4137_v44 = vrot.slane %v4136_v0, 4  ;;  %v5552_v18 = vsel %vm4607_vm1, %v10408_v4, %v5551_v59  ;;  %v9933_v56 = vpop.f32.mrb[81].mxu1  ;;  %v4149_v47 = vadd.f32 %v4148_v17, %v4147_v53 }
 0x398   : > { %v5951_v63 = vunpack.c.l.b16 %v4535_v2  ;;  %v4134_v34 = vrot.slane %v4133_v20, 1  ;;  %v5553_v1 = vsel %vm4609_vm4, %v10409_v45, %v5552_v18  ;;  %v7315_v21 = vpop.f32.mrb[82].mxu1  ;;  %v4533_v50 = vpack.c.bf16 %v9844_v33, %v9844_v33  ;;  %v10412_v33 = vld [vmem:[#allocation15_spill] sm:$0xff]  ;;  %v10414_v2 = vld [vmem:[#allocation6_spill] sm:$0xff]  ;;  %v10419_v18 = vld [vmem:[#allocation36_spill] sm:$0xff] }
 0x399   : > { %v4153_v48 = vrot.slane %v4152_v62, 2  ;;  %v4138_v14 = vadd.f32 %v4137_v44, %v4136_v0  ;;  %v5555_v26 = vpack.c.b16 %v5553_v1, %v5553_v1  ;;  %v9939_v25 = vpop.f32.mrb[83].mxu1  ;;  %v4348_v28 = vmul.f32 0.125, %v4149_v47  ;;  %v10418_v44 = vld [vmem:[#allocation30_spill] sm:$0xff] }
 0x39a   : > { %v5972_v49 = vsel %vm4597_vm12, %v5951_v63, %v5950_v54  ;;  %v4135_v57 = vadd.f32 %v4134_v34, %v4133_v20  ;;  %v5770_v36 = vsel %vm4601_vm5, %v10411_v27, %v10410_v60  ;;  %v5947_v23 = vunpack.c.l.b16 %v4531_v61  ;;  %v10415_v61 = vld [vmem:[#allocation29_spill] sm:$0xff]  ;;  %v10416_v20 = vld [vmem:[#allocation20_spill] sm:$0xff] }
 0x39b   : > { %v5973_v15 = vsel %vm4599_vm15, %v5952_v12, %v5972_v49  ;;  %v4154_v31 = vadd.f32 %v4153_v48, %v4152_v62  ;;  %v4139_v53 = vrot.slane %v4138_v14, 2  ;;  %7325 = vmatmul.mubr.msk.bf16.vlgmr.msra.gmra.mrb[88].mxu1 %vm2812_vm3, %v5555_v26  ;;  %v5771_v58 = vsel %vm4603_vm8, %v10412_v33, %v5770_v36  ;;  %v10413_v12 = vld [vmem:[#allocation18_spill] sm:$0xff]  ;;  %v10420_v48 = vld [vmem:[#allocation25_spill] sm:$0xff] }
 0x39c   : > { %v4346_v24 = vmul.f32 0.125, %v4135_v57  ;;  %v5974_v0 = vsel %vm4601_vm5, %v5953_v22, %v5973_v15  ;;  %7329 = vmatpush3.bf16.msra.mxu1 %v10405_v38  ;;  %7330 = vmatprep.mubr.msk.bf16.mxu1 %vm2812_vm3, %v9886_v52  ;;  %v5772_v11 = vsel %vm4605_vm11, %v10413_v12, %v5771_v58  ;;  %v10417_v22 = vld [vmem:[#allocation19_spill] sm:$0xff]  ;;  %v4540_v62 = vpack.c.bf16 %v4348_v28, %v4348_v28  ;;  %v10421_v36 = vld [vmem:[#allocation37_spill] sm:$0xff] }
 0x39d   : > { %v4155_v59 = vrot.slane %v4154_v31, 1  ;;  %v4140_v54 = vadd.f32 %v4139_v53, %v4138_v14  ;;  %7334 = vmatprep.subr.bf16.mxu1 %v10414_v2  ;;  %v5773_v17 = vsel %vm4607_vm1, %v10415_v61, %v5772_v11  ;;  %v5777_v38 = vsel %vm4601_vm5, %v10417_v22, %v10416_v20  ;;  %v10430_v22 = vld [vmem:[#allocation5_spill] sm:$0xff] }
 0x39e   : > { %v4538_v52 = vpack.c.bf16 %v4346_v24, %v4346_v24  ;;  %v5774_v4 = vsel %vm4609_vm4, %v10418_v44, %v5773_v17  ;;  %v5778_v63 = vsel %vm4603_vm8, %v10419_v18, %v5777_v38  ;;  %v5787_v1 = vsel %vm4607_vm1, %v9656_v5, %v9647_v51  ;;  %v10424_v24 = vld [vmem:[#allocation10_spill] sm:$0xff]  ;;  %v10433_v44 = vld [vmem:[#allocation21_spill] sm:$0xff] }
 0x39f   : > { %v4156_v47 = vadd.f32 %v4155_v59, %v4154_v31  ;;  %v4141_v34 = vrot.slane %v4140_v54, 1  ;;  %v5779_v45 = vsel %vm4605_vm11, %v9498_v29, %v5778_v63  ;;  %v5788_v49 = vsel %vm4609_vm4, %v9663_v16, %v5787_v1  ;;  %v10422_v31 = vld [vmem:[#allocation9_spill] sm:$0xff]  ;;  %v10426_v59 = vld [vmem:[#allocation14_spill] sm:$0xff]  ;;  %v10435_v63 = vld [vmem:[#allocation23_spill] sm:$0xff] }
 0x3a0   : > { %v5954_v21 = vunpack.c.l.b16 %v4538_v52  ;;  %v5780_v14 = vsel %vm4607_vm1, %v10420_v48, %v5779_v45  ;;  %v4821_v28 = vadd.f32 %v9677_v3, %v9651_v6  ;;  %v5803_v27 = vand.u32 %v7576_v39, %v10379_v55  ;;  %v10429_v17 = vld [vmem:[#allocation42_spill] sm:$0xff]  ;;  %v10437_v1 = vld [vmem:[#allocation41_spill] sm:$0xff] }
 0x3a1   : > { %v4349_v57 = vmul.f32 0.125, %v4156_v47  ;;  %v4142_v60 = vadd.f32 %v4141_v34, %v4140_v54  ;;  %v5781_v29 = vsel %vm4609_vm4, %v10421_v36, %v5780_v14  ;;  %v5949_v15 = vunpack.c.l.b16 %v4533_v50  ;;  %v10423_v50 = vld [vmem:[#allocation40_spill] sm:$0xff]  ;;  %v10427_v54 = vld [vmem:[#allocation17_spill] sm:$0xff] }
 0x3a2   : > { %v5975_v51 = vsel %vm4603_vm8, %v5954_v21, %v5974_v0  ;;  %v5789_v5 = vpack.c.b16 %v5781_v29, %v5774_v4  ;;  %v4813_v53 = vadd.f32 %v10422_v31, %v9654_v40  ;;  %v5960_v6 = vsel %vm4601_vm5, %v9725_v42, %v9714_v46  ;;  %v10425_v0 = vld [vmem:[#allocation11_spill] sm:$0xff]  ;;  %v10434_v4 = vld [vmem:[#allocation22_spill] sm:$0xff]  ;;  %v10436_v34 = vld [vmem:[#allocation24_spill] sm:$0xff] }
 0x3a3   : > { %v4541_v33 = vpack.c.bf16 %v4349_v57, %v4349_v57  ;;  %v4347_v58 = vmul.f32 0.125, %v4142_v60  ;;  %7331 = vmatmul.mubr.msk.bf16.vlgmr.msra.gmra.mrb[92].mxu1 %vm2812_vm3, %v5555_v26  ;;  %v5967_v16 = vsel %vm4601_vm5, %v9826_v13, %v9824_v8  ;;  %v5956_v3 = vunpack.c.l.b16 %v4540_v62  ;;  %v10438_v60 = vld [vmem:[#allocation32_spill] sm:$0xff] }
 0x3a4   : > { %7335 = vmatpush3.bf16.msra.mxu1 %v10414_v2  ;;  %7336 = vmatprep.mubr.msk.bf16.mxu1 %vm2812_vm3, %v10423_v50  ;;  %v5961_v40 = vsel %vm4603_vm8, %v9757_v10, %v5960_v6  ;;  %v5968_v26 = vsel %vm4603_vm8, %v9863_v30, %v5967_v16  ;;  %v4816_v12 = vadd.f32 %v10425_v0, %v10424_v24  ;;  %v10428_v2 = vld [vmem:[#allocation31_spill] sm:$0xff]  ;;  %v7578_v24 = vld [vmem:[%s10182_s7] sm:$0xff]   ;;  %vm7650_vm0 = vmmov 0  }
 0x3a5   : > { %v5957_v46 = vunpack.c.l.b16 %v4541_v33  ;;  %v4539_v42 = vpack.c.bf16 %v4347_v58, %v4347_v58  ;;  %7340 = vmatprep.subr.bf16.mxu1 %v5803_v27  ;;  %v5962_v8 = vsel %vm4605_vm11, %v9794_v37, %v5961_v40  ;;  %v5969_v13 = vsel %vm4605_vm11, %v5947_v23, %v5968_v26  ;;  %v10431_v23 = vld [vmem:[#allocation33_spill] sm:$0xff] }
 0x3a6   : > { %v5963_v11 = vsel %vm4607_vm1, %v9750_v32, %v5962_v8  ;;  %v5970_v10 = vsel %vm4607_vm1, %v9838_v9, %v5969_v13  ;;  %v4936_v30 = vadd.f32 %v9716_v41, %v10426_v59  ;;  %v4928_v39 = vadd.f32 %v10428_v2, %v10427_v54  ;;  %v10432_v32 = vld [vmem:[#allocation34_spill] sm:$0xff] }
 0x3a7   : > { %v5955_v61 = vunpack.c.l.b16 %v4539_v42  ;;  %v5964_v20 = vsel %vm4609_vm4, %v10429_v17, %v5963_v11  ;;  %v5971_v37 = vsel %vm4609_vm4, %v5949_v15, %v5970_v10  ;;  %v4931_v38 = vadd.f32 %v10431_v23, %v10430_v22  ;;  %v7579_v42 = vld [vmem:[%s10182_s7 + $0x8] sm:$0xff]  }
 0x3a8   : > { %v5979_v62 = vpack.c.b16 %v5971_v37, %v5964_v20  ;;  %v5079_v52 = vadd.f32 %v10432_v32, %v4821_v28  ;;  %v5077_v9 = vadd.f32 %v10433_v44, %v4813_v53  ;;  %v5078_v18 = vadd.f32 %v10434_v4, %v4816_v12 }
 0x3a9   : > { %v5976_v41 = vsel %vm4605_vm11, %v5955_v61, %v5975_v51  ;;  %v5141_v47 = vadd.f32 %v10435_v63, %v4936_v30  ;;  %v5139_v45 = vadd.f32 %v10436_v34, %v4928_v39  ;;  %v5140_v21 = vadd.f32 %v10437_v1, %v4931_v38 }
 0x3aa   : > { %v5977_v48 = vsel %vm4607_vm1, %v5956_v3, %v5976_v41  ;;  %v5280_v14 = vadd.f32 %v9848_v43, %v5079_v52  ;;  %v5278_v57 = vadd.f32 %v9852_v35, %v5077_v9  ;;  %v5279_v28 = vadd.f32 %v9865_v7, %v5078_v18  ;;  %v10439_v43 = vld [vmem:[#allocation16_spill] sm:$0xff] }
 0x3ab   : > { %7337 = vmatmul.mubr.msk.bf16.vlgmr.msra.gmra.mrb[96].mxu1 %vm2812_vm3, %v10438_v60  ;;  %v5978_v36 = vsel %vm4609_vm4, %v5957_v46, %v5977_v48  ;;  %v10035_v29 = vadd.f32 %v9929_v19, %v5141_v47  ;;  %v5340_v15 = vadd.f32 %v9933_v56, %v5139_v45  ;;  %v5341_v51 = vadd.f32 %v9939_v25, %v5140_v21  ;;  %v7577_v35 = vld [vmem:[%s10178_s3 + $0x38] sm:$0xff]   ;;  %v10058_v25 = vld [vmem:[%s10181_s6] ss:$0 sm:$0xff] }
 0x3ac   : > { %7341 = vmatpush3.bf16.msra.mxu1 %v5803_v27  ;;  %7342 = vmatprep.mubr.msk.bf16.mxu1 %vm2812_vm3, %v5789_v5  ;;  %v5790_v7 = vpack.c.b16 %v5788_v49, %v5788_v49  ;;  %v5993_v31 = vand.u32 %v7577_v35, %v10379_v55  ;;  %v10440_v19 = vld [vmem:[#allocation35_spill] sm:$0xff]  ;;  %v5980_v56 = vpack.c.b16 %v5978_v36, %v5978_v36  ;;  %v6878_v60 = vld [vmem:[%s10179_s4] ss:$0 sm:$0xff]  ;;  %vm6370_vm2 = vcmask 1043456  }
 0x3ad   : > { %7346 = vmatprep.subr.bf16.mxu1 %v10439_v43  ;;  %v6124_v49 = vadd.f32 %v10058_v25, %v5341_v51  ;;  %v6123_v27 = vadd.f32 %v10058_v25, %v5340_v15  ;;  %v6164_v46 = vand.u32 %v7578_v24, %v10379_v55  ;;  %v10076_v8 = vand.u32 %v7579_v42, %v10379_v55 }
 0x3ae   : > { %vm6366_vm6 = vcmask 195584   ;;  %vm6543_vm9 = vcmask 8192  }
 0x3af   : > { %vm6127_vm12 = vcmp.ge.f32.partialorder %v6124_v49, 0.0  ;;  %v6129_v53 = vmul.f32 0.01, %v6123_v27  ;;  %vm6126_vm15 = vcmp.ge.f32.partialorder %v6123_v27, 0.0 }
 0x3b1   : > { %v10064_v58 = vsel %vm6126_vm15, %v6123_v27, %v6129_v53 }
 0x3b3   : > { %7343 = vmatmul.mubr.msk.bf16.vlgmr.msra.gmra.mrb[100].mxu1 %vm2812_vm3, %v5790_v7 }
 0x3b4   : > { %7347 = vmatpush3.bf16.msra.mxu1 %v10439_v43  ;;  %7348 = vmatprep.mubr.msk.bf16.mxu1 %vm2812_vm3, %v5789_v5  ;;  %v6130_v5 = vmul.f32 0.01, %v6124_v49 }
 0x3b5   : > { %7352 = vmatprep.subr.bf16.mxu1 %v5993_v31 }
 0x3b6   : > { %v10062_v33 = vsel %vm6127_vm12, %v6124_v49, %v6130_v5 }
 0x3b7   : > { %v6223_v6 = vpack.c.bf16 %v10062_v33, %v10064_v58 }
 0x3bb   : > { %7349 = vmatmul.mubr.msk.bf16.vlgmr.msra.gmra.mrb[104].mxu1 %vm2812_vm3, %v5790_v7 }
 0x3bc   : > { %7353 = vmatpush3.bf16.msra.mxu1 %v5993_v31  ;;  %7354 = vmatprep.mubr.msk.bf16.mxu1 %vm2812_vm3, %v5979_v62 }
 0x3bd   : > { %7358 = vmatprep.subr.bf16.mxu1 %v10440_v19 }
 0x3c3   : > { %7355 = vmatmul.mubr.msk.bf16.vlgmr.msra.gmra.mrb[108].mxu1 %vm2812_vm3, %v5980_v56 }
 0x3c4   : > { %7360 = vmatprep.mubr.msk.bf16.mxu1 %vm2812_vm3, %v5979_v62  ;;  %7359 = vmatpush3.bf16.msra.mxu1 %v10440_v19 }
 0x3c5   : > { %7364 = vmatprep.subr.bf16.mxu1 %v6164_v46 }
 0x3cb   : > { %7361 = vmatmul.mubr.msk.bf16.vlgmr.msra.gmra.mrb[112].mxu1 %vm2812_vm3, %v5980_v56 }
 0x3cc   : > { %7365 = vmatpush3.bf16.msra.mxu1 %v6164_v46 }
 0x3cd   : > { %7370 = vmatprep.subr.bf16.mxu1 %v10076_v8 }
 0x41e   : > { %v7320_v16 = vpop.f32.mrb[84].mxu1 }
 0x41f   : > { %v5481_v3 = vadd.f32 %v7320_v16, %v5280_v14  ;;  %v5465_v50 = vpop.f32.mrb[85].mxu1  ;;  %v7580_v16 = vld [vmem:[%s10182_s7 + $0x10] sm:$0xff]  }
 0x420   : > { %v5479_v40 = vadd.f32 %v5465_v50, %v5278_v57  ;;  %v7321_v26 = vpop.f32.mrb[86].mxu1 }
 0x421   : > { %v5468_v0 = vpop.f32.mrb[87].mxu1 }
 0x422   : > { %v5480_v12 = vadd.f32 %v5468_v0, %v5279_v28 }
 0x46e   : > { %v7326_v13 = vpop.f32.mrb[88].mxu1 }
 0x46f   : > { %v5620_v11 = vadd.f32 %v7326_v13, %v5481_v3  ;;  %v5604_v10 = vpop.f32.mrb[89].mxu1 }
 0x470   : > { %v5618_v59 = vadd.f32 %v5604_v10, %v5479_v40  ;;  %v7327_v30 = vpop.f32.mrb[90].mxu1 }
 0x471   : > { %v5607_v54 = vpop.f32.mrb[91].mxu1  ;;  %v6125_v30 = vadd.f32 %v10058_v25, %v10035_v29 }
 0x472   : > { %v5619_v2 = vadd.f32 %v5607_v54, %v5480_v12 }
 0x473   : > { %vm6128_vm13 = vcmp.ge.f32.partialorder %v6125_v30, 0.0 }
 0x476   : > { %v7332_v39 = vpop.f32.mrb[92].mxu1 }
 0x477   : > { %v5655_v61 = vpop.f32.mrb[93].mxu1 }
 0x478   : > { %v7333_v17 = vpop.f32.mrb[94].mxu1 }
 0x479   : > { %v5658_v20 = vpop.f32.mrb[95].mxu1 }
 0x47e   : > { %v7338_v37 = vpop.f32.mrb[96].mxu1 }
 0x47f   : > { %v5712_v22 = vadd.f32 %v7338_v37, %v7332_v39  ;;  %v5703_v23 = vpop.f32.mrb[97].mxu1 }
 0x480   : > { %v5704_v38 = vadd.f32 %v5703_v23, %v5655_v61  ;;  %v7339_v62 = vpop.f32.mrb[98].mxu1  ;;  %v6131_v61 = vmul.f32 0.01, %v6125_v30 }
 0x481   : > { %v5706_v32 = vpop.f32.mrb[99].mxu1 }
 0x482   : > { %v5707_v52 = vadd.f32 %v5706_v32, %v5658_v20  ;;  %v6134_v37 = vsel %vm6128_vm13, %v6125_v30, %v6131_v61 }
 0x486   : > { %v7344_v44 = vpop.f32.mrb[100].mxu1 }
 0x487   : > { %v5855_v9 = vadd.f32 %v7344_v44, %v5620_v11  ;;  %v5839_v4 = vpop.f32.mrb[101].mxu1 }
 0x488   : > { %v5853_v18 = vadd.f32 %v5839_v4, %v5618_v59  ;;  %v7345_v41 = vpop.f32.mrb[102].mxu1  ;;  %v6310_v59 = vand.u32 %v7580_v16, %v10379_v55 }
 0x489   : > { %v5842_v63 = vpop.f32.mrb[103].mxu1 }
 0x48a   : > { %v5854_v47 = vadd.f32 %v5842_v63, %v5619_v2 }
 0x48e   : > { %v7350_v34 = vpop.f32.mrb[104].mxu1 }
 0x48f   : > { %v5906_v45 = vadd.f32 %v7350_v34, %v5712_v22  ;;  %v5890_v1 = vpop.f32.mrb[105].mxu1  ;;  %v6224_v22 = vpack.c.bf16 %v6134_v37, %v6134_v37  ;;  %v7581_v34 = vld [vmem:[%s10184_s9] sm:$0xff]  }
 0x490   : > { %v5904_v21 = vadd.f32 %v5890_v1, %v5704_v38  ;;  %v7351_v48 = vpop.f32.mrb[106].mxu1 }
 0x491   : > { %v5893_v14 = vpop.f32.mrb[107].mxu1 }
 0x492   : > { %v5905_v57 = vadd.f32 %v5893_v14, %v5707_v52 }
 0x496   : > { %v7356_v28 = vpop.f32.mrb[108].mxu1 }
 0x497   : > { %v6045_v36 = vadd.f32 %v7356_v28, %v5855_v9  ;;  %v6029_v15 = vpop.f32.mrb[109].mxu1 }
 0x498   : > { %v6043_v51 = vadd.f32 %v6029_v15, %v5853_v18  ;;  %v7357_v43 = vpop.f32.mrb[110].mxu1 }
 0x499   : > { %v6106_v35 = vadd.f32 %v6878_v60, %v6045_v36  ;;  %v6032_v7 = vpop.f32.mrb[111].mxu1 }
 0x49a   : > { %v6104_v31 = vadd.f32 %v6878_v60, %v6043_v51  ;;  %v6044_v19 = vadd.f32 %v6032_v7, %v5854_v47  ;;  %v6363_v47 = vld [vmem:[%s10177_s2] sm:$0xf] }
 0x49b   : > { %v6112_v56 = vmul.f32 0.01, %v6106_v35  ;;  %vm6109_vm5 = vcmp.ge.f32.partialorder %v6106_v35, 0.0 }
 0x49c   : > { %v6110_v49 = vmul.f32 0.01, %v6104_v31  ;;  %v6105_v27 = vadd.f32 %v6878_v60, %v6044_v19  ;;  %vm6107_vm8 = vcmp.ge.f32.partialorder %v6104_v31, 0.0 }
 0x49d   : > { %v6115_v3 = vsel %vm6109_vm5, %v6106_v35, %v6112_v56  ;;  %v7583_v56 = vld [vmem:[%s10186_s11 + $0x8] sm:$0xff]  }
 0x49e   : > { %vm6108_vm11 = vcmp.ge.f32.partialorder %v6105_v27, 0.0  ;;  %v6111_v5 = vmul.f32 0.01, %v6105_v27  ;;  %v7362_v53 = vpop.f32.mrb[112].mxu1  ;;  %v6113_v26 = vsel %vm6107_vm8, %v6104_v31, %v6110_v49  ;;  %v6149_v13 = vpack.c.bf16 %v6115_v3, %v6115_v3  ;;  %v6428_v49 = vld [vmem:[%s10185_s10] sm:$0x1] }
 0x49f   : > { %v6096_v50 = vadd.f32 %v7362_v53, %v5906_v45  ;;  %v6080_v40 = vpop.f32.mrb[113].mxu1  ;;  %v6438_v45 = vand.u32 %v7581_v34, %v10379_v55  ;;  %v7582_v55 = vld [vmem:[%s10186_s11] sm:$0xff]  }
 0x4a0   : > { %v6114_v24 = vsel %vm6108_vm11, %v6105_v27, %v6111_v5  ;;  %v6094_v0 = vadd.f32 %v6080_v40, %v5904_v21  ;;  %v7363_v12 = vpop.f32.mrb[114].mxu1 }
 0x4a1   : > { %v6083_v46 = vpop.f32.mrb[115].mxu1  ;;  %v6148_v42 = vpack.c.bf16 %v6114_v24, %v6113_v26  ;;  %v6137_v23 = vadd.f32 %v10058_v25, %v6096_v50  ;;  %v6486_v26 = vld [vmem:[%s10187_s12] sm:$0x1] }
 0x4a2   : > { %v6135_v11 = vadd.f32 %v10058_v25, %v6094_v0  ;;  %v6095_v10 = vadd.f32 %v6083_v46, %v5905_v57 }
 0x4a3   : > { %7366 = vmatprep.mubr.msk.bf16.mxu1 %vm2812_vm3, %v6148_v42  ;;  %v6143_v33 = vmul.f32 0.01, %v6137_v23  ;;  %vm6140_vm14 = vcmp.ge.f32.partialorder %v6137_v23, 0.0 }
 0x4a4   : > { %v6141_v54 = vmul.f32 0.01, %v6135_v11  ;;  %v6136_v2 = vadd.f32 %v10058_v25, %v6095_v10  ;;  %7367 = vmatmul.mubr.msk.bf16.vlgmr.msra.gmra.mrb[116].mxu1 %vm2812_vm3, %v6149_v13  ;;  %vm6138_vm1 = vcmp.ge.f32.partialorder %v6135_v11, 0.0  ;;  %v6883_v25 = vld [vmem:[%s10183_s8] ss:$0 sm:$0xff] }
 0x4a5   : > { %7371 = vmatpush3.bf16.msra.mxu1 %v10076_v8  ;;  %7372 = vmatprep.mubr.msk.bf16.mxu1 %vm2812_vm3, %v6223_v6  ;;  %v6146_v58 = vsel %vm6140_vm14, %v6137_v23, %v6143_v33  ;;  %v7649_v8 = vmov 0.0  }
 0x4a6   : > { %vm6139_vm4 = vcmp.ge.f32.partialorder %v6136_v2, 0.0  ;;  %v6142_v39 = vmul.f32 0.01, %v6136_v2  ;;  %7376 = vmatprep.subr.bf16.mxu1 %v6310_v59  ;;  %v6144_v29 = vsel %vm6138_vm1, %v6135_v11, %v6141_v54  ;;  %v6294_v6 = vpack.c.bf16 %v6146_v58, %v6146_v58 }
 0x4a8   : > { %v6145_v17 = vsel %vm6139_vm4, %v6136_v2, %v6142_v39 }
 0x4a9   : > { %v6293_v20 = vpack.c.bf16 %v6145_v17, %v6144_v29 }
 0x4b0   : > { %7373 = vmatmul.mubr.msk.bf16.vlgmr.msra.gmra.mrb[116].mxu1 %vm2812_vm3, %v6224_v22 }
 0x4b1   : > { %7377 = vmatpush3.bf16.msra.mxu1 %v6310_v59  ;;  %7378 = vmatprep.mubr.msk.bf16.mxu1 %vm2812_vm3, %v6293_v20 }
 0x4b2   : > { %7382 = vmatprep.subr.bf16.mxu1 %v7649_v8 }
 0x4bc   : > { %7379 = vmatmul.mubr.msk.bf16.vlgmr.msra.gmra.mrb[116].mxu1 %vm2812_vm3, %v6294_v6 }
 0x4bd   : > { %7386 = vmatprep.mubr.msk.bf16.mxu1 %vm7650_vm0, %v7649_v8 }
 0x58f   : > { %v7380_v38 = vpop.f32.mrb[116].mxu1 }
 0x590   : > { %v6346_v62 = vpop.f32.mrb[117].mxu1  ;;  %v7412_v52 = vadd.f32 %v7380_v38, %v6883_v25 }
 0x591   : > { %v7381_v32 = vpop.f32.mrb[118].mxu1  ;;  %v7413_v9 = vadd.f32 %v6883_v25, %v6346_v62 }
 0x592   : > { %v6349_v44 = vpop.f32.mrb[119].mxu1  ;;  %v6365_v41 = vpack.c.bf16 %v7412_v52, %v7412_v52 }
 0x593   : > { %v7414_v4 = vadd.f32 %v6883_v25, %v6349_v44 }
 0x594   : > { %v6372_v63 = vsel %vm6370_vm2, %v6365_v41, 0 }
 0x595   : > { %v6364_v18 = vpack.c.bf16 %v7414_v4, %v7413_v9 }
 0x597   : > { %7383 = vmatpush3.bf16.msra.mxu1 %v6364_v18 }
 0x598   : > { %7384 = vmatprep.subr.bf16.mxu1 %v7649_v8 }
 0x59b   : > { %7385 = vmatpush3.bf16.msra.mxu1 %v6372_v63 }
 0x59c   : > { %7390 = vmatprep.subr.bf16.mxu1 %v7649_v8 }
 0x59e   : > { %7387 = vmatmul.mubr.msk.bf16.vlgmr.msra.gmra.mrb[120].mxu1 %vm6366_vm6, %v6363_v47 }
 0x59f   : > { %7392 = vmatprep.mubr.msk.bf16.mxu1 %vm7650_vm0, %v7649_v8  ;;  %7391 = vmatpush3.bf16.msra.mxu1 %v6438_v45 }
 0x5a0   : > { %7396 = vmatprep.subr.bf16.mxu1 %v7649_v8 }
 0x671   : > { %v6408_v1 = vpop.f32.mrb[120].mxu1 }
 0x672   : > { %vm6414_vm7 = vcmp.ge.f32.partialorder %v6408_v1, 0.0  ;;  %v6415_v21 = vmul.f32 0.01, %v6408_v1  ;;  %v7388_v48 = vpop.f32.mrb[121].mxu1 }
 0x673   : > { %v6411_v14 = vpop.f32.mrb[122].mxu1 }
 0x674   : > { %v6416_v57 = vsel %vm6414_vm7, %v6408_v1, %v6415_v21  ;;  %v7389_v28 = vpop.f32.mrb[123].mxu1 }
 0x675   : > { %v6417_v60 = vsel %vm2812_vm3, %v6416_v57, 0.0 }
 0x676   : > { %v6418_v36 = vrot.slane %v6417_v60, 4 }
 0x678   : > { %v6419_v15 = vadd.f32 %v6418_v36, %v6417_v60 }
 0x67a   : > { %v6420_v51 = vrot.slane %v6419_v15, 2 }
 0x67c   : > { %v6421_v43 = vadd.f32 %v6420_v51, %v6419_v15 }
 0x67e   : > { %v6422_v35 = vrot.slane %v6421_v43, 1 }
 0x680   : > { %v6423_v7 = vadd.f32 %v6422_v35, %v6421_v43 }
 0x682   : > { %v6424_v31 = vmul.f32 0.125, %v6423_v7 }
 0x684   : > { %v6425_v19 = vpack.c.bf16 %v6424_v31, %v6424_v31 }
 0x686   : > { %7393 = vmatmul.mubr.msk.bf16.vlgmr.msra.gmra.mrb[124].mxu1 %vm2812_vm3, %v6425_v19  ;;  %vm6499_vm3 = vcmask 261120  }
 0x687   : > { %7400 = vmatprep.mubr.msk.bf16.mxu1 %vm7650_vm0, %v7649_v8  ;;  %7397 = vmatpush3.bf16.msra.mxu1 %v7582_v55 }
 0x688   : > { %7398 = vmatprep.subr.bf16.mxu1 %v7649_v8 }
 0x68b   : > { %7399 = vmatpush3.bf16.msra.mxu1 %v7583_v56 }
 0x759   : > { %v6474_v27 = vpop.f32.mrb[124].mxu1 }
 0x75a   : > { %v6475_v5 = vadd.f32 %v6474_v27, %v6428_v49  ;;  %v7394_v53 = vpop.f32.mrb[125].mxu1 }
 0x75b   : > { %v6477_v16 = vpop.f32.mrb[126].mxu1 }
 0x75c   : > { %v6480_v3 = vmax.f32 %v6475_v5, 0.0  ;;  %v7395_v50 = vpop.f32.mrb[127].mxu1 }
 0x75e   : > { %v6481_v40 = vpack.c.bf16 %v6480_v3, %v6480_v3 }
 0x760   : > { %7401 = vmatmul.mubr.msk.bf16.vlgmr.msra.gmra.mrb[128].mxu1 %vm6499_vm3, %v6481_v40 }
 0x833   : > { %v6537_v24 = vpop.f32.mrb[128].mxu1 }
 0x834   : > { %v6538_v0 = vadd.f32 %v6537_v24, %v6486_v26  ;;  %v7402_v12 = vpop.f32.mrb[129].mxu1 }
 0x835   : > { %v6540_v46 = vpop.f32.mrb[130].mxu1 }
 0x836   : > { %v7403_v42 = vpop.f32.mrb[131].mxu1  ;;  %6544 = vst.msk [vmem:[%s432_s16] sm:$0x1] %vm6543_vm9, %v6538_v0 }
 0x837   : > { %7597 = shalt.err (!%p7594_p3)
}
 0x838   : > { %s7598_s23 = scalar_lea.hbm %s10133_s0, 16  ;;  %s7602_s22 = scalar_lea.hbm %s10188_s13, 32 }
 0x839   : > { %p7599_p4 = scmp.ne.s32.totalorder %s10133_s0, %s7598_s23  ;;  %p7603_p9 = scmp.lt.u32.totalorder %s10133_s0, %s10188_s13 }
 0x83a   : > { %p7604_p10 = scmp.lt.u32.totalorder %s7602_s22, %s7598_s23  ;;  %p7606_p12 = scmp.lt.u32.totalorder %s7598_s23, %s10133_s0 }
 0x83b   : > { %p7600_p7 = pnand %p7599_p4, %p7760_p5 }
 0x83c   : > { %p7605_p11 = por %p7604_p10, %p7603_p9 }
 0x83d   : > { %p7601_p8 = pneg %p7600_p7 }
 0x83e   : > { %p7607_p13 = por %p7606_p12, %p7605_p11 }
 0x840   : > { %p7608_p0 = pnand %p7607_p13, %p7601_p8 }
 0x842   : > { %7611 = shalt.err (!%p7608_p0)
}
 0x843   : > { %7424 = dma.vmem_to_hbm [thread:$0]  (%p7760_p5), %s10135_s20, 16, %s10133_s0, %s6546_s29  }
 0x844 PF: > { %p7430_p1 = scmp.ge.s32.totalorder %s7646_s28, 2  ;;  %s6570_s24 = sand.u32 1, %s7634_s25  }
 0x845   : > { %s6571_s21 = scalar_lea.sflag [#allocation3], %s6570_s24 }
 0x846   : > { %p7427_p2 = pnand %p7430_p1, %p7764_p6 }
 0x848   : > { %7629 = dma.done.wait (!%p7427_p2), %s6571_s21, 16  }
 0x849   : > { %7631 = vsyncadd (!%p7427_p2), %s6571_s21, 4294967280  ;;  %p23_p3 = scmp.ge.s32.totalorder %s7747_s14, 4   ;;  %s10441_s25 = smov %s7638_s26 }
 0x84a   : > { %s10442_s26 = smov %s7642_s27  ;;  %s10443_s27 = smov %s7758_s17 }
 0x84b   : > { %s10444_s28 = smov %s7747_s14  ;;  %25 = sbr.rel (!%p23_p3) target bundleno = 6 (0x6), region = 119 }
 0x852   :  { %6575 = vsyncpa [#allocation3], 1 }
 0x853   :  { %6577 = vsyncpa [#allocation3 + $0x1], 1 }

</bundles_post_ra>
